<compile_context>
chip_gen: v5e
topology: v5e:2x2
jax: 0.10.0
libtpu: 0.0.40
codegen_flags: <defaults>
</compile_context>

<pallas_src>
import math

import numpy as np
import jax
import jax.numpy as jnp
from jax.experimental import pallas as pl
from jax.experimental.pallas import tpu as pltpu


def _cdiv(a: int, b: int) -> int:
    return -(-a // b)


def _round_up(a: int, b: int) -> int:
    return _cdiv(a, b) * b


def _make_kernel(three_way: bool):
    def kernel(x_ref, s_ref, phase_ref, idmask_ref, o_ref):
        # x_ref:      (tm, w_in)    packed input rows
        # s_ref:      (w_in, w_out) bf16 block-diagonal scale/selection matrix
        # phase_ref:  (1, w_out)    0 on sin columns, df*pi on shifted columns
        # idmask_ref: (1, w_out)    1.0 on identity columns, 0.0 elsewhere
        # o_ref:      (tm, w_out)   packed latent rows
        x = x_ref[...].astype(jnp.float32)
        s = s_ref[...]                                   # bf16 constants

        # Exact expansion via the MXU: split x into bf16-exact pieces so each
        # bf16 x bf16 product with the power-of-two / 0-1 selection entries is
        # exact; one nonzero per output column => exact f32 accumulation.
        # Explicit bf16 operands pin each dot to a single MXU pass.
        x_hi = x.astype(jnp.bfloat16)
        rem = x - x_hi.astype(jnp.float32)
        x_mid = rem.astype(jnp.bfloat16)
        y = jnp.dot(x_hi, s, preferred_element_type=jnp.float32)
        y = y + jnp.dot(x_mid, s, preferred_element_type=jnp.float32)
        if three_way:
            x_lo = (rem - x_mid.astype(jnp.float32)).astype(jnp.bfloat16)
            y = y + jnp.dot(x_lo, s, preferred_element_type=jnp.float32)

        # Single full-lane-width sin pass; identity columns restored from y.
        # TODO(synk): for sin_only (df=1.0) the shifted half equals -sin of the
        # first half; halving the transcendental work needs a half-width y and
        # a post-sin +/-1 expansion matmul (not implemented here).
        t = jnp.sin(y + phase_ref[...])
        o_ref[...] = jnp.where(idmask_ref[...] != 0.0, y, t).astype(o_ref.dtype)

    return kernel


def _encoder_tables(x_dim, min_deg, max_deg, use_identity, sin_only, pack):
    """Constant selection matrix, phase vector, and identity-column mask."""
    num_degs = max_deg - min_deg
    id_cols = x_dim if use_identity else 0
    half = num_degs * x_dim
    latent_dim = id_cols + 2 * half

    # Per-row expansion block [x_dim, latent_dim], degree-major like the
    # reference reshape of x[..., None, :] * scales[:, None].
    block = np.zeros((x_dim, latent_dim), dtype=np.float32)
    if use_identity:
        block[np.arange(x_dim), np.arange(x_dim)] = 1.0
    for d in range(num_degs):
        scale = np.float32(2.0 ** (min_deg + d))
        for j in range(x_dim):
            block[j, id_cols + d * x_dim + j] = scale
            block[j, id_cols + half + d * x_dim + j] = scale
    sel = np.kron(np.eye(pack, dtype=np.float32), block)  # (pack*x_dim, pack*latent)

    df = 1.0 if sin_only else 0.5
    phase_row = np.zeros((latent_dim,), dtype=np.float32)
    phase_row[id_cols + half:] = np.float32(df * math.pi)
    idmask_row = np.zeros((latent_dim,), dtype=np.float32)
    idmask_row[:id_cols] = 1.0
    phase = np.tile(phase_row, pack)[None, :]
    idmask = np.tile(idmask_row, pack)[None, :]
    return sel, phase, idmask, latent_dim


def _sel_bytes_cap() -> int:
    """Resident bf16 selection-matrix cap, a bit smaller on 64 MiB-VMEM parts."""
    try:
        vmem = pltpu.get_tpu_info().vmem_capacity_bytes
    except Exception:
        vmem = 64 << 20
    return (8 << 20) if vmem >= (100 << 20) else (6 << 20)


def sinusoidal_encode(x, *, min_deg, max_deg, use_identity=True, sin_only=False,
                      exact=True, out_dtype=None):
    """Pallas TPU implementation of SinusoidalEncoder.forward. x: [..., x_dim]."""
    if max_deg == min_deg:
        return x

    x_dim = x.shape[-1]
    batch_shape = x.shape[:-1]
    x_flat = x.reshape(-1, x_dim)
    n = x_flat.shape[0]

    num_degs = max_deg - min_deg
    latent_dim = (int(use_identity) + 2 * num_degs) * x_dim
    out_dtype = x.dtype if out_dtype is None else jnp.dtype(out_dtype)
    out_itemsize = jnp.dtype(out_dtype).itemsize

    # Pack rows along lanes so input/output blocks are multiples of 128 lanes
    # (full vreg utilization, unmasked full-width stores).  If the bf16
    # selection matrix would exceed the resident-VMEM cap, halve pack rather
    # than collapsing to the lane-sparse pack=1 layout.
    pack = 128 // math.gcd(x_dim, 128)
    sel_cap = _sel_bytes_cap()
    while pack > 1 and (pack * x_dim) * (pack * latent_dim) * 2 > sel_cap:
        pack //= 2

    w_in = pack * x_dim
    w_out = pack * latent_dim
    sel, phase, idmask, _ = _encoder_tables(
        x_dim, min_deg, max_deg, use_identity, sin_only, pack)
    sel_bytes = sel.size * 2                           # bf16 resident constant

    # Row tiling over packed rows: target >=2 grid steps (DMA/compute overlap
    # and v7x megacore sharding) with <=512 packed rows per step, capped by a
    # VMEM budget covering double-buffered tiles, resident constants, and
    # elementwise temporaries.  Deriving tm from the step count keeps padding
    # bounded by ~8 packed rows per step.
    np_rows = _cdiv(n, pack)
    per_row_bytes = 24 * w_in + (2 * out_itemsize + 16) * w_out
    fixed_bytes = 2 * sel_bytes + 16 * w_out + (1 << 20)
    budget = 24 << 20
    if budget > fixed_bytes + 8 * per_row_bytes:
        tm_cap = max(8, ((budget - fixed_bytes) // per_row_bytes) // 8 * 8)
    else:
        tm_cap = 8
    if np_rows <= 8:
        tm = 8
    else:
        g = max(2, _cdiv(np_rows, 512))
        tm = min(max(8, _round_up(_cdiv(np_rows, g), 8)), tm_cap)
    np_pad = _round_up(np_rows, tm)
    rows_pad = np_pad * pack

    if rows_pad != n:
        x_flat = jnp.pad(x_flat, ((0, rows_pad - n), (0, 0)))
    x_packed = x_flat.reshape(np_pad, w_in)            # contiguous (free) reshape

    grid = (np_pad // tm,)
    footprint = fixed_bytes + tm * per_row_bytes
    vmem_limit = int(min(48 << 20, max(32 << 20, 2 * footprint)))
    splits = 3 if exact else 2
    cost = pl.CostEstimate(
        flops=int(2 * splits * np_pad * w_in * w_out + 8 * np_pad * w_out),
        transcendentals=int(np_pad * w_out),
        bytes_accessed=int(4 * np_pad * w_in + out_itemsize * np_pad * w_out
                           + sel_bytes + 8 * w_out),
    )
    kernel = _make_kernel(three_way=exact)
    args = (x_packed,
            jnp.asarray(sel, dtype=jnp.bfloat16),
            jnp.asarray(phase),
            jnp.asarray(idmask))

    def build(single_buffer_consts):
        const_kw = {}
        if single_buffer_consts and hasattr(pl, "Buffered"):
            const_kw = dict(pipeline_mode=pl.Buffered(1))   # constants: 1 buffer
        return pl.pallas_call(
            kernel,
            out_shape=jax.ShapeDtypeStruct((np_pad, w_out), out_dtype),
            grid_spec=pltpu.PrefetchScalarGridSpec(
                num_scalar_prefetch=0,
                grid=grid,
                in_specs=[
                    pl.BlockSpec((tm, w_in), lambda i: (i, 0)),
                    pl.BlockSpec((w_in, w_out), lambda i: (0, 0), **const_kw),
                    pl.BlockSpec((1, w_out), lambda i: (0, 0), **const_kw),
                    pl.BlockSpec((1, w_out), lambda i: (0, 0), **const_kw),
                ],
                out_specs=pl.BlockSpec((tm, w_out), lambda i: (i, 0)),
            ),
            compiler_params=pltpu.CompilerParams(
                dimension_semantics=("parallel",),
                vmem_limit_bytes=vmem_limit),
            cost_estimate=cost,
        )

    try:
        out_packed = build(True)(*args)
    except Exception:
        # Fallback if single-buffered resident constants are not supported.
        out_packed = build(False)(*args)

    out_flat = out_packed.reshape(rows_pad, latent_dim)
    if rows_pad != n:
        out_flat = out_flat[:n]
    return out_flat.reshape(*batch_shape, latent_dim)


def sinusoidal_encode_ref(x, *, min_deg, max_deg, use_identity=True, sin_only=False):
    """Pure-JAX reference mirroring the PyTorch forward exactly."""
    if max_deg == min_deg:
        return x
    scales = jnp.asarray([2 ** i for i in range(min_deg, max_deg)], dtype=x.dtype)
    xb = (x[..., None, :] * scales[:, None]).reshape(
        *x.shape[:-1], (max_deg - min_deg) * x.shape[-1])
    df = 1.0 if sin_only else 0.5
    latent = jnp.sin(jnp.concatenate([xb, xb + df * math.pi], axis=-1))
    if use_identity:
        latent = jnp.concatenate([x, latent], axis=-1)
    return latent


if __name__ == "__main__":
    key = jax.random.PRNGKey(0)
    min_deg, max_deg = 0, 4

    configs = [
        # Default module config: identity + sin + shifted-sin (df=0.5).
        dict(x_dim=4, use_identity=True, sin_only=False, shape=(2, 16, 4)),
        # Exercises sin_only (df=1.0), no identity, and the row-padding path.
        dict(x_dim=4, use_identity=False, sin_only=True, shape=(5, 7, 4)),
        # Common NeRF case (x_dim=3): exercises the fixed pack-size guard.
        dict(x_dim=3, use_identity=True, sin_only=False, shape=(3, 5, 3)),
    ]
    for i, cfg in enumerate(configs):
        k = jax.random.fold_in(key, i)
        x = jax.random.normal(k, cfg["shape"], dtype=jnp.float32)
        out = sinusoidal_encode(
            x, min_deg=min_deg, max_deg=max_deg,
            use_identity=cfg["use_identity"], sin_only=cfg["sin_only"])
        out = jax.block_until_ready(out)
        ref = sinusoidal_encode_ref(
            x, min_deg=min_deg, max_deg=max_deg,
            use_identity=cfg["use_identity"], sin_only=cfg["sin_only"])

        expected_latent = (int(cfg["use_identity"]) + 2 * (max_deg - min_deg)) * cfg["x_dim"]
        assert out.shape == (*cfg["shape"][:-1], expected_latent), out.shape
        max_err = float(jnp.max(jnp.abs(out - ref)))
        assert jnp.allclose(out, ref, atol=1e-5, rtol=1e-5), max_err

    print("KERNEL_OK")
</pallas_src>

<mosaic_0001>
module attributes {stable_mosaic.version = 11 : i64} {
  func.func @kernel(%arg0: i32, %arg1: memref<8x128xf32, #tpu.memory_space<vmem>>, %arg2: memref<128x1152xbf16, #tpu.memory_space<vmem>>, %arg3: memref<1x1152xf32, #tpu.memory_space<vmem>>, %arg4: memref<1x1152xf32, #tpu.memory_space<vmem>>, %arg5: memref<8x1152xf32, #tpu.memory_space<vmem>>) attributes {dimension_semantics = [#tpu.dimension_semantics<parallel>], iteration_bounds = array<i64: 1>, scalar_prefetch = 0 : i64, scratch_operands = 0 : i64, tpu.core_type = #tpu.core_type<tc>, window_params = [{transform_indices = @transform_0, window_bounds = array<i64: 8, 128>}, {pipeline_mode = #tpu.pipeline_mode<synchronous>, transform_indices = @transform_1, window_bounds = array<i64: 128, 1152>}, {pipeline_mode = #tpu.pipeline_mode<synchronous>, transform_indices = @transform_2, window_bounds = array<i64: 1, 1152>}, {pipeline_mode = #tpu.pipeline_mode<synchronous>, transform_indices = @transform_3, window_bounds = array<i64: 1, 1152>}, {transform_indices = @transform_4, window_bounds = array<i64: 8, 1152>}]} {
    %c0 = arith.constant 0 : index
    %c0_0 = arith.constant 0 : index
    %0 = vector.load %arg1[%c0, %c0_0] : memref<8x128xf32, #tpu.memory_space<vmem>>, vector<8x128xf32>
    %c0_1 = arith.constant 0 : index
    %c0_2 = arith.constant 0 : index
    %1 = vector.load %arg2[%c0_1, %c0_2] : memref<128x1152xbf16, #tpu.memory_space<vmem>>, vector<128x1152xbf16>
    %2 = arith.truncf %0 : vector<8x128xf32> to vector<8x128xbf16>
    %3 = arith.extf %2 : vector<8x128xbf16> to vector<8x128xf32>
    %4 = arith.subf %0, %3 : vector<8x128xf32>
    %5 = arith.truncf %4 : vector<8x128xf32> to vector<8x128xbf16>
    %cst = arith.constant dense<0.000000e+00> : vector<8x1152xf32>
    %6 = tpu.matmul %2, %1, %cst {dimension_numbers = #tpu.dot_dimension_numbers<[1], [0], [0], [1], [0, 0, 1, 1], [], []>} : vector<8x128xbf16>, vector<128x1152xbf16>, vector<8x1152xf32> -> vector<8x1152xf32>
    %cst_3 = arith.constant dense<0.000000e+00> : vector<8x1152xf32>
    %7 = tpu.matmul %5, %1, %cst_3 {dimension_numbers = #tpu.dot_dimension_numbers<[1], [0], [0], [1], [0, 0, 1, 1], [], []>} : vector<8x128xbf16>, vector<128x1152xbf16>, vector<8x1152xf32> -> vector<8x1152xf32>
    %8 = arith.addf %6, %7 : vector<8x1152xf32>
    %9 = arith.extf %5 : vector<8x128xbf16> to vector<8x128xf32>
    %10 = arith.subf %4, %9 : vector<8x128xf32>
    %11 = arith.truncf %10 : vector<8x128xf32> to vector<8x128xbf16>
    %cst_4 = arith.constant dense<0.000000e+00> : vector<8x1152xf32>
    %12 = tpu.matmul %11, %1, %cst_4 {dimension_numbers = #tpu.dot_dimension_numbers<[1], [0], [0], [1], [0, 0, 1, 1], [], []>} : vector<8x128xbf16>, vector<128x1152xbf16>, vector<8x1152xf32> -> vector<8x1152xf32>
    %13 = arith.addf %8, %12 : vector<8x1152xf32>
    %c0_5 = arith.constant 0 : index
    %c0_6 = arith.constant 0 : index
    %14 = vector.load %arg3[%c0_5, %c0_6] : memref<1x1152xf32, #tpu.memory_space<vmem>>, vector<1x1152xf32>
    %15 = vector.broadcast %14 : vector<1x1152xf32> to vector<8x1152xf32>
    %16 = arith.addf %13, %15 : vector<8x1152xf32>
    %17 = math.sin %16 : vector<8x1152xf32>
    %c0_7 = arith.constant 0 : index
    %c0_8 = arith.constant 0 : index
    %18 = vector.load %arg4[%c0_7, %c0_8] : memref<1x1152xf32, #tpu.memory_space<vmem>>, vector<1x1152xf32>
    %cst_9 = arith.constant 0.000000e+00 : f32
    %19 = vector.broadcast %cst_9 : f32 to vector<1x1152xf32>
    %20 = arith.cmpf one, %18, %19 : vector<1x1152xf32>
    %21 = vector.shape_cast %20 : vector<1x1152xi1> to vector<1x1152xi1>
    %22 = vector.broadcast %21 : vector<1x1152xi1> to vector<8x1152xi1>
    %23 = arith.select %22, %13, %17 : vector<8x1152xi1>, vector<8x1152xf32>
    %c0_10 = arith.constant 0 : index
    %c0_11 = arith.constant 0 : index
    %24 = vector.load %arg5[%c0_10, %c0_11] : memref<8x1152xf32, #tpu.memory_space<vmem>>, vector<8x1152xf32>
    tpu.vector_store %arg5[%c0_10, %c0_11], %23 {strides = array<i32>} : memref<8x1152xf32, #tpu.memory_space<vmem>>, vector<8x1152xf32>,
    return
  }
  func.func @transform_0(%arg0: i32) -> (i32, i32) {
    %c0_i32 = arith.constant 0 : i32
    %c0_i32_0 = arith.constant 0 : i32
    return %arg0, %c0_i32 : i32, i32
  }
  func.func @transform_1(%arg0: i32) -> (i32, i32) {
    %c0_i32 = arith.constant 0 : i32
    %c0_i32_0 = arith.constant 0 : i32
    %c0_i32_1 = arith.constant 0 : i32
    return %c0_i32, %c0_i32_0 : i32, i32
  }
  func.func @transform_2(%arg0: i32) -> (i32, i32) {
    %c0_i32 = arith.constant 0 : i32
    %c0_i32_0 = arith.constant 0 : i32
    %c0_i32_1 = arith.constant 0 : i32
    return %c0_i32, %c0_i32_0 : i32, i32
  }
  func.func @transform_3(%arg0: i32) -> (i32, i32) {
    %c0_i32 = arith.constant 0 : i32
    %c0_i32_0 = arith.constant 0 : i32
    %c0_i32_1 = arith.constant 0 : i32
    return %c0_i32, %c0_i32_0 : i32, i32
  }
  func.func @transform_4(%arg0: i32) -> (i32, i32) {
    %c0_i32 = arith.constant 0 : i32
    %c0_i32_0 = arith.constant 0 : i32
    return %arg0, %c0_i32 : i32, i32
  }
}

module attributes {stable_mosaic.version = 11 : i64} {
  func.func @kernel(%arg0: i32, %arg1: memref<8x128xf32, #tpu.memory_space<vmem>>, %arg2: memref<128x1152xbf16, #tpu.memory_space<vmem>>, %arg3: memref<1x1152xf32, #tpu.memory_space<vmem>>, %arg4: memref<1x1152xf32, #tpu.memory_space<vmem>>, %arg5: memref<8x1152xf32, #tpu.memory_space<vmem>>) attributes {dimension_semantics = [#tpu.dimension_semantics<parallel>], iteration_bounds = array<i64: 1>, scalar_prefetch = 0 : i64, scratch_operands = 0 : i64, tpu.core_type = #tpu.core_type<tc>, window_params = [{transform_indices = @transform_0, window_bounds = array<i64: 8, 128>}, {pipeline_mode = #tpu.pipeline_mode<synchronous>, transform_indices = @transform_1, window_bounds = array<i64: 128, 1152>}, {pipeline_mode = #tpu.pipeline_mode<synchronous>, transform_indices = @transform_2, window_bounds = array<i64: 1, 1152>}, {pipeline_mode = #tpu.pipeline_mode<synchronous>, transform_indices = @transform_3, window_bounds = array<i64: 1, 1152>}, {transform_indices = @transform_4, window_bounds = array<i64: 8, 1152>}]} {
    %c0 = arith.constant 0 : index
    %c0_0 = arith.constant 0 : index
    %0 = vector.load %arg1[%c0, %c0_0] : memref<8x128xf32, #tpu.memory_space<vmem>>, vector<8x128xf32>
    %c0_1 = arith.constant 0 : index
    %c0_2 = arith.constant 0 : index
    %1 = vector.load %arg2[%c0_1, %c0_2] : memref<128x1152xbf16, #tpu.memory_space<vmem>>, vector<128x1152xbf16>
    %2 = arith.truncf %0 : vector<8x128xf32> to vector<8x128xbf16>
    %3 = arith.extf %2 : vector<8x128xbf16> to vector<8x128xf32>
    %4 = arith.subf %0, %3 : vector<8x128xf32>
    %5 = arith.truncf %4 : vector<8x128xf32> to vector<8x128xbf16>
    %cst = arith.constant dense<0.000000e+00> : vector<8x1152xf32>
    %6 = tpu.matmul %2, %1, %cst {dimension_numbers = #tpu.dot_dimension_numbers<[1], [0], [0], [1], [0, 0, 1, 1], [], []>} : vector<8x128xbf16>, vector<128x1152xbf16>, vector<8x1152xf32> -> vector<8x1152xf32>
    %cst_3 = arith.constant dense<0.000000e+00> : vector<8x1152xf32>
    %7 = tpu.matmul %5, %1, %cst_3 {dimension_numbers = #tpu.dot_dimension_numbers<[1], [0], [0], [1], [0, 0, 1, 1], [], []>} : vector<8x128xbf16>, vector<128x1152xbf16>, vector<8x1152xf32> -> vector<8x1152xf32>
    %8 = arith.addf %6, %7 : vector<8x1152xf32>
    %9 = arith.extf %5 : vector<8x128xbf16> to vector<8x128xf32>
    %10 = arith.subf %4, %9 : vector<8x128xf32>
    %11 = arith.truncf %10 : vector<8x128xf32> to vector<8x128xbf16>
    %cst_4 = arith.constant dense<0.000000e+00> : vector<8x1152xf32>
    %12 = tpu.matmul %11, %1, %cst_4 {dimension_numbers = #tpu.dot_dimension_numbers<[1], [0], [0], [1], [0, 0, 1, 1], [], []>} : vector<8x128xbf16>, vector<128x1152xbf16>, vector<8x1152xf32> -> vector<8x1152xf32>
    %13 = arith.addf %8, %12 : vector<8x1152xf32>
    %c0_5 = arith.constant 0 : index
    %c0_6 = arith.constant 0 : index
    %14 = vector.load %arg3[%c0_5, %c0_6] : memref<1x1152xf32, #tpu.memory_space<vmem>>, vector<1x1152xf32>
    %15 = vector.broadcast %14 : vector<1x1152xf32> to vector<8x1152xf32>
    %16 = arith.addf %13, %15 : vector<8x1152xf32>
    %17 = math.sin %16 : vector<8x1152xf32>
    %c0_7 = arith.constant 0 : index
    %c0_8 = arith.constant 0 : index
    %18 = vector.load %arg4[%c0_7, %c0_8] : memref<1x1152xf32, #tpu.memory_space<vmem>>, vector<1x1152xf32>
    %cst_9 = arith.constant 0.000000e+00 : f32
    %19 = vector.broadcast %cst_9 : f32 to vector<1x1152xf32>
    %20 = arith.cmpf one, %18, %19 : vector<1x1152xf32>
    %21 = vector.shape_cast %20 : vector<1x1152xi1> to vector<1x1152xi1>
    %22 = vector.broadcast %21 : vector<1x1152xi1> to vector<8x1152xi1>
    %23 = arith.select %22, %13, %17 : vector<8x1152xi1>, vector<8x1152xf32>
    %c0_10 = arith.constant 0 : index
    %c0_11 = arith.constant 0 : index
    %24 = vector.load %arg5[%c0_10, %c0_11] : memref<8x1152xf32, #tpu.memory_space<vmem>>, vector<8x1152xf32>
    tpu.vector_store %arg5[%c0_10, %c0_11], %23 {strides = array<i32>} : memref<8x1152xf32, #tpu.memory_space<vmem>>, vector<8x1152xf32>,
    return
  }
  func.func @transform_0(%arg0: i32) -> (i32, i32) {
    %c0_i32 = arith.constant 0 : i32
    %c0_i32_0 = arith.constant 0 : i32
    return %arg0, %c0_i32 : i32, i32
  }
  func.func @transform_1(%arg0: i32) -> (i32, i32) {
    %c0_i32 = arith.constant 0 : i32
    %c0_i32_0 = arith.constant 0 : i32
    %c0_i32_1 = arith.constant 0 : i32
    return %c0_i32, %c0_i32_0 : i32, i32
  }
  func.func @transform_2(%arg0: i32) -> (i32, i32) {
    %c0_i32 = arith.constant 0 : i32
    %c0_i32_0 = arith.constant 0 : i32
    %c0_i32_1 = arith.constant 0 : i32
    return %c0_i32, %c0_i32_0 : i32, i32
  }
  func.func @transform_3(%arg0: i32) -> (i32, i32) {
    %c0_i32 = arith.constant 0 : i32
    %c0_i32_0 = arith.constant 0 : i32
    %c0_i32_1 = arith.constant 0 : i32
    return %c0_i32, %c0_i32_0 : i32, i32
  }
  func.func @transform_4(%arg0: i32) -> (i32, i32) {
    %c0_i32 = arith.constant 0 : i32
    %c0_i32_0 = arith.constant 0 : i32
    return %arg0, %c0_i32 : i32, i32
  }
}

</mosaic_0001>

<bundles_post_ra>
// kernel: tpu_custom_call.1
= control target key start
LH: loop header
LB: loop body
LE: loop exit
PB: predicated region body
PF: predicated region fallthrough
CT: control target
= control target key end

     0   :  { %9 = vsyncpa [#allocation3], 0  ;;  %s4465_s0 = inlined_call_operand.hbm [shape: f32[8,128], index: 0, kind: input, shape index: {}]   ;;  %s4466_s1 = inlined_call_operand.hbm [shape: bf16[128,1152], index: 1, kind: input, shape index: {}]   ;;  %s4467_s2 = inlined_call_operand.hbm [shape: f32[1,1152], index: 2, kind: input, shape index: {}]   ;;  %s4468_s3 = inlined_call_operand.hbm [shape: f32[1,1152], index: 3, kind: input, shape index: {}]   ;;  %s4469_s4 = inlined_call_operand.hbm [shape: f32[8,1152], index: 4, kind: output, shape index: {}]  }
   0x1   :  { %10 = vsyncpa [#allocation6], 0 }
   0x2   :  { %11 = vsyncpa [#allocation9], 0  ;;  %s28_s17 = sshll.u32 %s4466_s1, 4  ;;  %s29_s17 = int_to_ptr.hbm [resolvable:$true] %s28_s17 }
   0x3   :  { %12 = vsyncpa [#allocation4], 0  ;;  %s2909_s18 = smov [#allocation5]   ;;  %s18_s22 = sshll.u32 %s4465_s0, 4  ;;  %s19_s22 = int_to_ptr.hbm [resolvable:$true] %s18_s22 }
   0x4   :  { %s30_s19 = sshll.u32 %s2909_s18, 4  ;;  %s2910_s23 = smov 576   ;;  %s31_s19 = int_to_ptr.vmem [resolvable:$true] %s30_s19 }
   0x5   :  { %s2911_s24 = smov 36   ;;  %s2912_s25 = smov [#allocation2]  }
   0x6   :  { %36 = dma.hbm_to_vmem [thread:$0]  %s29_s17, 9216, %s31_s19, [#allocation6], %s2910_s23, %s2910_s23, %s2911_s24  }
   0x7   :  { %s20_s26 = sshll.u32 %s2912_s25, 4  ;;  %s42_s29 = sshll.u32 %s4467_s2, 4  ;;  %s21_s26 = int_to_ptr.vmem [resolvable:$true] %s20_s26  ;;  %s43_s29 = int_to_ptr.hbm [resolvable:$true] %s42_s29 }
   0x8   :  { %23 = dma.hbm_to_vmem [thread:$0]  %s19_s22, 128, %s21_s26, [#allocation3]  }
   0x9   :  { %s53_s5 = sshll.u32 %s4468_s3, 4  ;;  %s2913_s6 = smov [#allocation7]   ;;  %s54_s5 = int_to_ptr.hbm [resolvable:$true] %s53_s5 }
   0xa   :  { %s44_s7 = sshll.u32 %s2913_s6, 4  ;;  %s2914_s0 = smov [#allocation8]   ;;  %s45_s7 = int_to_ptr.vmem [resolvable:$true] %s44_s7 }
   0xb   :  { %47 = dma.hbm_to_vmem [thread:$0]  %s43_s29, 144, %s45_s7, [#allocation6]  }
   0xc   :  { %s55_s8 = sshll.u32 %s2914_s0, 4  ;;  %s56_s8 = int_to_ptr.vmem [resolvable:$true] %s55_s8 }
   0xd   :  { %58 = dma.hbm_to_vmem [thread:$0]  %s54_s5, 144, %s56_s8, [#allocation9]  }
   0xe   :  { %2901 = dma.done.wait [#allocation3], 128  }
   0xf   :  { %2902 = vsyncadd [#allocation3], 4294967168 }
  0x10   :  { %2903 = dma.done.wait [#allocation6], 9360  }
  0x11   :  { %2904 = vsyncadd [#allocation6], 4294957936 }
  0x12   :  { %2905 = dma.done.wait [#allocation9], 144  }
  0x13   :  { %2906 = vsyncadd [#allocation9], 4294967152  ;;  %v2632_v0 = vld [vmem:[#allocation5 + $0x1f8] sm:$0xf]  ;;  %v2760_v1 = vld [vmem:[#allocation5 + $0x218] sm:$0xf0] }
  0x14   :  { %v2756_v2 = vld [vmem:[#allocation5 + $0x1fc] sm:$0xf]  ;;  %v2960_v3 = vor.u32 %v2760_v1, %v2632_v0  ;;  %v2634_v4 = vld [vmem:[#allocation5 + $0x21c] sm:$0xf0]  ;;  %v2761_v6 = vld [vmem:[#allocation5 + $0x220] sm:$0xf0] }
  0x15   :  { %v2640_v5 = vld [vmem:[#allocation5 + $0x200] sm:$0xf]  ;;  %v2962_v7 = vor.u32 %v2756_v2, %v2634_v4  ;;  %v2757_v9 = vld [vmem:[#allocation5 + $0x204] sm:$0xf]  ;;  %v2642_v10 = vld [vmem:[#allocation5 + $0x224] sm:$0xf0] }
  0x16   :  { %v2964_v8 = vor.u32 %v2761_v6, %v2640_v5  ;;  %v2596_v11 = vld [vmem:[#allocation5 + $0x1b0] sm:$0xf]  ;;  %528 = vmatpush.bf16.msra.mxu0 %v2960_v3  ;;  %v2967_v12 = vor.u32 %v2757_v9, %v2642_v10  ;;  %v2751_v13 = vld [vmem:[#allocation5 + $0x1d0] sm:$0xf0]  ;;  %v2598_v15 = vld [vmem:[#allocation5 + $0x1d4] sm:$0xf0] }
  0x17   :  { %v2747_v14 = vld [vmem:[#allocation5 + $0x1b4] sm:$0xf]  ;;  %541 = vmatpush.bf16.msra.mxu1 %v2962_v7  ;;  %v2971_v16 = vor.u32 %v2751_v13, %v2596_v11  ;;  %v2604_v18 = vld [vmem:[#allocation5 + $0x1b8] sm:$0xf]  ;;  %v2752_v19 = vld [vmem:[#allocation5 + $0x1d8] sm:$0xf0] }
  0x18   :  { %554 = vmatpush.bf16.msra.mxu2 %v2964_v8  ;;  %v2973_v17 = vor.u32 %v2747_v14, %v2598_v15  ;;  %v2748_v20 = vld [vmem:[#allocation5 + $0x1bc] sm:$0xf]  ;;  %567 = vmatpush.bf16.msra.mxu3 %v2967_v12  ;;  %v2976_v21 = vor.u32 %v2752_v19, %v2604_v18  ;;  %v2606_v22 = vld [vmem:[#allocation5 + $0x1dc] sm:$0xf0]  ;;  %v2560_v23 = vld [vmem:[#allocation5 + $0x168] sm:$0xf] }
  0x19   :  { %v2742_v24 = vld [vmem:[#allocation5 + $0x188] sm:$0xf0]  ;;  %v2978_v25 = vor.u32 %v2748_v20, %v2606_v22  ;;  %v2562_v27 = vld [vmem:[#allocation5 + $0x18c] sm:$0xf0]  ;;  %v2743_v30 = vld [vmem:[#allocation5 + $0x190] sm:$0xf0] }
  0x1a   :  { %v2738_v26 = vld [vmem:[#allocation5 + $0x16c] sm:$0xf]  ;;  %v2568_v28 = vld [vmem:[#allocation5 + $0x170] sm:$0xf]  ;;  %529 = vmatpush.bf16.msra.mxu0 %v2971_v16  ;;  %v2981_v29 = vor.u32 %v2742_v24, %v2560_v23  ;;  %v2739_v31 = vld [vmem:[#allocation5 + $0x174] sm:$0xf] }
  0x1b   :  { %v2570_v32 = vld [vmem:[#allocation5 + $0x194] sm:$0xf0]  ;;  %542 = vmatpush.bf16.msra.mxu1 %v2973_v17  ;;  %v2985_v33 = vor.u32 %v2738_v26, %v2562_v27  ;;  %v2987_v34 = vor.u32 %v2743_v30, %v2568_v28  ;;  %v2524_v35 = vld [vmem:[#allocation5 + $0x120] sm:$0xf]  ;;  %v2733_v36 = vld [vmem:[#allocation5 + $0x140] sm:$0xf0] }
  0x1c   :  { %555 = vmatpush.bf16.msra.mxu2 %v2976_v21  ;;  %v2729_v37 = vld [vmem:[#allocation5 + $0x124] sm:$0xf]  ;;  %568 = vmatpush.bf16.msra.mxu3 %v2978_v25  ;;  %v2990_v38 = vor.u32 %v2739_v31, %v2570_v32  ;;  %v2526_v39 = vld [vmem:[#allocation5 + $0x144] sm:$0xf0]  ;;  %v2734_v41 = vld [vmem:[#allocation5 + $0x148] sm:$0xf0]  ;;  %v2993_v44 = vor.u32 %v2733_v36, %v2524_v35 }
  0x1d   :  { %v2532_v40 = vld [vmem:[#allocation5 + $0x128] sm:$0xf]  ;;  %v2730_v42 = vld [vmem:[#allocation5 + $0x12c] sm:$0xf]  ;;  %v2534_v43 = vld [vmem:[#allocation5 + $0x14c] sm:$0xf0]  ;;  %v2997_v45 = vor.u32 %v2729_v37, %v2526_v39 }
  0x1e   :  { %530 = vmatpush.bf16.msra.mxu0 %v2981_v29  ;;  %v2999_v46 = vor.u32 %v2734_v41, %v2532_v40  ;;  %v2488_v47 = vld [vmem:[#allocation5 + $0xd8] sm:$0xf]  ;;  %v2724_v48 = vld [vmem:[#allocation5 + $0xf8] sm:$0xf0]  ;;  %v3002_v50 = vor.u32 %v2730_v42, %v2534_v43  ;;  %v2490_v51 = vld [vmem:[#allocation5 + $0xfc] sm:$0xf0] }
  0x1f   :  { %543 = vmatpush.bf16.msra.mxu1 %v2985_v33  ;;  %v2720_v49 = vld [vmem:[#allocation5 + $0xdc] sm:$0xf]  ;;  %v2496_v52 = vld [vmem:[#allocation5 + $0xe0] sm:$0xf]  ;;  %v2725_v53 = vld [vmem:[#allocation5 + $0x100] sm:$0xf0]  ;;  %v3005_v56 = vor.u32 %v2724_v48, %v2488_v47 }
  0x20   :  { %556 = vmatpush.bf16.msra.mxu2 %v2987_v34  ;;  %569 = vmatpush.bf16.msra.mxu3 %v2990_v38  ;;  %v2721_v54 = vld [vmem:[#allocation5 + $0xe4] sm:$0xf]  ;;  %v2498_v55 = vld [vmem:[#allocation5 + $0x104] sm:$0xf0]  ;;  %v3009_v57 = vor.u32 %v2720_v49, %v2490_v51  ;;  %v3011_v58 = vor.u32 %v2725_v53, %v2496_v52  ;;  %v2452_v59 = vld [vmem:[#allocation5 + $0x90] sm:$0xf] }
  0x21   :  { %v2715_v60 = vld [vmem:[#allocation5 + $0xb0] sm:$0xf0]  ;;  %v3014_v62 = vor.u32 %v2721_v54, %v2498_v55  ;;  %v2454_v63 = vld [vmem:[#allocation5 + $0xb4] sm:$0xf0]  ;;  %v2716_v1 = vld [vmem:[#allocation5 + $0xb8] sm:$0xf0] }
  0x22   :  { %531 = vmatpush.bf16.msra.mxu0 %v2993_v44  ;;  %v2711_v61 = vld [vmem:[#allocation5 + $0x94] sm:$0xf]  ;;  %v2460_v0 = vld [vmem:[#allocation5 + $0x98] sm:$0xf]  ;;  %v2712_v2 = vld [vmem:[#allocation5 + $0x9c] sm:$0xf]  ;;  %v3017_v5 = vor.u32 %v2715_v60, %v2452_v59 }
  0x23   :  { %544 = vmatpush.bf16.msra.mxu1 %v2997_v45  ;;  %4507 = vst [vmem:[#allocation15_spill] sm:$0xff] %v3014_v62  ;;  %v2462_v4 = vld [vmem:[#allocation5 + $0xbc] sm:$0xf0]  ;;  %v3021_v6 = vor.u32 %v2711_v61, %v2454_v63  ;;  %v3023_v9 = vor.u32 %v2716_v1, %v2460_v0  ;;  %v2416_v10 = vld [vmem:[#allocation5 + $0x48] sm:$0xf]  ;;  %s2922_s2 = smov [#allocation10]  }
  0x24   :  { %557 = vmatpush.bf16.msra.mxu2 %v2999_v46  ;;  %570 = vmatpush.bf16.msra.mxu3 %v3002_v50  ;;  %v2706_v11 = vld [vmem:[#allocation5 + $0x68] sm:$0xf0]  ;;  %v3026_v14 = vor.u32 %v2712_v2, %v2462_v4  ;;  %v2418_v15 = vld [vmem:[#allocation5 + $0x6c] sm:$0xf0]  ;;  %v2707_v19 = vld [vmem:[#allocation5 + $0x70] sm:$0xf0] }
  0x25   :  { %v2702_v13 = vld [vmem:[#allocation5 + $0x4c] sm:$0xf]  ;;  %v2424_v18 = vld [vmem:[#allocation5 + $0x50] sm:$0xf]  ;;  %v2703_v20 = vld [vmem:[#allocation5 + $0x54] sm:$0xf]  ;;  %v3029_v23 = vor.u32 %v2706_v11, %v2416_v10 }
  0x26   :  { %532 = vmatpush.bf16.msra.mxu0 %v3005_v56  ;;  %4508 = vst [vmem:[#allocation16_spill] sm:$0xff] %v3026_v14  ;;  %v2426_v22 = vld [vmem:[#allocation5 + $0x74] sm:$0xf0]  ;;  %v2380_v24 = vld [vmem:[#allocation5] sm:$0xf]  ;;  %v3033_v27 = vor.u32 %v2702_v13, %v2418_v15  ;;  %v3035_v28 = vor.u32 %v2707_v19, %v2424_v18  ;;  %s2364_s3 = sshll.u32 %s2922_s2, 4  ;;  %s2365_s3 = int_to_ptr.vmem [resolvable:$true] %s2364_s3 }
  0x27   :  { %545 = vmatpush.bf16.msra.mxu1 %v3009_v57  ;;  %v2697_v26 = vld [vmem:[#allocation5 + $0x20] sm:$0xf0]  ;;  %v2382_v31 = vld [vmem:[#allocation5 + $0x24] sm:$0xf0]  ;;  %v3038_v35 = vor.u32 %v2703_v20, %v2426_v22  ;;  %v2698_v36 = vld [vmem:[#allocation5 + $0x28] sm:$0xf0] }
  0x28   :  { %558 = vmatpush.bf16.msra.mxu2 %v3011_v58  ;;  %571 = vmatpush.bf16.msra.mxu3 %v3014_v62  ;;  %v2693_v30 = vld [vmem:[#allocation5 + $0x4] sm:$0xf]  ;;  %v2388_v32 = vld [vmem:[#allocation5 + $0x8] sm:$0xf]  ;;  %v2694_v37 = vld [vmem:[#allocation5 + $0xc] sm:$0xf]  ;;  %v3041_v43 = vor.u32 %v2697_v26, %v2380_v24 }
  0x29   :  { %4509 = vst [vmem:[#allocation17_spill] sm:$0xff] %v3038_v35  ;;  %v2390_v39 = vld [vmem:[#allocation5 + $0x2c] sm:$0xf0]  ;;  %v2648_v40 = vld [vmem:[#allocation5 + $0x208] sm:$0xf]  ;;  %v3045_v51 = vor.u32 %v2693_v30, %v2382_v31  ;;  %v3047_v52 = vor.u32 %v2698_v36, %v2388_v32  ;;  %s2366_s11 = sshll.u32 %s4469_s4, 4  ;;  %s2367_s11 = int_to_ptr.hbm [resolvable:$true] %s2366_s11 }
  0x2a   :  { %533 = vmatpush.bf16.msra.mxu0 %v3017_v5  ;;  %v2762_v41 = vld [vmem:[#allocation5 + $0x228] sm:$0xf0]  ;;  %v2650_v47 = vld [vmem:[#allocation5 + $0x22c] sm:$0xf0]  ;;  %v2763_v49 = vld [vmem:[#allocation5 + $0x230] sm:$0xf0]  ;;  %v3050_v55 = vor.u32 %v2694_v37, %v2390_v39 }
  0x2b   :  { %546 = vmatpush.bf16.msra.mxu1 %v3021_v6  ;;  %v2758_v42 = vld [vmem:[#allocation5 + $0x20c] sm:$0xf]  ;;  %v2656_v48 = vld [vmem:[#allocation5 + $0x210] sm:$0xf]  ;;  %4510 = vst [vmem:[#allocation18_spill] sm:$0xff] %v3047_v52  ;;  %v3052_v59 = vor.u32 %v2762_v41, %v2648_v40  ;;  %v75_v41 = vld [vmem:[#allocation2] sm:$0xff] }
  0x2c   :  { %559 = vmatpush.bf16.msra.mxu2 %v3023_v9  ;;  %572 = vmatpush.bf16.msra.mxu3 %v3026_v14  ;;  %v2759_v53 = vld [vmem:[#allocation5 + $0x214] sm:$0xf]  ;;  %v2658_v54 = vld [vmem:[#allocation5 + $0x234] sm:$0xf0]  ;;  %4511 = vst [vmem:[#allocation19_spill] sm:$0xff] %v3050_v55  ;;  %v3054_v60 = vor.u32 %v2758_v42, %v2650_v47  ;;  %v3056_v61 = vor.u32 %v2763_v49, %v2656_v48 }
  0x2d   :  { %v2612_v63 = vld [vmem:[#allocation5 + $0x1c0] sm:$0xf]  ;;  %v2753_v0 = vld [vmem:[#allocation5 + $0x1e0] sm:$0xf0]  ;;  %v3059_v2 = vor.u32 %v2759_v53, %v2658_v54  ;;  %v2614_v4 = vld [vmem:[#allocation5 + $0x1e4] sm:$0xf0]  ;;  %v3085_v54 = vpack.c.bf16 %v75_v41, %v75_v41 }
  0x2e   :  { %534 = vmatpush.bf16.msra.mxu0 %v3029_v23  ;;  %4512 = vst [vmem:[#allocation20_spill] sm:$0xff] %v3056_v61  ;;  %v2749_v1 = vld [vmem:[#allocation5 + $0x1c4] sm:$0xf]  ;;  %v2620_v10 = vld [vmem:[#allocation5 + $0x1c8] sm:$0xf]  ;;  %v3065_v18 = vor.u32 %v2753_v0, %v2612_v63 }
  0x2f   :  { %547 = vmatpush.bf16.msra.mxu1 %v3033_v27  ;;  %4513 = vst [vmem:[#allocation21_spill] sm:$0xff] %v3059_v2  ;;  %v2754_v11 = vld [vmem:[#allocation5 + $0x1e8] sm:$0xf0]  ;;  %v2622_v15 = vld [vmem:[#allocation5 + $0x1ec] sm:$0xf0]  ;;  %v3069_v19 = vor.u32 %v2749_v1, %v2614_v4 }
  0x30   :  { %560 = vmatpush.bf16.msra.mxu2 %v3035_v28  ;;  %573 = vmatpush.bf16.msra.mxu3 %v3038_v35  ;;  %v2750_v13 = vld [vmem:[#allocation5 + $0x1cc] sm:$0xf]  ;;  %v3071_v20 = vor.u32 %v2754_v11, %v2620_v10  ;;  %v2576_v22 = vld [vmem:[#allocation5 + $0x178] sm:$0xf]  ;;  %v2744_v24 = vld [vmem:[#allocation5 + $0x198] sm:$0xf0] }
  0x31   :  { %v2740_v26 = vld [vmem:[#allocation5 + $0x17c] sm:$0xf]  ;;  %v3074_v30 = vor.u32 %v2750_v13, %v2622_v15  ;;  %v2578_v31 = vld [vmem:[#allocation5 + $0x19c] sm:$0xf0]  ;;  %v2745_v36 = vld [vmem:[#allocation5 + $0x1a0] sm:$0xf0]  ;;  %v3077_v40 = vor.u32 %v2744_v24, %v2576_v22  ;;  %v157_v13 = vunpack.c.l.bf16 %v3085_v54 }
  0x32   :  { %535 = vmatpush.bf16.msra.mxu0 %v3041_v43  ;;  %4514 = vst [vmem:[#allocation22_spill] sm:$0xff] %v3071_v20  ;;  %v2584_v32 = vld [vmem:[#allocation5 + $0x180] sm:$0xf]  ;;  %v2741_v37 = vld [vmem:[#allocation5 + $0x184] sm:$0xf]  ;;  %v3081_v42 = vor.u32 %v2740_v26, %v2578_v31 }
  0x33   :  { %548 = vmatpush.bf16.msra.mxu1 %v3045_v51  ;;  %4515 = vst [vmem:[#allocation23_spill] sm:$0xff] %v3074_v30  ;;  %v2586_v39 = vld [vmem:[#allocation5 + $0x1a4] sm:$0xf0]  ;;  %v3083_v47 = vor.u32 %v2745_v36, %v2584_v32  ;;  %v2540_v48 = vld [vmem:[#allocation5 + $0x130] sm:$0xf]  ;;  %v3100_v36 = vsub.f32 %v75_v41, %v157_v13 }
  0x34   :  { %561 = vmatpush.bf16.msra.mxu2 %v3047_v52  ;;  %574 = vmatpush.bf16.msra.mxu3 %v3050_v55  ;;  %v2735_v49 = vld [vmem:[#allocation5 + $0x150] sm:$0xf0]  ;;  %v3088_v63 = vor.u32 %v2741_v37, %v2586_v39  ;;  %v2542_v0 = vld [vmem:[#allocation5 + $0x154] sm:$0xf0]  ;;  %v2736_v4 = vld [vmem:[#allocation5 + $0x158] sm:$0xf0] }
  0x35   :  { %4516 = vst [vmem:[#allocation24_spill] sm:$0xff] %v3083_v47  ;;  %v2731_v53 = vld [vmem:[#allocation5 + $0x134] sm:$0xf]  ;;  %v2548_v1 = vld [vmem:[#allocation5 + $0x138] sm:$0xf]  ;;  %v3092_v15 = vor.u32 %v2735_v49, %v2540_v48 }
  0x36   :  { %580 = vmatpush.bf16.msrb.mxu0 %v3052_v59  ;;  %4517 = vst [vmem:[#allocation25_spill] sm:$0xff] %v3088_v63  ;;  %v2732_v10 = vld [vmem:[#allocation5 + $0x13c] sm:$0xf]  ;;  %v2550_v11 = vld [vmem:[#allocation5 + $0x15c] sm:$0xf0]  ;;  %v3096_v22 = vor.u32 %v2731_v53, %v2542_v0  ;;  %v3098_v24 = vor.u32 %v2736_v4, %v2548_v1  ;;  %v3107_v53 = vpack.c.bf16 %v3100_v36, %v3100_v36 }
  0x37   :  { %593 = vmatpush.bf16.msrb.mxu1 %v3054_v60  ;;  %v2504_v26 = vld [vmem:[#allocation5 + $0xe8] sm:$0xf]  ;;  %v2726_v31 = vld [vmem:[#allocation5 + $0x108] sm:$0xf0]  ;;  %4519 = vst [vmem:[#allocation27_spill] sm:$0xff] %v3100_v36  ;;  %v3103_v37 = vor.u32 %v2732_v10, %v2550_v11 }
  0x38   :  { %606 = vmatpush.bf16.msrb.mxu2 %v3056_v61  ;;  %619 = vmatpush.bf16.msrb.mxu3 %v3059_v2  ;;  %4518 = vst [vmem:[#allocation26_spill] sm:$0xff] %v3098_v24  ;;  %v2722_v32 = vld [vmem:[#allocation5 + $0xec] sm:$0xf]  ;;  %v2506_v39 = vld [vmem:[#allocation5 + $0x10c] sm:$0xf0]  ;;  %v3110_v0 = vor.u32 %v2726_v31, %v2504_v26 }
  0x39   :  { %4520 = vst [vmem:[#allocation28_spill] sm:$0xff] %v3103_v37  ;;  %v2512_v48 = vld [vmem:[#allocation5 + $0xf0] sm:$0xf]  ;;  %v2727_v49 = vld [vmem:[#allocation5 + $0x110] sm:$0xf0]  ;;  %v3114_v41 = vor.u32 %v2722_v32, %v2506_v39  ;;  %562 = vmatmul.bf16.vlgmr.msra.gmra.mxu2 %v3107_v53  ;;  %536 = vmatmul.bf16.vlgmr.msra.gmra.mxu0 %v3107_v53 }
  0x3a   :  { %581 = vmatpush.bf16.msrb.mxu0 %v3065_v18  ;;  %v2514_v2 = vld [vmem:[#allocation5 + $0x114] sm:$0xf0]  ;;  %4521 = vst [vmem:[#allocation29_spill] sm:$0xff] %v3110_v0  ;;  %v2468_v1 = vld [vmem:[#allocation5 + $0xa0] sm:$0xf]  ;;  %v3116_v4 = vor.u32 %v2727_v49, %v2512_v48  ;;  %549 = vmatmul.bf16.vlgmr.msra.gmra.mxu1 %v3107_v53 }
  0x3b   :  { %594 = vmatpush.bf16.msrb.mxu1 %v3069_v19  ;;  %4522 = vst [vmem:[#allocation30_spill] sm:$0xff] %v3114_v41  ;;  %v2717_v10 = vld [vmem:[#allocation5 + $0xc0] sm:$0xf0]  ;;  %v2470_v36 = vld [vmem:[#allocation5 + $0xc4] sm:$0xf0]  ;;  %575 = vmatmul.bf16.vlgmr.msra.gmra.mxu3 %v3107_v53 }
  0x3c   :  { %607 = vmatpush.bf16.msrb.mxu2 %v3071_v20  ;;  %620 = vmatpush.bf16.msrb.mxu3 %v3074_v30  ;;  %v2723_v30 = vld [vmem:[#allocation5 + $0xf4] sm:$0xf]  ;;  %4523 = vst [vmem:[#allocation31_spill] sm:$0xff] %v3116_v4  ;;  %v2713_v11 = vld [vmem:[#allocation5 + $0xa4] sm:$0xf]  ;;  %v3125_v32 = vor.u32 %v2717_v10, %v2468_v1 }
  0x3d   :  { %v3119_v13 = vor.u32 %v2723_v30, %v2514_v2  ;;  %v2718_v55 = vld [vmem:[#allocation5 + $0xc8] sm:$0xf0]  ;;  %v2478_v31 = vld [vmem:[#allocation5 + $0xcc] sm:$0xf0]  ;;  %v3130_v2 = vor.u32 %v2713_v11, %v2470_v36  ;;  %v2432_v39 = vld [vmem:[#allocation5 + $0x58] sm:$0xf] }
  0x3e   :  { %582 = vmatpush.bf16.msrb.mxu0 %v3077_v40  ;;  %v2714_v26 = vld [vmem:[#allocation5 + $0xac] sm:$0xf]  ;;  %4525 = vst [vmem:[#allocation33_spill] sm:$0xff] %v3125_v32  ;;  %v2708_v48 = vld [vmem:[#allocation5 + $0x78] sm:$0xf0] }
  0x3f   :  { %595 = vmatpush.bf16.msrb.mxu1 %v3081_v42  ;;  %4524 = vst [vmem:[#allocation32_spill] sm:$0xff] %v3119_v13  ;;  %v2704_v49 = vld [vmem:[#allocation5 + $0x5c] sm:$0xf]  ;;  %v2434_v35 = vld [vmem:[#allocation5 + $0x7c] sm:$0xf0] }
  0x40   :  { %608 = vmatpush.bf16.msrb.mxu2 %v3083_v47  ;;  %621 = vmatpush.bf16.msrb.mxu3 %v3088_v63  ;;  %v2476_v63 = vld [vmem:[#allocation5 + $0xa8] sm:$0xf]  ;;  %v2440_v1 = vld [vmem:[#allocation5 + $0x60] sm:$0xf]  ;;  %v2709_v10 = vld [vmem:[#allocation5 + $0x80] sm:$0xf0] }
  0x41   :  { %v3132_v30 = vor.u32 %v2718_v55, %v2476_v63  ;;  %v2705_v14 = vld [vmem:[#allocation5 + $0x64] sm:$0xf]  ;;  %v2396_v36 = vld [vmem:[#allocation5 + $0x10] sm:$0xf]  ;;  %v3142_v55 = vor.u32 %v2704_v49, %v2434_v35  ;;  %v3144_v63 = vor.u32 %v2709_v10, %v2440_v1  ;;  %v2699_v11 = vld [vmem:[#allocation5 + $0x30] sm:$0xf0] }
  0x42   :  { %583 = vmatpush.bf16.msrb.mxu0 %v3092_v15  ;;  %v2664_v62 = vld [vmem:[#allocation5 + $0x218] sm:$0xf]  ;;  %v2628_v1 = vld [vmem:[#allocation5 + $0x1d0] sm:$0xf]  ;;  %v2755_v10 = vld [vmem:[#allocation5 + $0x1f0] sm:$0xf0] }
  0x43   :  { %596 = vmatpush.bf16.msrb.mxu1 %v3096_v22  ;;  %4526 = vst [vmem:[#allocation34_spill] sm:$0xff] %v3132_v30 }
  0x44   :  { %609 = vmatpush.bf16.msrb.mxu2 %v3098_v24  ;;  %622 = vmatpush.bf16.msrb.mxu3 %v3103_v37  ;;  %v3135_v37 = vor.u32 %v2714_v26, %v2478_v31  ;;  %4527 = vst [vmem:[#allocation35_spill] sm:$0xff] %v3144_v63  ;;  %v2695_v26 = vld [vmem:[#allocation5 + $0x14] sm:$0xf]  ;;  %v2398_v31 = vld [vmem:[#allocation5 + $0x34] sm:$0xf0] }
  0x45   :  { %v2764_v24 = vld [vmem:[#allocation5 + $0x238] sm:$0xf0]  ;;  %v3154_v35 = vor.u32 %v2695_v26, %v2398_v31  ;;  %v2520_v31 = vld [vmem:[#allocation5 + $0xf8] sm:$0xf] }
  0x46   :  { %584 = vmatpush.bf16.msrb.mxu0 %v3110_v0  ;;  %v2442_v0 = vld [vmem:[#allocation5 + $0x84] sm:$0xf0] }
  0x47   :  { %597 = vmatpush.bf16.msrb.mxu1 %v3114_v41  ;;  %v3138_v41 = vor.u32 %v2708_v48, %v2432_v39  ;;  %v2696_v39 = vld [vmem:[#allocation5 + $0x1c] sm:$0xf]  ;;  %v2406_v48 = vld [vmem:[#allocation5 + $0x3c] sm:$0xf0] }
  0x48   :  { %610 = vmatpush.bf16.msrb.mxu2 %v3116_v4  ;;  %623 = vmatpush.bf16.msrb.mxu3 %v3119_v13  ;;  %v3147_v13 = vor.u32 %v2705_v14, %v2442_v0  ;;  %v2404_v4 = vld [vmem:[#allocation5 + $0x18] sm:$0xf]  ;;  %v3159_v14 = vor.u32 %v2696_v39, %v2406_v48  ;;  %v3161_v0 = vor.u32 %v2764_v24, %v2664_v62  ;;  %v2592_v62 = vld [vmem:[#allocation5 + $0x188] sm:$0xf]  ;;  %v2746_v24 = vld [vmem:[#allocation5 + $0x1a8] sm:$0xf0] }
  0x49   :  { %v2728_v39 = vld [vmem:[#allocation5 + $0x118] sm:$0xf0] }
  0x4a   :  { %585 = vmatpush.bf16.msrb.mxu0 %v3125_v32  ;;  %v2700_v32 = vld [vmem:[#allocation5 + $0x38] sm:$0xf0]  ;;  %v3190_v48 = vor.u32 %v2728_v39, %v2520_v31  ;;  %v2412_v31 = vld [vmem:[#allocation5 + $0x20] sm:$0xf]  ;;  %v2701_v39 = vld [vmem:[#allocation5 + $0x40] sm:$0xf0] }
  0x4b   :  { %598 = vmatpush.bf16.msrb.mxu1 %v3130_v2  ;;  %v3156_v49 = vor.u32 %v2700_v32, %v2404_v4  ;;  %v3168_v4 = vor.u32 %v2755_v10, %v2628_v1  ;;  %v3177_v32 = vor.u32 %v2746_v24, %v2592_v62  ;;  %v2484_v1 = vld [vmem:[#allocation5 + $0xb0] sm:$0xf]  ;;  %v2719_v10 = vld [vmem:[#allocation5 + $0xd0] sm:$0xf0]  ;;  %v2448_v24 = vld [vmem:[#allocation5 + $0x68] sm:$0xf] }
  0x4c   :  { %611 = vmatpush.bf16.msrb.mxu2 %v3132_v30  ;;  %624 = vmatpush.bf16.msrb.mxu3 %v3135_v37  ;;  %v3150_v30 = vor.u32 %v2699_v11, %v2396_v36  ;;  %v2556_v36 = vld [vmem:[#allocation5 + $0x140] sm:$0xf]  ;;  %v2737_v11 = vld [vmem:[#allocation5 + $0x160] sm:$0xf0]  ;;  %v3196_v62 = vor.u32 %v2719_v10, %v2484_v1  ;;  %v3208_v1 = vor.u32 %v2701_v39, %v2412_v31  ;;  %v4529_v10 = vld [vmem:[#allocation26_spill] sm:$0xff] }
  0x4d   :  { %4528 = vst [vmem:[#allocation36_spill] sm:$0xff] %v3156_v49  ;;  %v3184_v26 = vor.u32 %v2737_v11, %v2556_v36  ;;  %v2710_v36 = vld [vmem:[#allocation5 + $0x88] sm:$0xf0]  ;;  %v4532_v31 = vld [vmem:[#allocation30_spill] sm:$0xff]  ;;  %v4533_v39 = vld [vmem:[#allocation31_spill] sm:$0xff] }
  0x4e   :  { %586 = vmatpush.bf16.msrb.mxu0 %v3138_v41  ;;  %v3202_v11 = vor.u32 %v2710_v36, %v2448_v24  ;;  %v4530_v24 = vld [vmem:[#allocation15_spill] sm:$0xff]  ;;  %v4531_v36 = vld [vmem:[#allocation29_spill] sm:$0xff] }
  0x4f   :  { %599 = vmatpush.bf16.msrb.mxu1 %v3142_v55 }
  0x50   :  { %612 = vmatpush.bf16.msrb.mxu2 %v3144_v63  ;;  %625 = vmatpush.bf16.msrb.mxu3 %v3147_v13 }
  0x52   :  { %587 = vmatpush.bf16.msrb.mxu0 %v3150_v30 }
  0x53   :  { %600 = vmatpush.bf16.msrb.mxu1 %v3154_v35 }
  0x54   :  { %613 = vmatpush.bf16.msrb.mxu2 %v3156_v49  ;;  %626 = vmatpush.bf16.msrb.mxu3 %v3159_v14 }
  0x55   :  { %588 = vmatmul.bf16.vlgmr.msrb.gmra.mxu0 %v3107_v53 }
  0x56   :  { %632 = vmatpush.bf16.msra.mxu0 %v3161_v0  ;;  %601 = vmatmul.bf16.vlgmr.msrb.gmra.mxu1 %v3107_v53 }
  0x57   :  { %645 = vmatpush.bf16.msra.mxu1 %v2960_v3  ;;  %614 = vmatmul.bf16.vlgmr.msrb.gmra.mxu2 %v3107_v53 }
  0x58   :  { %658 = vmatpush.bf16.msra.mxu2 %v2962_v7  ;;  %671 = vmatpush.bf16.msra.mxu3 %v2964_v8 }
  0x59   :  { %627 = vmatmul.bf16.vlgmr.msrb.gmra.mxu3 %v3107_v53 }
  0x5a   :  { %633 = vmatpush.bf16.msra.mxu0 %v3168_v4 }
  0x5b   :  { %646 = vmatpush.bf16.msra.mxu1 %v2971_v16 }
  0x5c   :  { %659 = vmatpush.bf16.msra.mxu2 %v2973_v17  ;;  %672 = vmatpush.bf16.msra.mxu3 %v2976_v21 }
  0x5e   :  { %634 = vmatpush.bf16.msra.mxu0 %v3177_v32 }
  0x5f   :  { %647 = vmatpush.bf16.msra.mxu1 %v2981_v29 }
  0x60   :  { %660 = vmatpush.bf16.msra.mxu2 %v2985_v33  ;;  %673 = vmatpush.bf16.msra.mxu3 %v2987_v34 }
  0x62   :  { %635 = vmatpush.bf16.msra.mxu0 %v3184_v26 }
  0x63   :  { %648 = vmatpush.bf16.msra.mxu1 %v2993_v44 }
  0x64   :  { %661 = vmatpush.bf16.msra.mxu2 %v2997_v45  ;;  %674 = vmatpush.bf16.msra.mxu3 %v2999_v46 }
  0x66   :  { %636 = vmatpush.bf16.msra.mxu0 %v3190_v48 }
  0x67   :  { %649 = vmatpush.bf16.msra.mxu1 %v3005_v56 }
  0x68   :  { %662 = vmatpush.bf16.msra.mxu2 %v3009_v57  ;;  %675 = vmatpush.bf16.msra.mxu3 %v3011_v58 }
  0x6a   :  { %637 = vmatpush.bf16.msra.mxu0 %v3196_v62 }
  0x6b   :  { %650 = vmatpush.bf16.msra.mxu1 %v3017_v5 }
  0x6c   :  { %663 = vmatpush.bf16.msra.mxu2 %v3021_v6  ;;  %676 = vmatpush.bf16.msra.mxu3 %v3023_v9 }
  0x6e   :  { %638 = vmatpush.bf16.msra.mxu0 %v3202_v11 }
  0x6f   :  { %651 = vmatpush.bf16.msra.mxu1 %v3029_v23 }
  0x70   :  { %664 = vmatpush.bf16.msra.mxu2 %v3033_v27  ;;  %677 = vmatpush.bf16.msra.mxu3 %v3035_v28 }
  0x72   :  { %639 = vmatpush.bf16.msra.mxu0 %v3208_v1 }
  0x73   :  { %652 = vmatpush.bf16.msra.mxu1 %v3041_v43 }
  0x74   :  { %665 = vmatpush.bf16.msra.mxu2 %v3045_v51  ;;  %678 = vmatpush.bf16.msra.mxu3 %v3047_v52  ;;  %v4537_v52 = vld [vmem:[#allocation17_spill] sm:$0xff] }
  0x75   :  { %640 = vmatmul.bf16.vlgmr.msra.gmra.mxu0 %v3107_v53 }
  0x76   :  { %684 = vmatpush.bf16.msrb.mxu0 %v2967_v12  ;;  %653 = vmatmul.bf16.vlgmr.msra.gmra.mxu1 %v3085_v54 }
  0x77   :  { %697 = vmatpush.bf16.msrb.mxu1 %v3052_v59  ;;  %666 = vmatmul.bf16.vlgmr.msra.gmra.mxu2 %v3085_v54 }
  0x78   :  { %710 = vmatpush.bf16.msrb.mxu2 %v3054_v60  ;;  %723 = vmatpush.bf16.msrb.mxu3 %v3056_v61  ;;  %v4535_v61 = vld [vmem:[#allocation33_spill] sm:$0xff] }
  0x79   :  { %679 = vmatmul.bf16.vlgmr.msra.gmra.mxu3 %v3085_v54 }
  0x7a   :  { %685 = vmatpush.bf16.msrb.mxu0 %v2978_v25 }
  0x7b   :  { %698 = vmatpush.bf16.msrb.mxu1 %v3065_v18 }
  0x7c   :  { %711 = vmatpush.bf16.msrb.mxu2 %v3069_v19  ;;  %724 = vmatpush.bf16.msrb.mxu3 %v3071_v20  ;;  %v4534_v20 = vld [vmem:[#allocation16_spill] sm:$0xff] }
  0x7e   :  { %686 = vmatpush.bf16.msrb.mxu0 %v2990_v38 }
  0x7f   :  { %699 = vmatpush.bf16.msrb.mxu1 %v3077_v40 }
  0x80   :  { %712 = vmatpush.bf16.msrb.mxu2 %v3081_v42  ;;  %725 = vmatpush.bf16.msrb.mxu3 %v3083_v47  ;;  %v4536_v47 = vld [vmem:[#allocation34_spill] sm:$0xff] }
  0x82   :  { %687 = vmatpush.bf16.msrb.mxu0 %v3002_v50 }
  0x83   :  { %700 = vmatpush.bf16.msrb.mxu1 %v3092_v15 }
  0x84   :  { %713 = vmatpush.bf16.msrb.mxu2 %v3096_v22  ;;  %726 = vmatpush.bf16.msrb.mxu3 %v4529_v10  ;;  %v4538_v10 = vld [vmem:[#allocation19_spill] sm:$0xff] }
  0x86   :  { %688 = vmatpush.bf16.msrb.mxu0 %v4530_v24 }
  0x87   :  { %701 = vmatpush.bf16.msrb.mxu1 %v4531_v36 }
  0x88   :  { %714 = vmatpush.bf16.msrb.mxu2 %v4532_v31  ;;  %727 = vmatpush.bf16.msrb.mxu3 %v4533_v39  ;;  %v4539_v39 = vld [vmem:[#allocation21_spill] sm:$0xff] }
  0x8a   :  { %689 = vmatpush.bf16.msrb.mxu0 %v4534_v20 }
  0x8b   :  { %702 = vmatpush.bf16.msrb.mxu1 %v4535_v61 }
  0x8c   :  { %715 = vmatpush.bf16.msrb.mxu2 %v3130_v2  ;;  %728 = vmatpush.bf16.msrb.mxu3 %v4536_v47 }
  0x8e   :  { %690 = vmatpush.bf16.msrb.mxu0 %v4537_v52 }
  0x8f   :  { %703 = vmatpush.bf16.msrb.mxu1 %v3138_v41 }
  0x90   :  { %716 = vmatpush.bf16.msrb.mxu2 %v3142_v55  ;;  %729 = vmatpush.bf16.msrb.mxu3 %v3144_v63  ;;  %v4540_v63 = vld [vmem:[#allocation23_spill] sm:$0xff] }
  0x92   :  { %691 = vmatpush.bf16.msrb.mxu0 %v4538_v10 }
  0x93   :  { %704 = vmatpush.bf16.msrb.mxu1 %v3150_v30 }
  0x94   :  { %717 = vmatpush.bf16.msrb.mxu2 %v3154_v35  ;;  %730 = vmatpush.bf16.msrb.mxu3 %v3156_v49  ;;  %v4541_v49 = vld [vmem:[#allocation25_spill] sm:$0xff] }
  0x95   :  { %692 = vmatmul.bf16.vlgmr.msrb.gmra.mxu0 %v3085_v54 }
  0x96   :  { %736 = vmatpush.bf16.msra.mxu0 %v4539_v39  ;;  %705 = vmatmul.bf16.vlgmr.msrb.gmra.mxu1 %v3085_v54 }
  0x97   :  { %749 = vmatpush.bf16.msra.mxu1 %v3161_v0  ;;  %718 = vmatmul.bf16.vlgmr.msrb.gmra.mxu2 %v3085_v54 }
  0x98   :  { %765 = vmatpush.bf16.msra.mxu2 %v2960_v3  ;;  %778 = vmatpush.bf16.msra.mxu3 %v2962_v7  ;;  %v4542_v3 = vld [vmem:[#allocation28_spill] sm:$0xff] }
  0x99   :  { %731 = vmatmul.bf16.vlgmr.msrb.gmra.mxu3 %v3085_v54  ;;  %v4543_v7 = vld [vmem:[#allocation32_spill] sm:$0xff] }
  0x9a   :  { %737 = vmatpush.bf16.msra.mxu0 %v4540_v63 }
  0x9b   :  { %750 = vmatpush.bf16.msra.mxu1 %v3168_v4 }
  0x9c   :  { %766 = vmatpush.bf16.msra.mxu2 %v2971_v16  ;;  %779 = vmatpush.bf16.msra.mxu3 %v2973_v17  ;;  %v762_v16 = vunpack.c.l.bf16 %v3107_v53  ;;  %v4544_v17 = vld [vmem:[#allocation27_spill] sm:$0xff] }
  0x9e   :  { %738 = vmatpush.bf16.msra.mxu0 %v4541_v49 }
  0x9f   :  { %751 = vmatpush.bf16.msra.mxu1 %v3177_v32 }
  0xa0   :  { %767 = vmatpush.bf16.msra.mxu2 %v2981_v29  ;;  %780 = vmatpush.bf16.msra.mxu3 %v2985_v33  ;;  %v763_v29 = vsub.f32 %v4544_v17, %v762_v16 }
  0xa2   :  { %739 = vmatpush.bf16.msra.mxu0 %v4542_v3  ;;  %v3290_v33 = vpack.c.bf16 %v763_v29, %v763_v29 }
  0xa3   :  { %752 = vmatpush.bf16.msra.mxu1 %v3184_v26 }
  0xa4   :  { %768 = vmatpush.bf16.msra.mxu2 %v2993_v44  ;;  %781 = vmatpush.bf16.msra.mxu3 %v2997_v45  ;;  %v4546_v45 = vld [vmem:[#allocation20_spill] sm:$0xff] }
  0xa6   :  { %740 = vmatpush.bf16.msra.mxu0 %v4543_v7 }
  0xa7   :  { %753 = vmatpush.bf16.msra.mxu1 %v3190_v48 }
  0xa8   :  { %769 = vmatpush.bf16.msra.mxu2 %v3005_v56  ;;  %782 = vmatpush.bf16.msra.mxu3 %v3009_v57 }
  0xaa   :  { %741 = vmatpush.bf16.msra.mxu0 %v3135_v37 }
  0xab   :  { %754 = vmatpush.bf16.msra.mxu1 %v3196_v62 }
  0xac   :  { %770 = vmatpush.bf16.msra.mxu2 %v3017_v5  ;;  %783 = vmatpush.bf16.msra.mxu3 %v3021_v6  ;;  %v4549_v6 = vld [vmem:[#allocation26_spill] sm:$0xff] }
  0xae   :  { %742 = vmatpush.bf16.msra.mxu0 %v3147_v13 }
  0xaf   :  { %755 = vmatpush.bf16.msra.mxu1 %v3202_v11 }
  0xb0   :  { %771 = vmatpush.bf16.msra.mxu2 %v3029_v23  ;;  %784 = vmatpush.bf16.msra.mxu3 %v3033_v27 }
  0xb2   :  { %743 = vmatpush.bf16.msra.mxu0 %v3159_v14 }
  0xb3   :  { %756 = vmatpush.bf16.msra.mxu1 %v3208_v1 }
  0xb4   :  { %772 = vmatpush.bf16.msra.mxu2 %v3041_v43  ;;  %785 = vmatpush.bf16.msra.mxu3 %v3045_v51 }
  0xb5   :  { %744 = vmatmul.bf16.vlgmr.msra.gmra.mxu0 %v3085_v54 }
  0xb6   :  { %791 = vmatpush.bf16.msrb.mxu0 %v2964_v8  ;;  %757 = vmatmul.bf16.vlgmr.msra.gmra.mxu1 %v3085_v54  ;;  %v537_v8 = vpop.f32.mrf.mxu0 }
  0xb7   :  { %804 = vmatpush.bf16.msrb.mxu1 %v2967_v12  ;;  %773 = vmatmul.bf16.vlgmr.msra.gmra.mxu2 %v3290_v33  ;;  %v550_v12 = vpop.f32.mrf.mxu1 }
  0xb8   :  { %817 = vmatpush.bf16.msrb.mxu2 %v3052_v59  ;;  %830 = vmatpush.bf16.msrb.mxu3 %v3054_v60  ;;  %v4551_v59 = vld [vmem:[#allocation35_spill] sm:$0xff]  ;;  %v4552_v60 = vld [vmem:[#allocation36_spill] sm:$0xff] }
  0xb9   :  { %786 = vmatmul.bf16.vlgmr.msra.gmra.mxu3 %v3290_v33 }
  0xba   :  { %792 = vmatpush.bf16.msrb.mxu0 %v2976_v21 }
  0xbb   :  { %805 = vmatpush.bf16.msrb.mxu1 %v2978_v25 }
  0xbc   :  { %818 = vmatpush.bf16.msrb.mxu2 %v3065_v18  ;;  %831 = vmatpush.bf16.msrb.mxu3 %v3069_v19  ;;  %v563_v21 = vpop.f32.mrf.mxu2 }
  0xbe   :  { %793 = vmatpush.bf16.msrb.mxu0 %v2987_v34  ;;  %v576_v25 = vpop.f32.mrf.mxu3  ;;  %v4545_v34 = vld [vmem:[#allocation18_spill] sm:$0xff] }
  0xbf   :  { %806 = vmatpush.bf16.msrb.mxu1 %v2990_v38  ;;  %v539_v38 = vpop.f32.mrf.mxu0  ;;  %v552_v44 = vpop.f32.mrf.mxu1 }
  0xc0   :  { %819 = vmatpush.bf16.msrb.mxu2 %v3077_v40  ;;  %832 = vmatpush.bf16.msrb.mxu3 %v3081_v42 }
  0xc2   :  { %794 = vmatpush.bf16.msrb.mxu0 %v2999_v46 }
  0xc3   :  { %807 = vmatpush.bf16.msrb.mxu1 %v3002_v50  ;;  %v4547_v50 = vld [vmem:[#allocation22_spill] sm:$0xff] }
  0xc4   :  { %820 = vmatpush.bf16.msrb.mxu2 %v3092_v15  ;;  %833 = vmatpush.bf16.msrb.mxu3 %v3096_v22  ;;  %v565_v46 = vpop.f32.mrf.mxu2 }
  0xc6   :  { %795 = vmatpush.bf16.msrb.mxu0 %v3011_v58  ;;  %v578_v56 = vpop.f32.mrf.mxu3  ;;  %v4548_v58 = vld [vmem:[#allocation24_spill] sm:$0xff] }
  0xc7   :  { %808 = vmatpush.bf16.msrb.mxu1 %v4530_v24 }
  0xc8   :  { %821 = vmatpush.bf16.msrb.mxu2 %v4531_v36  ;;  %834 = vmatpush.bf16.msrb.mxu3 %v4532_v31 }
  0xca   :  { %796 = vmatpush.bf16.msrb.mxu0 %v3023_v9 }
  0xcb   :  { %809 = vmatpush.bf16.msrb.mxu1 %v4534_v20 }
  0xcc   :  { %822 = vmatpush.bf16.msrb.mxu2 %v4535_v61  ;;  %835 = vmatpush.bf16.msrb.mxu3 %v3130_v2 }
  0xce   :  { %797 = vmatpush.bf16.msrb.mxu0 %v3035_v28  ;;  %v4550_v28 = vld [vmem:[#allocation31_spill] sm:$0xff] }
  0xcf   :  { %810 = vmatpush.bf16.msrb.mxu1 %v4537_v52 }
  0xd0   :  { %823 = vmatpush.bf16.msrb.mxu2 %v3138_v41  ;;  %836 = vmatpush.bf16.msrb.mxu3 %v3142_v55 }
  0xd2   :  { %798 = vmatpush.bf16.msrb.mxu0 %v4545_v34  ;;  %v589_v5 = vpop.f32.mrf.mxu0 }
  0xd3   :  { %811 = vmatpush.bf16.msrb.mxu1 %v4538_v10  ;;  %v602_v57 = vpop.f32.mrf.mxu1 }
  0xd4   :  { %824 = vmatpush.bf16.msrb.mxu2 %v3150_v30  ;;  %837 = vmatpush.bf16.msrb.mxu3 %v3154_v35 }
  0xd5   :  { %799 = vmatmul.bf16.vlgmr.msrb.gmra.mxu0 %v3290_v33 }
  0xd6   :  { %843 = vmatpush.bf16.msra.mxu0 %v4546_v45  ;;  %812 = vmatmul.bf16.vlgmr.msrb.gmra.mxu1 %v3290_v33 }
  0xd7   :  { %856 = vmatpush.bf16.msra.mxu1 %v4539_v39  ;;  %825 = vmatmul.bf16.vlgmr.msrb.gmra.mxu2 %v3290_v33 }
  0xd8   :  { %869 = vmatpush.bf16.msra.mxu2 %v3161_v0  ;;  %838 = vmatmul.bf16.vlgmr.msrb.gmra.mxu3 %v3290_v33 }
  0xda   :  { %844 = vmatpush.bf16.msra.mxu0 %v4547_v50  ;;  %v615_v9 = vpop.f32.mrf.mxu2  ;;  %v591_v43 = vpop.f32.mrf.mxu0 }
  0xdb   :  { %857 = vmatpush.bf16.msra.mxu1 %v4540_v63  ;;  %v604_v27 = vpop.f32.mrf.mxu1 }
  0xdc   :  { %870 = vmatpush.bf16.msra.mxu2 %v3168_v4  ;;  %v3345_v23 = vpop.f32.mrf.mxu3 }
  0xde   :  { %845 = vmatpush.bf16.msra.mxu0 %v4548_v58 }
  0xdf   :  { %858 = vmatpush.bf16.msra.mxu1 %v4541_v49 }
  0xe0   :  { %871 = vmatpush.bf16.msra.mxu2 %v3177_v32 }
  0xe2   :  { %846 = vmatpush.bf16.msra.mxu0 %v4549_v6  ;;  %v617_v51 = vpop.f32.mrf.mxu2 }
  0xe3   :  { %859 = vmatpush.bf16.msra.mxu1 %v4542_v3 }
  0xe4   :  { %872 = vmatpush.bf16.msra.mxu2 %v3184_v26  ;;  %v630_v52 = vpop.f32.mrf.mxu3 }
  0xe6   :  { %847 = vmatpush.bf16.msra.mxu0 %v4550_v28 }
  0xe7   :  { %860 = vmatpush.bf16.msra.mxu1 %v4543_v7 }
  0xe8   :  { %873 = vmatpush.bf16.msra.mxu2 %v3190_v48 }
  0xea   :  { %848 = vmatpush.bf16.msra.mxu0 %v4536_v47 }
  0xeb   :  { %861 = vmatpush.bf16.msra.mxu1 %v3135_v37 }
  0xec   :  { %874 = vmatpush.bf16.msra.mxu2 %v3196_v62  ;;  %v3376_v62 = vld [vmem:[#allocation7] sm:$0xff] }
  0xed   :  { %v896_v10 = vperm.slane %v3376_v62, 1 }
  0xee   :  { %849 = vmatpush.bf16.msra.mxu0 %v4551_v59 }
  0xef   :  { %862 = vmatpush.bf16.msra.mxu1 %v3147_v13 }
  0xf0   :  { %875 = vmatpush.bf16.msra.mxu2 %v3202_v11  ;;  %v895_v11 = vperm.slane %v3376_v62, 0 }
  0xf2   :  { %850 = vmatpush.bf16.msra.mxu0 %v4552_v60  ;;  %v641_v19 = vpop.f32.mrf.mxu0 }
  0xf3   :  { %863 = vmatpush.bf16.msra.mxu1 %v3159_v14  ;;  %v654_v61 = vpop.f32.mrf.mxu1 }
  0xf4   :  { %876 = vmatpush.bf16.msra.mxu2 %v3208_v1  ;;  %v655_v18 = vadd.f32 %v654_v61, %v537_v8  ;;  %v2915_v61 = vmov 683565275  }
  0xf5   :  { %851 = vmatmul.bf16.vlgmr.msra.gmra.mxu0 %v3290_v33 }
  0xf6   :  { %864 = vmatmul.bf16.vlgmr.msra.gmra.mxu1 %v3290_v33 }
  0xf7   :  { %877 = vmatmul.bf16.vlgmr.msra.gmra.mxu2 %v3290_v33 }
  0xfa   :  { %v667_v20 = vpop.f32.mrf.mxu2  ;;  %v643_v15 = vpop.f32.mrf.mxu0 }
  0xfb   :  { %v668_v42 = vadd.f32 %v667_v20, %v550_v12  ;;  %v656_v54 = vpop.f32.mrf.mxu1 }
  0xfc   :  { %v680_v40 = vpop.f32.mrf.mxu3  ;;  %v2917_v54 = vmov 2131351028  }
  0xfd   :  { %v3362_v47 = vadd.f32 %v680_v40, %v563_v21 }
 0x102   :  { %v669_v22 = vpop.f32.mrf.mxu2 }
 0x104   :  { %v682_v37 = vpop.f32.mrf.mxu3 }
 0x105   :  { %v2918_v37 = vmov 2102212464  }
 0x112   :  { %v693_v53 = vpop.f32.mrf.mxu0 }
 0x113   :  { %v3364_v41 = vadd.f32 %v693_v53, %v576_v25  ;;  %v706_v13 = vpop.f32.mrf.mxu1 }
 0x114   :  { %v3366_v2 = vadd.f32 %v706_v13, %v589_v5 }
 0x11a   :  { %v719_v30 = vpop.f32.mrf.mxu2  ;;  %v695_v35 = vpop.f32.mrf.mxu0 }
 0x11b   :  { %v3368_v55 = vadd.f32 %v719_v30, %v602_v57  ;;  %v708_v14 = vpop.f32.mrf.mxu1  ;;  %v2919_v30 = vmov 920167782  }
 0x11c   :  { %v732_v63 = vpop.f32.mrf.mxu3  ;;  %v2920_v14 = vmov 1326507024  }
 0x11d   :  { %v3370_v49 = vadd.f32 %v732_v63, %v615_v9 }
 0x122   :  { %v721_v0 = vpop.f32.mrf.mxu2 }
 0x124   :  { %v734_v4 = vpop.f32.mrf.mxu3 }
 0x132   :  { %v3372_v32 = vpop.f32.mrf.mxu0 }
 0x133   :  { %v758_v26 = vpop.f32.mrf.mxu1 }
 0x134   :  { %v3374_v48 = vadd.f32 %v758_v26, %v641_v19  ;;  %v2916_v19 = vmov 2475754826  }
 0x13a   :  { %v774_v1 = vpop.f32.mrf.mxu2  ;;  %v747_v31 = vpop.f32.mrf.mxu0 }
 0x13b   :  { %v3380_v24 = vadd.f32 %v774_v1, %v655_v18  ;;  %v760_v3 = vpop.f32.mrf.mxu1 }
 0x13c   :  { %v787_v36 = vpop.f32.mrf.mxu3 }
 0x13d   :  { %v3382_v39 = vadd.f32 %v787_v36, %v668_v42  ;;  %v3385_v7 = vadd.f32 %v895_v11, %v3380_v24 }
 0x13f   :  { %v3388_v16 = vadd.f32 %v896_v10, %v3382_v39  ;;  %v922_v17 = vand.u32 2147483647, %v3385_v7  ;;  %v925_v29 = vand.u32 2139095040, %v3385_v7 }
 0x141   :  { %v1077_v33 = vand.u32 2147483647, %v3388_v16  ;;  %v1080_v8 = vand.u32 2139095040, %v3388_v16  ;;  %v926_v12 = vshrl.u32 %v925_v29, 23  ;;  %v929_v21 = vand.u32 8388607, %v922_v17 }
 0x142   :  { %v776_v38 = vpop.f32.mrf.mxu2 }
 0x143   :  { %v1081_v25 = vshrl.u32 %v1080_v8, 23  ;;  %v1084_v34 = vand.u32 8388607, %v1077_v33  ;;  %v2666_v44 = vadd.s32 4294967169, %v926_v12  ;;  %v930_v45 = vor.u32 8388608, %v929_v21 }
 0x144   :  { %v789_v46 = vpop.f32.mrf.mxu3 }
 0x145   :  { %v2669_v50 = vadd.s32 4294967169, %v1081_v25  ;;  %v1085_v56 = vor.u32 8388608, %v1084_v34  ;;  %v932_v57 = vadd.s32 1, %v2666_v44  ;;  %v3398_v5 = vshll.u32 %v930_v45, 8 }
 0x147   :  { %v1087_v58 = vadd.s32 1, %v2669_v50  ;;  %vm933_vm0 = vcmp.gt.s32.totalorder %v932_v57, 0  ;;  %v3400_v9 = vshll.u32 %v1085_v56, 8  ;;  %v3403_v51 = vand.u32 65535, %v3398_v5 }
 0x148   :  { %v934_v6 = vsel %vm933_vm0, %v932_v57, 0  ;;  %v3406_v52 = vshrl.u32 %v3398_v5, 16 }
 0x149   :  { %vm1088_vm1 = vcmp.gt.s32.totalorder %v1087_v58, 0  ;;  %v936_v27 = vand.u32 31, %v934_v6  ;;  %v3410_v60 = vshrl.u32 %v934_v6, 5  ;;  %v3415_v40 = vand.u32 65535, %v3400_v9 }
 0x14a   :  { %v1089_v28 = vsel %vm1088_vm1, %v1087_v58, 0 }
 0x14b   :  { %v937_v43 = vsub.s32 32, %v936_v27  ;;  %v3408_v59 = vand.u32 31, %v1089_v28  ;;  %v939_v18 = vshll.u32 %v2915_v61, %v936_v27  ;;  %v942_v20 = vshll.u32 %v2916_v19, %v936_v27 }
 0x14c   :  { %v945_v22 = vshll.u32 %v2917_v54, %v936_v27  ;;  %v948_v13 = vshll.u32 %v2918_v37, %v936_v27  ;;  %v951_v35 = vshll.u32 %v2919_v30, %v936_v27  ;;  %vm954_vm2 = vcmp.lt.s32.totalorder %v3410_v60, 1 }
 0x14d   :  { %v940_v42 = vshrl.u32 %v2916_v19, %v937_v43  ;;  %v943_v15 = vshrl.u32 %v2917_v54, %v937_v43  ;;  %v946_v53 = vshrl.u32 %v2918_v37, %v937_v43  ;;  %v949_v63 = vshrl.u32 %v2919_v30, %v937_v43 }
 0x14e   :  { %v952_v0 = vshrl.u32 %v2920_v14, %v937_v43  ;;  %v3426_v1 = vsub.s32 32, %v3408_v59  ;;  %vm955_vm3 = vcmp.lt.s32.totalorder %v3410_v60, 2  ;;  %v938_v31 = vshrl.u32 %v2915_v61, %v937_v43 }
 0x14f   :  { %v941_v4 = vor.u32 %v940_v42, %v939_v18  ;;  %v944_v26 = vor.u32 %v943_v15, %v942_v20  ;;  %v947_v11 = vor.u32 %v946_v53, %v945_v22  ;;  %v950_v10 = vor.u32 %v949_v63, %v948_v13 }
 0x150   :  { %v953_v36 = vor.u32 %v952_v0, %v951_v35  ;;  %vm957_vm4 = vcmp.lt.s32.totalorder %v3410_v60, 4  ;;  %vm956_vm5 = vcmp.lt.s32.totalorder %v3410_v60, 3  ;;  %v1094_v25 = vshll.u32 %v2915_v61, %v3408_v59 }
 0x151   :  { %v962_v3 = vsel %vm954_vm2, %v941_v4, %v944_v26  ;;  %v966_v29 = vsel %vm954_vm2, %v944_v26, %v947_v11  ;;  %v963_v12 = vsel %vm957_vm4, %v950_v10, 920167782  ;;  %v959_v34 = vsel %vm957_vm4, %v947_v11, 2102212464 }
 0x152   :  { %v3436_v8 = vpop.f32.mrf.mxu0  ;;  %v967_v21 = vsel %vm957_vm4, %v953_v36, 1326507024  ;;  %v964_v38 = vsel %vm956_vm5, %v947_v11, %v963_v12  ;;  %v1095_v45 = vshrl.u32 %v2916_v19, %v3426_v1  ;;  %v1097_v56 = vshll.u32 %v2916_v19, %v3408_v59 }
 0x153   :  { %v968_v44 = vsel %vm956_vm5, %v950_v10, %v967_v21  ;;  %v965_v46 = vsel %vm955_vm3, %v962_v3, %v964_v38  ;;  %v1098_v57 = vshrl.u32 %v2917_v54, %v3426_v1  ;;  %v958_v18 = vsel %vm954_vm2, %v938_v31, %v941_v4 }
 0x154   :  { %v969_v50 = vsel %vm955_vm3, %v966_v29, %v968_v44  ;;  %v995_v27 = vand.u32 65535, %v965_v46  ;;  %v996_v43 = vshrl.u32 %v965_v46, 16  ;;  %v960_v20 = vsel %vm956_vm5, %v944_v26, %v959_v34 }
 0x155   :  { %v973_v58 = vand.u32 65535, %v969_v50  ;;  %v974_v6 = vshrl.u32 %v969_v50, 16  ;;  %v3459_v42 = vshrl.u32 %v1089_v28, 5  ;;  %v3461_v15 = vor.u32 %v1095_v45, %v1094_v25 }
 0x156   :  { %v3465_v13 = vor.u32 %v1098_v57, %v1097_v56  ;;  %v1101_v63 = vshrl.u32 %v2918_v37, %v3426_v1  ;;  %v998_v0 = vmul.u32 %v996_v43, %v3403_v51  ;;  %v999_v4 = vmul.u32 %v995_v27, %v3406_v52 }
 0x157   :  { %v976_v22 = vmul.u32 %v974_v6, %v3403_v51  ;;  %v977_v53 = vmul.u32 %v973_v58, %v3406_v52  ;;  %v975_v35 = vmul.u32 %v973_v58, %v3403_v51  ;;  %v1100_v28 = vshll.u32 %v2917_v54, %v3408_v59 }
 0x158   :  { %v978_v26 = vmul.u32 %v974_v6, %v3406_v52  ;;  %v997_v10 = vmul.u32 %v995_v27, %v3403_v51  ;;  %v1000_v36 = vmul.u32 %v996_v43, %v3406_v52  ;;  %v1001_v21 = vshll.u32 %v998_v0, 16 }
 0x159   :  { %v979_v11 = vshll.u32 %v976_v22, 16  ;;  %v980_v3 = vshrl.u32 %v976_v22, 16  ;;  %v981_v29 = vshll.u32 %v977_v53, 16  ;;  %v982_v12 = vshrl.u32 %v977_v53, 16 }
 0x15a   :  { %v802_v31 = vpop.f32.mrf.mxu0  ;;  %v1003_v34 = vshll.u32 %v999_v4, 16  ;;  %v1102_v38 = vor.u32 %v1101_v63, %v1100_v28  ;;  %v2921_v44 = vmov 0   ;;  %vm1005_vm7 = vc.u32 %v997_v10, %v1001_v21 }
 0x15b   :  { %vm983_vm6 = vc.u32 %v975_v35, %v979_v11  ;;  %v985_v25 = vadd.s32 %v979_v11, %v975_v35  ;;  %v1007_v46 = vadd.s32 %v1001_v21, %v997_v10  ;;  %v1104_v50 = vshrl.u32 %v2919_v30, %v3426_v1 }
 0x15c   :  { %v984_v45 = vsel %vm983_vm6, 1, %v2921_v44  ;;  %v1006_v52 = vsel %vm1005_vm7, 1, %v2921_v44  ;;  %v1103_v56 = vshll.u32 %v2918_v37, %v3408_v59  ;;  %v1106_v6 = vshll.u32 %v2919_v30, %v3408_v59 }
 0x15d   :  { %v986_v51 = vadd.s32 %v984_v45, %v978_v26  ;;  %vm987_vm8 = vc.u32 %v985_v25, %v981_v29  ;;  %v1008_v58 = vadd.s32 %v1006_v52, %v1000_v36  ;;  %vm1009_vm9 = vc.u32 %v1007_v46, %v1003_v34 }
 0x15e   :  { %v988_v57 = vsel %vm987_vm8, 1, %v2921_v44  ;;  %v1010_v43 = vsel %vm1009_vm9, 1, %v2921_v44  ;;  %v1105_v22 = vor.u32 %v1104_v50, %v1103_v56  ;;  %v1107_v53 = vshrl.u32 %v2920_v14, %v3426_v1 }
 0x15f   :  { %v990_v27 = vadd.s32 %v988_v57, %v986_v51  ;;  %v1002_v63 = vshrl.u32 %v998_v0, 16  ;;  %v1004_v35 = vshrl.u32 %v999_v4, 16  ;;  %v3489_v28 = vadd.s32 %v1007_v46, %v1003_v34  ;;  %v813_v34 = vpop.f32.mrf.mxu1 }
 0x160   :  { %v1012_v26 = vadd.s32 %v1010_v43, %v1008_v58  ;;  %v1108_v10 = vor.u32 %v1107_v53, %v1106_v6  ;;  %vm1109_vm10 = vcmp.lt.s32.totalorder %v3459_v42, 1  ;;  %vm1112_vm11 = vcmp.lt.s32.totalorder %v3459_v42, 4 }
 0x161   :  { %v991_v11 = vadd.s32 %v990_v27, %v980_v3  ;;  %vm1111_vm12 = vcmp.lt.s32.totalorder %v3459_v42, 3  ;;  %v1117_v59 = vsel %vm1109_vm10, %v3461_v15, %v3465_v13  ;;  %v1118_v0 = vsel %vm1112_vm11, %v1105_v22, 920167782 }
 0x162   :  { %v1013_v36 = vadd.s32 %v1012_v26, %v1002_v63  ;;  %vm1110_vm13 = vcmp.lt.s32.totalorder %v3459_v42, 2  ;;  %v1119_v31 = vsel %vm1111_vm12, %v1102_v38, %v1118_v0  ;;  %v1121_v3 = vsel %vm1109_vm10, %v3465_v13, %v1102_v38 }
 0x163   :  { %v3500_v4 = vadd.s32 %v991_v11, %v982_v12  ;;  %v961_v29 = vsel %vm955_vm3, %v958_v18, %v960_v20  ;;  %v1120_v25 = vsel %vm1110_vm13, %v1117_v59, %v1119_v31  ;;  %v1122_v12 = vsel %vm1112_vm11, %v1108_v10, 1326507024 }
 0x164   :  { %v1014_v21 = vadd.s32 %v1013_v36, %v1004_v35  ;;  %v1123_v45 = vsel %vm1111_vm12, %v1105_v22, %v1122_v12  ;;  %v1127_v46 = vshrl.u32 %v3400_v9, 16  ;;  %v1150_v50 = vand.u32 65535, %v1120_v25 }
 0x165   :  { %vm1017_vm14 = vc.u32 %v3500_v4, %v3489_v28  ;;  %v1093_v60 = vshrl.u32 %v2915_v61, %v3426_v1  ;;  %v1124_v18 = vsel %vm1110_vm13, %v1121_v3, %v1123_v45  ;;  %v1151_v20 = vshrl.u32 %v1120_v25, 16 }
 0x166   :  { %v1018_v51 = vadd.s32 1, %v1014_v21  ;;  %v1015_v52 = vmul.u32 %v3398_v5, %v961_v29  ;;  %v1128_v56 = vand.u32 65535, %v1124_v18  ;;  %v1129_v57 = vshrl.u32 %v1124_v18, 16 }
 0x167   :  { %v897_v58 = vperm.slane %v3376_v62, 2  ;;  %v1113_v27 = vsel %vm1109_vm10, %v1093_v60, %v3461_v15  ;;  %v1153_v43 = vmul.u32 %v1151_v20, %v3415_v40  ;;  %v1154_v22 = vmul.u32 %v1150_v50, %v1127_v46  ;;  %v815_v29 = vpop.f32.mrf.mxu1 }
 0x168   :  { %v1019_v6 = vsel %vm1017_vm14, %v1018_v51, %v1014_v21  ;;  %v1114_v1 = vsel %vm1112_vm11, %v1102_v38, 2102212464  ;;  %v1131_v63 = vmul.u32 %v1129_v57, %v3415_v40  ;;  %v1132_v35 = vmul.u32 %v1128_v56, %v1127_v46 }
 0x169   :  { %v1020_v53 = vadd.s32 %v1019_v6, %v1015_v52  ;;  %v1152_v5 = vmul.u32 %v1150_v50, %v3415_v40  ;;  %v1155_v26 = vmul.u32 %v1151_v20, %v1127_v46  ;;  %v1156_v11 = vshll.u32 %v1153_v43, 16 }
 0x16a   :  { %v3535_v10 = vadd.f32 %v3436_v8, %v3362_v47  ;;  %v1130_v15 = vmul.u32 %v1128_v56, %v3415_v40  ;;  %v1133_v59 = vmul.u32 %v1129_v57, %v1127_v46  ;;  %v1134_v0 = vshll.u32 %v1131_v63, 16 }
 0x16b   :  { %v1021_v36 = vadd.s32 536870912, %v1020_v53  ;;  %v1136_v31 = vshll.u32 %v1132_v35, 16  ;;  %v1158_v3 = vshll.u32 %v1154_v22, 16  ;;  %vm1160_vm15 = vc.u32 %v1152_v5, %v1156_v11 }
 0x16c   :  { %v1162_v38 = vadd.s32 %v1156_v11, %v1152_v5  ;;  %vm1138_vm0 = vc.u32 %v1130_v15, %v1134_v0  ;;  %v1140_v25 = vadd.s32 %v1134_v0, %v1130_v15  ;;  %v1161_v12 = vsel %vm1160_vm15, 1, %v2921_v44 }
 0x16d   :  { %v1022_v21 = vshrl.u32 %v1021_v36, 30  ;;  %v1115_v47 = vsel %vm1111_vm12, %v3465_v13, %v1114_v1  ;;  %v1139_v8 = vsel %vm1138_vm0, 1, %v2921_v44  ;;  %v1163_v45 = vadd.s32 %v1161_v12, %v1155_v26 }
 0x16e   :  { %vm1164_vm1 = vc.u32 %v1162_v38, %v1158_v3  ;;  %v1135_v46 = vshrl.u32 %v1131_v63, 16  ;;  %v1141_v50 = vadd.s32 %v1139_v8, %v1133_v59  ;;  %vm1142_vm2 = vc.u32 %v1140_v25, %v1136_v31 }
 0x16f   :  { %v1023_v40 = vshll.u32 %v1022_v21, 30  ;;  %v1143_v51 = vsel %vm1142_vm2, 1, %v2921_v44  ;;  %v1165_v60 = vsel %vm1164_vm1, 1, %v2921_v44  ;;  %v3546_v18 = vadd.f32 %v897_v58, %v3535_v10 }
 0x170   :  { %v3549_v20 = vadd.f32 %v813_v34, %v3364_v41  ;;  %v1046_v13 = vsub.s32 4, %v1022_v21  ;;  %v1145_v56 = vadd.s32 %v1143_v51, %v1141_v50  ;;  %v1167_v57 = vadd.s32 %v1165_v60, %v1163_v45  ;;  %v2317_v50 = vld [vmem:[#allocation8] sm:$0xff] }
 0x171   :  { %v1024_v52 = vsub.s32 %v1020_v53, %v1023_v40  ;;  %vm924_vm3 = vcmp.lt.s32.totalorder %v3385_v7, 0  ;;  %v1157_v6 = vshrl.u32 %v1153_v43, 16  ;;  %v1235_v1 = vand.u32 2139095040, %v3546_v18 }
 0x172   :  { %v1137_v5 = vshrl.u32 %v1132_v35, 16  ;;  %v1146_v26 = vadd.s32 %v1145_v56, %v1135_v46  ;;  %v1116_v58 = vsel %vm1110_vm13, %v1113_v27, %v1115_v47  ;;  %v1159_v11 = vshrl.u32 %v1154_v22, 16 }
 0x173   :  { %vm1025_vm4 = vcmp.lt.s32.totalorder %v1024_v52, 0  ;;  %v1026_v63 = vsub.s32 0, %v1024_v52  ;;  %v1168_v36 = vadd.s32 %v1167_v57, %v1157_v6  ;;  %v1236_v41 = vshrl.u32 %v1235_v1, 23 }
 0x174   :  { %v1047_v53 = vsel %vm924_vm3, %v1046_v13, %v1022_v21  ;;  %v1147_v15 = vadd.s32 %v1146_v26, %v1137_v5  ;;  %v1166_v59 = vadd.s32 %v1162_v38, %v1158_v3  ;;  %v1232_v31 = vand.u32 2147483647, %v3546_v18 }
 0x175   :  { %v1027_v34 = vsel %vm1025_vm4, %v1026_v63, %v1024_v52  ;;  %v1169_v43 = vadd.s32 %v1168_v36, %v1159_v11  ;;  %v2672_v29 = vadd.s32 4294967169, %v1236_v41  ;;  %vm3560_vm5 = vcmp.le.f32.partialorder %v922_v17, 0.7853982 }
 0x176   :  { %v1028_v0 = vclz %v1027_v34  ;;  %vm1172_vm6 = vc.u32 %v1147_v15, %v1166_v59  ;;  %v1049_v21 = vsel %vm3560_vm5, 0, %v1047_v53  ;;  %v1170_v3 = vmul.u32 %v3400_v9, %v1116_v58 }
 0x177   :  { %v1173_v27 = vadd.s32 1, %v1169_v43  ;;  %v1242_v22 = vadd.s32 1, %v2672_v29  ;;  %v1239_v25 = vand.u32 8388607, %v1232_v31  ;;  %v1016_v8 = vadd.s32 %v3489_v28, %v3500_v4 }
 0x178   :  { %v2667_v42 = vadd.s32 4294967294, %v1028_v0  ;;  %v1066_v46 = vadd.s32 3, %v1049_v21  ;;  %vm2319_vm9 = vcmp.ne.f32.partialorder %v2317_v50, 0.0  ;;  %v1171_v58 = vadd.s32 %v1166_v59, %v1147_v15 }
 0x179   :  { %v1174_v38 = vsel %vm1172_vm6, %v1173_v27, %v1169_v43  ;;  %vm1243_vm8 = vcmp.gt.s32.totalorder %v1242_v22, 0  ;;  %v1240_v57 = vor.u32 8388608, %v1239_v25  ;;  %v3582_v41 = vsel %vm2319_vm9, 1, %v2921_v44 }
 0x17a   :  { %vm2668_vm7 = vcmp.lt.s32.totalorder %v2667_v42, 0  ;;  %v1175_v17 = vadd.s32 %v1174_v38, %v1170_v3  ;;  %v1244_v47 = vsel %vm1243_vm8, %v1242_v22, 0  ;;  %v3573_v26 = vand.u32 3, %v1066_v46 }
 0x17b   :  { %v1031_v12 = vsel %vm2668_vm7, 0, %v2667_v42  ;;  %v1246_v60 = vand.u32 31, %v1244_v47  ;;  %v3576_v11 = vshrl.u32 %v1244_v47, 5  ;;  %v3578_v36 = vshll.u32 %v1240_v57, 8 }
 0x17c   :  { %v1032_v45 = vsub.s32 32, %v1031_v12  ;;  %v1036_v40 = vsub.s32 4294967266, %v1031_v12  ;;  %v1176_v51 = vadd.s32 536870912, %v1175_v17  ;;  %v1033_v13 = vshll.u32 %v1024_v52, %v1031_v12 }
 0x17d   :  { %v1247_v1 = vsub.s32 32, %v1246_v60  ;;  %v898_v52 = vperm.slane %v3376_v62, 3  ;;  %v1249_v59 = vshll.u32 %v2915_v61, %v1246_v60  ;;  %v1252_v27 = vshll.u32 %v2916_v19, %v1246_v60 }
 0x17e   :  { %v1034_v9 = vshrl.u32 %v1016_v8, %v1032_v45  ;;  %v1037_v56 = vadd.s32 127, %v1036_v40  ;;  %v3571_v6 = vshrl.u32 %v1176_v51, 30  ;;  %v1255_v22 = vshll.u32 %v2917_v54, %v1246_v60 }
 0x17f   :  { %v1250_v53 = vshrl.u32 %v2916_v19, %v1247_v1  ;;  %v1253_v0 = vshrl.u32 %v2917_v54, %v1247_v1  ;;  %v1256_v29 = vshrl.u32 %v2918_v37, %v1247_v1  ;;  %v1258_v3 = vshll.u32 %v2918_v37, %v1246_v60 }
 0x180   :  { %v1035_v63 = vor.u32 %v1034_v9, %v1033_v13  ;;  %v1038_v5 = vshll.u32 %v1037_v56, 23  ;;  %v1178_v28 = vshll.u32 %v3571_v6, 30  ;;  %v1259_v38 = vshrl.u32 %v2919_v30, %v1247_v1 }
 0x181   :  { %v1262_v25 = vshrl.u32 %v2920_v14, %v1247_v1  ;;  %v3598_v47 = vor.u32 %v1253_v0, %v1252_v27  ;;  %v1261_v8 = vshll.u32 %v2919_v30, %v1246_v60  ;;  %vm1079_vm11 = vcmp.lt.s32.totalorder %v3388_v16, 0 }
 0x182   :  { %v1039_v4 = vor.u32 4788187, %v1038_v5  ;;  %v3584_v34 = vsub.s32 %v1175_v17, %v1178_v28  ;;  %v1042_v15 = vcvt.s32.f32 %v1035_v63  ;;  %v1251_v17 = vor.u32 %v1250_v53, %v1249_v59 }
 0x183   :  { %v1257_v46 = vor.u32 %v1256_v29, %v1255_v22  ;;  %v1260_v50 = vor.u32 %v1259_v38, %v1258_v3  ;;  %v1263_v51 = vor.u32 %v1262_v25, %v1261_v8  ;;  %vm1264_vm12 = vcmp.lt.s32.totalorder %v3576_v11, 1  ;;  %v3636_v22 = vpop.f32.mrf.mxu2 }
 0x184   :  { %v1040_v43 = vand.u32 2147483647, %v1039_v4  ;;  %vm1180_vm10 = vcmp.lt.s32.totalorder %v3584_v34, 0  ;;  %v1181_v42 = vsub.s32 0, %v3584_v34  ;;  %v3604_v13 = vand.u32 65535, %v3578_v36 }
 0x185   :  { %v3607_v9 = vshrl.u32 %v3578_v36, 16  ;;  %v2323_v60 = vperm.slane %v3582_v41, 0  ;;  %vm1267_vm13 = vcmp.lt.s32.totalorder %v3576_v11, 4  ;;  %v1201_v5 = vsub.s32 4, %v3571_v6 }
 0x186   :  { %v1043_v21 = vmul.f32 %v1042_v15, %v1040_v43  ;;  %v1182_v12 = vsel %vm1180_vm10, %v1181_v42, %v3584_v34  ;;  %vm1266_vm14 = vcmp.lt.s32.totalorder %v3576_v11, 3  ;;  %v1273_v28 = vsel %vm1267_vm13, %v1260_v50, 920167782 }
 0x187   :  { %v1183_v40 = vclz %v1182_v12  ;;  %v1272_v53 = vsel %vm1264_vm12, %v1251_v17, %v3598_v47  ;;  %v1274_v35 = vsel %vm1266_vm14, %v1257_v46, %v1273_v28  ;;  %v1248_v43 = vshrl.u32 %v2915_v61, %v1247_v1 }
 0x188   :  { %v1044_v45 = vxor.u32 2147483648, %v1043_v21  ;;  %v1276_v15 = vsel %vm1264_vm12, %v3598_v47, %v1257_v46  ;;  %v1277_v59 = vsel %vm1267_vm13, %v1263_v51, 1326507024  ;;  %vm1265_vm0 = vcmp.lt.s32.totalorder %v3576_v11, 2 }
 0x189   :  { %v2670_v57 = vadd.s32 4294967294, %v1183_v40  ;;  %v1275_v1 = vsel %vm1265_vm0, %v1272_v53, %v1274_v35  ;;  %v1278_v38 = vsel %vm1266_vm14, %v1260_v50, %v1277_v59  ;;  %v3648_v51 = vsel %vm1079_vm11, %v1201_v5, %v3571_v6 }
 0x18a   :  { %v1045_v56 = vsel %vm924_vm3, %v1044_v45, %v1043_v21  ;;  %v1279_v45 = vsel %vm1265_vm0, %v1276_v15, %v1278_v38  ;;  %v1269_v50 = vsel %vm1267_vm13, %v1257_v46, 2102212464  ;;  %v1306_v15 = vshrl.u32 %v1275_v1, 16 }
 0x18b   :  { %v3616_v63 = vsel %vm3560_vm5, %v3385_v7, %v1045_v56  ;;  %vm2671_vm15 = vcmp.lt.s32.totalorder %v2670_v57, 0  ;;  %v1284_v56 = vshrl.u32 %v1279_v45, 16  ;;  %vm1072_vm1 = vcmp.eq.s32.totalorder %v3573_v26, 2 }
 0x18c   :  { %v1050_v4 = vmul.f32 %v3616_v63, %v3616_v63  ;;  %v1186_v0 = vsel %vm2671_vm15, 0, %v2670_v57  ;;  %v3659_v6 = vsel %vm1264_vm12, %v1248_v43, %v1251_v17  ;;  %v1305_v5 = vand.u32 65535, %v1275_v1  ;;  %v828_v1 = vpop.f32.mrf.mxu2 }
 0x18d   :  { %v1187_v27 = vsub.s32 32, %v1186_v0  ;;  %v1188_v21 = vshll.u32 %v3584_v34, %v1186_v0  ;;  %v1191_v3 = vsub.s32 4294967266, %v1186_v0  ;;  %v1283_v34 = vand.u32 65535, %v1279_v45 }
 0x18e   :  { %v1051_v29 = vmul.f32 -0.001358992, %v1050_v4  ;;  %v1058_v42 = vmul.f32 -0.00019511016, %v1050_v4  ;;  %vm1069_vm2 = vcmp.eq.s32.totalorder %v3573_v26, 0  ;;  %vm1068_vm4 = vcmp.lt.s32.totalorder %v3573_v26, 2 }
 0x18f   :  { %v1189_v8 = vshrl.u32 %v1171_v58, %v1187_v27  ;;  %v1192_v40 = vadd.s32 127, %v1191_v3  ;;  %v1286_v58 = vmul.u32 %v1284_v56, %v3604_v13  ;;  %v3654_v0 = vmul.u32 %v1283_v34, %v3607_v9 }
 0x190   :  { %v1052_v25 = vadd.f32 0.041655596, %v1051_v29  ;;  %v1059_v12 = vadd.f32 0.008332121, %v1058_v42  ;;  %vm3664_vm3 = vcmp.le.f32.partialorder %v1077_v33, 0.7853982  ;;  %v1288_v43 = vmul.u32 %v1284_v56, %v3607_v9 }
 0x191   :  { %v1190_v53 = vor.u32 %v1189_v8, %v1188_v21  ;;  %v1193_v35 = vshll.u32 %v1192_v40, 23  ;;  %v1285_v21 = vmul.u32 %v1283_v34, %v3604_v13  ;;  %v1289_v3 = vshll.u32 %v1286_v58, 16 }
 0x192   :  { %v1053_v57 = vmul.f32 %v1052_v25, %v1050_v4  ;;  %v1060_v28 = vmul.f32 %v1059_v12, %v1050_v4  ;;  %vm3670_vm5 = vcmp.eq.s32.totalorder %v2323_v60, 1  ;;  %v1291_v33 = vshll.u32 %v3654_v0, 16 }
 0x193   :  { %v1194_v42 = vor.u32 4788187, %v1193_v35  ;;  %v1197_v27 = vcvt.s32.f32 %v1190_v53  ;;  %vm1065_vm6 = vweird.f32 %v3385_v7  ;;  %vm1293_vm7 = vc.u32 %v1285_v21, %v1289_v3 }
 0x194   :  { %v1054_v59 = vadd.f32 -0.4999988, %v1053_v57  ;;  %v1061_v29 = vadd.f32 -0.16666654, %v1060_v28  ;;  %v1295_v8 = vadd.s32 %v1289_v3, %v1285_v21  ;;  %v1308_v45 = vmul.u32 %v1306_v15, %v3604_v13 }
 0x195   :  { %v1195_v12 = vand.u32 2147483647, %v1194_v42  ;;  %v1294_v34 = vsel %vm1293_vm7, 1, %v2921_v44  ;;  %v1309_v60 = vmul.u32 %v1305_v5, %v3607_v9  ;;  %v1307_v56 = vmul.u32 %v1305_v5, %v3604_v13 }
 0x196   :  { %v1055_v38 = vmul.f32 %v1054_v59, %v1050_v4  ;;  %v1062_v25 = vmul.f32 %v1061_v29, %v1050_v4  ;;  %v1296_v28 = vadd.s32 %v1294_v34, %v1288_v43  ;;  %vm1297_vm8 = vc.u32 %v1295_v8, %v1291_v33 }
 0x197   :  { %v1198_v57 = vmul.f32 %v1197_v27, %v1195_v12  ;;  %v1298_v59 = vsel %vm1297_vm8, 1, %v2921_v44  ;;  %v1311_v29 = vshll.u32 %v1308_v45, 16  ;;  %v1270_v21 = vsel %vm1266_vm14, %v3598_v47, %v1269_v50 }
 0x198   :  { %v1056_v40 = vadd.f32 1.0, %v1055_v38  ;;  %v1063_v4 = vadd.f32 1.0, %v1062_v25  ;;  %v1290_v3 = vshrl.u32 %v1286_v58, 16  ;;  %v1300_v38 = vadd.s32 %v1298_v59, %v1296_v28 }
 0x199   :  { %v1199_v42 = vxor.u32 2147483648, %v1198_v57  ;;  %v1310_v27 = vmul.u32 %v1306_v15, %v3607_v9  ;;  %v1313_v43 = vshll.u32 %v1309_v60, 16  ;;  %vm1315_vm9 = vc.u32 %v1307_v56, %v1311_v29 }
 0x19a   :  { %v1064_v53 = vmul.f32 %v1063_v4, %v3616_v63  ;;  %v1073_v35 = vxor.u32 2147483648, %v1056_v40  ;;  %v1316_v5 = vsel %vm1315_vm9, 1, %v2921_v44  ;;  %v1317_v33 = vadd.s32 %v1311_v29, %v1307_v56 }
 0x19b   :  { %v1200_v63 = vsel %vm1079_vm11, %v1199_v42, %v1198_v57  ;;  %v1301_v50 = vadd.s32 %v1300_v38, %v1290_v3  ;;  %v1318_v9 = vadd.s32 %v1316_v5, %v1310_v27  ;;  %v1292_v12 = vshrl.u32 %v3654_v0, 16 }
 0x19c   :  { %v1070_v25 = vxor.u32 2147483648, %v1064_v53  ;;  %v1074_v13 = vsel %vm1072_vm1, %v1073_v35, %v1064_v53  ;;  %v1203_v47 = vsel %vm3664_vm3, %v3388_v16, %v1200_v63  ;;  %vm1319_vm10 = vc.u32 %v1317_v33, %v1313_v43 }
 0x19d   :  { %v1205_v15 = vmul.f32 %v1203_v47, %v1203_v47  ;;  %v1312_v4 = vshrl.u32 %v1308_v45, 16  ;;  %v1320_v34 = vsel %vm1319_vm10, 1, %v2921_v44  ;;  %v1204_v7 = vsel %vm3664_vm3, 0, %v3648_v51 }
 0x19e   :  { %v1071_v1 = vsel %vm1069_vm2, %v1056_v40, %v1070_v25  ;;  %v3706_v40 = vadd.f32 %v898_v52, %v3549_v20  ;;  %v1322_v56 = vadd.s32 %v1320_v34, %v1318_v9  ;;  %v3714_v0 = vadd.s32 %v1301_v50, %v1292_v12 }
 0x19f   :  { %v1075_v58 = vsel %vm1068_vm4, %v1071_v1, %v1074_v13  ;;  %v1206_v57 = vmul.f32 -0.001358992, %v1205_v15  ;;  %v1213_v28 = vmul.f32 -0.00019511016, %v1205_v15  ;;  %v1314_v45 = vshrl.u32 %v1309_v60, 16 }
 0x1a0   :  { %v1076_v8 = vsel %vm1065_vm6, nan, %v1075_v58  ;;  %v1323_v59 = vadd.s32 %v1322_v56, %v1312_v4  ;;  %v1390_v52 = vand.u32 2139095040, %v3706_v40  ;;  %v3720_v17 = vadd.s32 %v1317_v33, %v1313_v43 }
 0x1a1   :  { %v2341_v26 = vsel %vm3670_vm5, %v3380_v24, %v1076_v8  ;;  %v1207_v53 = vadd.f32 0.041655596, %v1206_v57  ;;  %v1214_v35 = vadd.f32 0.008332121, %v1213_v28  ;;  %v1271_v24 = vsel %vm1265_vm0, %v3659_v6, %v1270_v21 }
 0x1a2   :  { %2350 = vst [vmem:[#allocation10] sm:$0xff] %v2341_v26  ;;  %v1387_v29 = vand.u32 2147483647, %v3706_v40  ;;  %v1324_v46 = vadd.s32 %v1323_v59, %v1314_v45  ;;  %v1391_v51 = vshrl.u32 %v1390_v52, 23  ;;  %v1221_v38 = vadd.s32 3, %v1204_v7  ;;  %v3747_v52 = vpop.f32.mrf.mxu3 }
 0x1a3   :  { %v1208_v42 = vmul.f32 %v1207_v53, %v1205_v15  ;;  %v1215_v3 = vmul.f32 %v1214_v35, %v1205_v15  ;;  %vm1327_vm11 = vc.u32 %v3714_v0, %v3720_v17  ;;  %v1325_v63 = vmul.u32 %v3578_v36, %v1271_v24 }
 0x1a4   :  { %v1328_v27 = vadd.s32 1, %v1324_v46  ;;  %v2675_v13 = vadd.s32 4294967169, %v1391_v51  ;;  %v1394_v11 = vand.u32 8388607, %v1387_v29  ;;  %v1222_v33 = vand.u32 3, %v1221_v38 }
 0x1a5   :  { %v1209_v60 = vadd.f32 -0.4999988, %v1208_v42  ;;  %v1216_v25 = vadd.f32 -0.16666654, %v1215_v3  ;;  %v2324_v1 = vperm.slane %v3582_v41, 1  ;;  %v3731_v12 = vadd.f32 %v3636_v22, %v3366_v2 }
 0x1a6   :  { %v1329_v43 = vsel %vm1327_vm11, %v1328_v27, %v1324_v46  ;;  %v1397_v5 = vadd.s32 1, %v2675_v13  ;;  %v1395_v36 = vor.u32 8388608, %v1394_v11  ;;  %v899_v34 = vperm.slane %v3376_v62, 4 }
 0x1a7   :  { %v1210_v6 = vmul.f32 %v1209_v60, %v1205_v15  ;;  %v1217_v21 = vmul.f32 %v1216_v25, %v1205_v15  ;;  %v1330_v50 = vadd.s32 %v1329_v43, %v1325_v63  ;;  %vm1220_vm13 = vweird.f32 %v3388_v16 }
 0x1a8   :  { %vm1398_vm12 = vcmp.gt.s32.totalorder %v1397_v5, 0  ;;  %vm1223_vm14 = vcmp.lt.s32.totalorder %v1222_v33, 2  ;;  %vm1224_vm15 = vcmp.eq.s32.totalorder %v1222_v33, 0  ;;  %vm1227_vm0 = vcmp.eq.s32.totalorder %v1222_v33, 2 }
 0x1a9   :  { %v1211_v9 = vadd.f32 1.0, %v1210_v6  ;;  %v1218_v58 = vadd.f32 1.0, %v1217_v21  ;;  %v1331_v8 = vadd.s32 536870912, %v1330_v50  ;;  %v1399_v4 = vsel %vm1398_vm12, %v1397_v5, 0 }
 0x1aa   :  { %v1401_v57 = vand.u32 31, %v1399_v4  ;;  %vm3735_vm1 = vcmp.eq.s32.totalorder %v2324_v1, 1  ;;  %vm1234_vm2 = vcmp.lt.s32.totalorder %v3546_v18, 0  ;;  %v3740_v22 = vshll.u32 %v1395_v36, 8 }
 0x1ab   :  { %v1219_v26 = vmul.f32 %v1218_v58, %v1203_v47  ;;  %v1228_v15 = vxor.u32 2147483648, %v1211_v9  ;;  %v1332_v28 = vshrl.u32 %v1331_v8, 30  ;;  %v3743_v62 = vadd.f32 %v899_v34, %v3731_v12 }
 0x1ac   :  { %v1402_v7 = vsub.s32 32, %v1401_v57  ;;  %v3752_v3 = vshrl.u32 %v1399_v4, 5  ;;  %v1404_v60 = vshll.u32 %v2915_v61, %v1401_v57  ;;  %v1407_v25 = vshll.u32 %v2916_v19, %v1401_v57 }
 0x1ad   :  { %v1225_v56 = vxor.u32 2147483648, %v1219_v26  ;;  %v1333_v2 = vshll.u32 %v1332_v28, 30  ;;  %v1229_v53 = vsel %vm1227_vm0, %v1228_v15, %v1219_v26  ;;  %v1356_v38 = vsub.s32 4, %v1332_v28 }
 0x1ae   :  { %v1405_v35 = vshrl.u32 %v2916_v19, %v1402_v7  ;;  %v1408_v59 = vshrl.u32 %v2917_v54, %v1402_v7  ;;  %v1411_v46 = vshrl.u32 %v2918_v37, %v1402_v7  ;;  %vm3764_vm3 = vcmp.le.f32.partialorder %v1232_v31, 0.7853982 }
 0x1af   :  { %v1226_v47 = vsel %vm1224_vm15, %v1211_v9, %v1225_v56  ;;  %v3750_v42 = vsub.s32 %v1330_v50, %v1333_v2  ;;  %v1410_v63 = vshll.u32 %v2917_v54, %v1401_v57  ;;  %v1413_v21 = vshll.u32 %v2918_v37, %v1401_v57 }
 0x1b0   :  { %v1230_v24 = vsel %vm1223_vm14, %v1226_v47, %v1229_v53  ;;  %v1406_v11 = vor.u32 %v1405_v35, %v1404_v60  ;;  %v1409_v6 = vor.u32 %v1408_v59, %v1407_v25  ;;  %v1414_v43 = vshrl.u32 %v2919_v30, %v1402_v7 }
 0x1b1   :  { %v1231_v51 = vsel %vm1220_vm13, nan, %v1230_v24  ;;  %vm1335_vm4 = vcmp.lt.s32.totalorder %v3750_v42, 0  ;;  %v1336_v16 = vsub.s32 0, %v3750_v42  ;;  %v1412_v5 = vor.u32 %v1411_v46, %v1410_v63 }
 0x1b2   :  { %v2342_v27 = vsel %vm3735_vm1, %v3382_v39, %v1231_v51  ;;  %v1416_v31 = vshll.u32 %v2919_v30, %v1401_v57  ;;  %v1417_v33 = vshrl.u32 %v2920_v14, %v1402_v7  ;;  %v1326_v1 = vadd.s32 %v3720_v17, %v3714_v0  ;;  %v841_v17 = vpop.f32.mrf.mxu3 }
 0x1b3   :  { %2351 = vst [vmem:[#allocation10 + $0x8] sm:$0xff] %v2342_v27  ;;  %v1337_v39 = vsel %vm1335_vm4, %v1336_v16, %v3750_v42  ;;  %v1415_v9 = vor.u32 %v1414_v43, %v1413_v21  ;;  %v1436_v58 = vand.u32 65535, %v3740_v22  ;;  %vm1419_vm5 = vcmp.lt.s32.totalorder %v3752_v3, 1 }
 0x1b4   :  { %v1338_v50 = vclz %v1337_v39  ;;  %v1418_v8 = vor.u32 %v1417_v33, %v1416_v31  ;;  %v1437_v36 = vshrl.u32 %v3740_v22, 16  ;;  %v1545_v4 = vand.u32 2139095040, %v3743_v62 }
 0x1b5   :  { %v1357_v26 = vsel %vm1234_vm2, %v1356_v38, %v1332_v28  ;;  %vm1422_vm6 = vcmp.lt.s32.totalorder %v3752_v3, 4  ;;  %v1427_v0 = vsel %vm1419_vm5, %v1406_v11, %v1409_v6  ;;  %vm1421_vm7 = vcmp.lt.s32.totalorder %v3752_v3, 3 }
 0x1b6   :  { %v2673_v34 = vadd.s32 4294967294, %v1338_v50  ;;  %v1428_v15 = vsel %vm1422_vm6, %v1415_v9, 920167782  ;;  %v1431_v57 = vsel %vm1419_vm5, %v1409_v6, %v1412_v5  ;;  %v1432_v56 = vsel %vm1422_vm6, %v1418_v8, 1326507024 }
 0x1b7   :  { %vm1420_vm9 = vcmp.lt.s32.totalorder %v3752_v3, 2  ;;  %v1429_v28 = vsel %vm1421_vm7, %v1412_v5, %v1428_v15  ;;  %v1433_v45 = vsel %vm1421_vm7, %v1415_v9, %v1432_v56  ;;  %v1403_v47 = vshrl.u32 %v2915_v61, %v1402_v7 }
 0x1b8   :  { %vm2674_vm8 = vcmp.lt.s32.totalorder %v2673_v34, 0  ;;  %v1430_v53 = vsel %vm1420_vm9, %v1427_v0, %v1429_v28  ;;  %v1434_v35 = vsel %vm1420_vm9, %v1431_v57, %v1433_v45  ;;  %v1359_v46 = vsel %vm3764_vm3, 0, %v1357_v26 }
 0x1b9   :  { %v1341_v2 = vsel %vm2674_vm8, 0, %v2673_v34  ;;  %v1438_v51 = vand.u32 65535, %v1434_v35  ;;  %v1424_v38 = vsel %vm1422_vm6, %v1412_v5, 2102212464  ;;  %v1439_v60 = vshrl.u32 %v1434_v35, 16 }
 0x1ba   :  { %v1342_v59 = vsub.s32 32, %v1341_v2  ;;  %v1346_v24 = vsub.s32 4294967266, %v1341_v2  ;;  %v1460_v25 = vand.u32 65535, %v1430_v53  ;;  %v1461_v27 = vshrl.u32 %v1430_v53, 16 }
 0x1bb   :  { %v1343_v7 = vshll.u32 %v3750_v42, %v1341_v2  ;;  %v1442_v21 = vmul.u32 %v1438_v51, %v1437_v36  ;;  %v1441_v43 = vmul.u32 %v1439_v60, %v1436_v58  ;;  %v1542_v31 = vand.u32 2147483647, %v3743_v62 }
 0x1bc   :  { %v1344_v16 = vshrl.u32 %v1326_v1, %v1342_v59  ;;  %v1347_v63 = vadd.s32 127, %v1346_v24  ;;  %v1463_v39 = vmul.u32 %v1461_v27, %v1436_v58  ;;  %v1546_v33 = vshrl.u32 %v1545_v4, 23 }
 0x1bd   :  { %v1376_v8 = vadd.s32 3, %v1359_v46  ;;  %v1423_v34 = vsel %vm1419_vm5, %v1403_v47, %v1406_v11  ;;  %v1425_v5 = vsel %vm1421_vm7, %v1409_v6, %v1424_v38  ;;  %v1440_v26 = vmul.u32 %v1438_v51, %v1436_v58 }
 0x1be   :  { %v1345_v50 = vor.u32 %v1344_v16, %v1343_v7  ;;  %v1348_v9 = vshll.u32 %v1347_v63, 23  ;;  %v1444_v0 = vshll.u32 %v1441_v43, 16  ;;  %v1464_v42 = vmul.u32 %v1460_v25, %v1437_v36 }
 0x1bf   :  { %v1443_v17 = vmul.u32 %v1439_v60, %v1437_v36  ;;  %v1446_v15 = vshll.u32 %v1442_v21, 16  ;;  %v1462_v57 = vmul.u32 %v1460_v25, %v1436_v58  ;;  %v1466_v4 = vshll.u32 %v1463_v39, 16 }
 0x1c0   :  { %v1349_v1 = vor.u32 4788187, %v1348_v9  ;;  %v1352_v56 = vcvt.s32.f32 %v1345_v50  ;;  %vm1448_vm10 = vc.u32 %v1440_v26, %v1444_v0  ;;  %v1450_v28 = vadd.s32 %v1444_v0, %v1440_v26 }
 0x1c1   :  { %v1449_v2 = vsel %vm1448_vm10, 1, %v2921_v44  ;;  %v1465_v53 = vmul.u32 %v1461_v27, %v1437_v36  ;;  %v1468_v35 = vshll.u32 %v1464_v42, 16  ;;  %vm1470_vm12 = vc.u32 %v1462_v57, %v1466_v4 }
 0x1c2   :  { %v1350_v45 = vand.u32 2147483647, %v1349_v1  ;;  %v1451_v11 = vadd.s32 %v1449_v2, %v1443_v17  ;;  %vm1452_vm11 = vc.u32 %v1450_v28, %v1446_v15  ;;  %v1472_v6 = vadd.s32 %v1466_v4, %v1462_v57 }
 0x1c3   :  { %v1453_v59 = vsel %vm1452_vm11, 1, %v2921_v44  ;;  %v1471_v24 = vsel %vm1470_vm12, 1, %v2921_v44  ;;  %v2678_v46 = vadd.s32 4294967169, %v1546_v33  ;;  %v1445_v58 = vshrl.u32 %v1441_v43, 16 }
 0x1c4   :  { %v1353_v47 = vmul.f32 %v1352_v56, %v1350_v45  ;;  %v1455_v51 = vadd.s32 %v1453_v59, %v1451_v11  ;;  %v1473_v38 = vadd.s32 %v1471_v24, %v1465_v53  ;;  %vm1474_vm13 = vc.u32 %v1472_v6, %v1468_v35 }
 0x1c5   :  { %v1447_v25 = vshrl.u32 %v1442_v21, 16  ;;  %v1475_v7 = vsel %vm1474_vm13, 1, %v2921_v44  ;;  %v1552_v36 = vadd.s32 1, %v2678_v46  ;;  %v1467_v16 = vshrl.u32 %v1463_v39, 16 }
 0x1c6   :  { %v1354_v60 = vxor.u32 2147483648, %v1353_v47  ;;  %v1456_v27 = vadd.s32 %v1455_v51, %v1445_v58  ;;  %v1477_v63 = vadd.s32 %v1475_v7, %v1473_v38  ;;  %v3820_v50 = vadd.f32 %v3747_v52, %v3368_v55 }
 0x1c7   :  { %v1469_v33 = vshrl.u32 %v1464_v42, 16  ;;  %v1549_v43 = vand.u32 8388607, %v1542_v31  ;;  %vm1553_vm14 = vcmp.gt.s32.totalorder %v1552_v36, 0  ;;  %v1426_v55 = vsel %vm1420_vm9, %v1423_v34, %v1425_v5 }
 0x1c8   :  { %v1355_v9 = vsel %vm1234_vm2, %v1354_v60, %v1353_v47  ;;  %v3829_v26 = vadd.s32 %v1456_v27, %v1447_v25  ;;  %v1478_v39 = vadd.s32 %v1477_v63, %v1467_v16  ;;  %v1554_v0 = vsel %vm1553_vm14, %v1552_v36, 0 }
 0x1c9   :  { %v1358_v21 = vsel %vm3764_vm3, %v3546_v18, %v1355_v9  ;;  %v3833_v52 = vadd.s32 %v1472_v6, %v1468_v35  ;;  %v1556_v17 = vand.u32 31, %v1554_v0  ;;  %v3835_v42 = vand.u32 3, %v1376_v8 }
 0x1ca   :  { %v1360_v1 = vmul.f32 %v1358_v21, %v1358_v21  ;;  %v1479_v15 = vadd.s32 %v1478_v39, %v1469_v33  ;;  %v1480_v28 = vmul.u32 %v3740_v22, %v1426_v55  ;;  %v1550_v45 = vor.u32 8388608, %v1549_v43 }
 0x1cb   :  { %vm1482_vm15 = vc.u32 %v3829_v26, %v3833_v52  ;;  %v3839_v13 = vsub.s32 32, %v1556_v17  ;;  %v3842_v2 = vshrl.u32 %v1554_v0, 5  ;;  %v1568_v5 = vshll.u32 %v2918_v37, %v1556_v17 }
 0x1cc   :  { %v1361_v57 = vmul.f32 -0.001358992, %v1360_v1  ;;  %v1368_v56 = vmul.f32 -0.00019511016, %v1360_v1  ;;  %v1483_v4 = vadd.s32 1, %v1479_v15  ;;  %v1559_v24 = vshll.u32 %v2915_v61, %v1556_v17 }
 0x1cd   :  { %v1560_v8 = vshrl.u32 %v2916_v19, %v3839_v13  ;;  %v1563_v35 = vshrl.u32 %v2917_v54, %v3839_v13  ;;  %v1566_v11 = vshrl.u32 %v2918_v37, %v3839_v13  ;;  %v1569_v22 = vshrl.u32 %v2919_v30, %v3839_v13 }
 0x1ce   :  { %v1362_v3 = vadd.f32 0.041655596, %v1361_v57  ;;  %v1369_v34 = vadd.f32 0.008332121, %v1368_v56  ;;  %v1484_v53 = vsel %vm1482_vm15, %v1483_v4, %v1479_v15  ;;  %v1562_v46 = vshll.u32 %v2916_v19, %v1556_v17 }
 0x1cf   :  { %v1485_v59 = vadd.s32 %v1484_v53, %v1480_v28  ;;  %v1565_v58 = vshll.u32 %v2917_v54, %v1556_v17  ;;  %v1570_v51 = vor.u32 %v1569_v22, %v1568_v5  ;;  %v1571_v38 = vshll.u32 %v2919_v30, %v1556_v17 }
 0x1d0   :  { %v1363_v6 = vmul.f32 %v1362_v3, %v1360_v1  ;;  %v1370_v47 = vmul.f32 %v1369_v34, %v1360_v1  ;;  %v1572_v36 = vshrl.u32 %v2920_v14, %v3839_v13  ;;  %v3859_v27 = vor.u32 %v1560_v8, %v1559_v24 }
 0x1d1   :  { %v1486_v7 = vadd.s32 536870912, %v1485_v59  ;;  %v3861_v16 = vor.u32 %v1563_v35, %v1562_v46  ;;  %v3863_v63 = vor.u32 %v1566_v11, %v1565_v58  ;;  %vm1577_vm0 = vcmp.lt.s32.totalorder %v3842_v2, 4 }
 0x1d2   :  { %v1364_v60 = vadd.f32 -0.4999988, %v1363_v6  ;;  %v1371_v25 = vadd.f32 -0.16666654, %v1370_v47  ;;  %vm1378_vm1 = vcmp.lt.s32.totalorder %v3835_v42, 2  ;;  %v1573_v39 = vor.u32 %v1572_v36, %v1571_v38 }
 0x1d3   :  { %v3867_v43 = vshrl.u32 %v1486_v7, 30  ;;  %vm1379_vm2 = vcmp.eq.s32.totalorder %v3835_v42, 0  ;;  %v2325_v0 = vperm.slane %v3582_v41, 2  ;;  %vm1574_vm3 = vcmp.lt.s32.totalorder %v3842_v2, 1 }
 0x1d4   :  { %v1365_v9 = vmul.f32 %v1364_v60, %v1360_v1  ;;  %v1372_v33 = vmul.f32 %v1371_v25, %v1360_v1  ;;  %v1583_v55 = vsel %vm1577_vm0, %v1570_v51, 920167782  ;;  %vm1576_vm4 = vcmp.lt.s32.totalorder %v3842_v2, 3 }
 0x1d5   :  { %v1488_v57 = vshll.u32 %v3867_v43, 30  ;;  %v1582_v1 = vsel %vm1574_vm3, %v3859_v27, %v3861_v16  ;;  %v1584_v56 = vsel %vm1576_vm4, %v3863_v63, %v1583_v55  ;;  %v1587_v28 = vsel %vm1577_vm0, %v1573_v39, 1326507024 }
 0x1d6   :  { %v1366_v17 = vadd.f32 1.0, %v1365_v9  ;;  %v1373_v15 = vadd.f32 1.0, %v1372_v33  ;;  %v3885_v4 = vshll.u32 %v1550_v45, 8  ;;  %v1586_v5 = vsel %vm1574_vm3, %v3861_v16, %v3863_v63 }
 0x1d7   :  { %v1489_v8 = vsub.s32 %v1485_v59, %v1488_v57  ;;  %vm1382_vm5 = vcmp.eq.s32.totalorder %v3835_v42, 2  ;;  %vm3892_vm6 = vcmp.eq.s32.totalorder %v2325_v0, 1  ;;  %vm1575_vm7 = vcmp.lt.s32.totalorder %v3842_v2, 2 }
 0x1d8   :  { %v1374_v3 = vmul.f32 %v1373_v15, %v1358_v21  ;;  %v1383_v34 = vxor.u32 2147483648, %v1366_v17  ;;  %v1588_v45 = vsel %vm1576_vm4, %v1570_v51, %v1587_v28  ;;  %v1585_v11 = vsel %vm1575_vm7, %v1582_v1, %v1584_v56  ;;  %v3913_v15 = vld [vmem:[#allocation7] sm:$0xff] }
 0x1d9   :  { %vm1490_vm8 = vcmp.lt.s32.totalorder %v1489_v8, 0  ;;  %v1491_v21 = vsub.s32 0, %v1489_v8  ;;  %v1589_v6 = vsel %vm1575_vm7, %v1586_v5, %v1588_v45  ;;  %v1591_v47 = vand.u32 65535, %v3885_v4 }
 0x1da   :  { %v1380_v35 = vxor.u32 2147483648, %v1374_v3  ;;  %v1384_v22 = vsel %vm1382_vm5, %v1383_v34, %v1374_v3  ;;  %v1592_v59 = vshrl.u32 %v3885_v4, 16  ;;  %v1593_v58 = vand.u32 65535, %v1589_v6 }
 0x1db   :  { %v1492_v46 = vsel %vm1490_vm8, %v1491_v21, %v1489_v8  ;;  %v1594_v51 = vshrl.u32 %v1589_v6, 16  ;;  %vm1375_vm9 = vweird.f32 %v3546_v18  ;;  %v1616_v25 = vshrl.u32 %v1585_v11, 16 }
 0x1dc   :  { %v1381_v24 = vsel %vm1379_vm2, %v1366_v17, %v1380_v35  ;;  %v1493_v60 = vclz %v1492_v46  ;;  %v1597_v9 = vmul.u32 %v1593_v58, %v1592_v59  ;;  %v1615_v0 = vand.u32 65535, %v1585_v11 }
 0x1dd   :  { %v1385_v38 = vsel %vm1378_vm1, %v1381_v24, %v1384_v22  ;;  %v1596_v36 = vmul.u32 %v1594_v51, %v1591_v47  ;;  %v1595_v55 = vmul.u32 %v1593_v58, %v1591_v47  ;;  %v900_v18 = vperm.slane %v3913_v15, 5 }
 0x1de   :  { %v1386_v7 = vsel %vm1375_vm9, nan, %v1385_v38  ;;  %v2676_v39 = vadd.s32 4294967294, %v1493_v60  ;;  %v1481_v42 = vadd.s32 %v3833_v52, %v3829_v26  ;;  %v1598_v57 = vmul.u32 %v1594_v51, %v1592_v59 }
 0x1df   :  { %v2343_v33 = vsel %vm3892_vm6, %v3535_v10, %v1386_v7  ;;  %v1599_v17 = vshll.u32 %v1596_v36, 16  ;;  %v1618_v1 = vmul.u32 %v1616_v25, %v1591_v47  ;;  %v1601_v28 = vshll.u32 %v1597_v9, 16 }
 0x1e0   :  { %2352 = vst [vmem:[#allocation10 + $0x10] sm:$0xff] %v2343_v33  ;;  %vm2677_vm10 = vcmp.lt.s32.totalorder %v2676_v39, 0  ;;  %v1617_v53 = vmul.u32 %v1615_v0, %v1591_v47  ;;  %v1619_v35 = vmul.u32 %v1615_v0, %v1592_v59  ;;  %v1620_v24 = vmul.u32 %v1616_v25, %v1592_v59 }
 0x1e1   :  { %v1496_v56 = vsel %vm2677_vm10, 0, %v2676_v39  ;;  %vm1603_vm11 = vc.u32 %v1595_v55, %v1599_v17  ;;  %v1605_v3 = vadd.s32 %v1599_v17, %v1595_v55  ;;  %v1621_v21 = vshll.u32 %v1618_v1, 16  ;;  %v852_v55 = vpop.f32.mrf.mxu0 }
 0x1e2   :  { %v1497_v10 = vsub.s32 32, %v1496_v56  ;;  %v1501_v34 = vsub.s32 4294967266, %v1496_v56  ;;  %v1604_v5 = vsel %vm1603_vm11, 1, %v2921_v44  ;;  %v1498_v11 = vshll.u32 %v1489_v8, %v1496_v56 }
 0x1e3   :  { %v1606_v45 = vadd.s32 %v1604_v5, %v1598_v57  ;;  %vm1607_vm12 = vc.u32 %v1605_v3, %v1601_v28  ;;  %vm1625_vm13 = vc.u32 %v1617_v53, %v1621_v21  ;;  %v1600_v51 = vshrl.u32 %v1596_v36, 16 }
 0x1e4   :  { %v1499_v22 = vshrl.u32 %v1481_v42, %v1497_v10  ;;  %v1502_v6 = vadd.s32 127, %v1501_v34  ;;  %v1608_v26 = vsel %vm1607_vm12, 1, %v2921_v44  ;;  %v1626_v38 = vsel %vm1625_vm13, 1, %v2921_v44 }
 0x1e5   :  { %v1610_v52 = vadd.s32 %v1608_v26, %v1606_v45  ;;  %vm1389_vm14 = vcmp.lt.s32.totalorder %v3706_v40, 0  ;;  %v1623_v47 = vshll.u32 %v1619_v35, 16  ;;  %v1627_v60 = vadd.s32 %v1621_v21, %v1617_v53 }
 0x1e6   :  { %v1500_v46 = vor.u32 %v1499_v22, %v1498_v11  ;;  %v1503_v58 = vshll.u32 %v1502_v6, 23  ;;  %v1628_v7 = vadd.s32 %v1626_v38, %v1620_v24  ;;  %v1511_v8 = vsub.s32 4, %v3867_v43 }
 0x1e7   :  { %v1611_v39 = vadd.s32 %v1610_v52, %v1600_v51  ;;  %v3924_v0 = vadd.f32 %v900_v18, %v3820_v50  ;;  %v1558_v59 = vshrl.u32 %v2915_v61, %v3839_v13  ;;  %v1579_v25 = vsel %vm1577_vm0, %v3863_v63, 2102212464 }
 0x1e8   :  { %v1504_v33 = vor.u32 4788187, %v1503_v58  ;;  %v1602_v36 = vshrl.u32 %v1597_v9, 16  ;;  %vm1629_vm15 = vc.u32 %v1627_v60, %v1623_v47  ;;  %v1507_v42 = vcvt.s32.f32 %v1500_v46 }
 0x1e9   :  { %v1630_v57 = vsel %vm1629_vm15, 1, %v2921_v44  ;;  %v1697_v56 = vand.u32 2147483647, %v3924_v0  ;;  %v1578_v18 = vsel %vm1574_vm3, %v1558_v59, %v3859_v27  ;;  %v1622_v28 = vshrl.u32 %v1618_v1, 16  ;;  %v854_v2 = vpop.f32.mrf.mxu0 }
 0x1ea   :  { %v1505_v17 = vand.u32 2147483647, %v1504_v33  ;;  %v1632_v3 = vadd.s32 %v1630_v57, %v1628_v7  ;;  %v1700_v13 = vand.u32 2139095040, %v3924_v0  ;;  %v1512_v63 = vsel %vm1389_vm14, %v1511_v8, %v3867_v43 }
 0x1eb   :  { %v1580_v9 = vsel %vm1576_vm4, %v3861_v16, %v1579_v25  ;;  %v1612_v34 = vadd.s32 %v1611_v39, %v1602_v36  ;;  %v1624_v5 = vshrl.u32 %v1619_v35, 16  ;;  %v1704_v27 = vand.u32 8388607, %v1697_v56 }
 0x1ec   :  { %v1508_v10 = vmul.f32 %v1507_v42, %v1505_v17  ;;  %v1633_v53 = vadd.s32 %v1632_v3, %v1622_v28  ;;  %v1701_v45 = vshrl.u32 %v1700_v13, 23  ;;  %vm3947_vm0 = vcmp.le.f32.partialorder %v1387_v29, 0.7853982 }
 0x1ed   :  { %v1631_v11 = vadd.s32 %v1627_v60, %v1623_v47  ;;  %v1514_v43 = vsel %vm3947_vm0, 0, %v1512_v63  ;;  %v1581_v16 = vsel %vm1575_vm7, %v1578_v18, %v1580_v9  ;;  %v3958_v26 = vadd.f32 %v852_v55, %v3370_v49 }
 0x1ee   :  { %v1509_v21 = vxor.u32 2147483648, %v1508_v10  ;;  %v1634_v35 = vadd.s32 %v1633_v53, %v1624_v5  ;;  %v2681_v22 = vadd.s32 4294967169, %v1701_v45  ;;  %v901_v29 = vperm.slane %v3913_v15, 6 }
 0x1ef   :  { %vm1637_vm1 = vc.u32 %v1612_v34, %v1631_v11  ;;  %v1705_v46 = vor.u32 8388608, %v1704_v27  ;;  %v1635_v38 = vmul.u32 %v3885_v4, %v1581_v16  ;;  %v1531_v47 = vadd.s32 3, %v1514_v43 }
 0x1f0   :  { %v1510_v6 = vsel %vm1389_vm14, %v1509_v21, %v1508_v10  ;;  %v1638_v24 = vadd.s32 1, %v1634_v35  ;;  %v1707_v58 = vadd.s32 1, %v2681_v22  ;;  %v3968_v25 = vadd.f32 %v901_v29, %v3958_v26 }
 0x1f1   :  { %v1513_v52 = vsel %vm3947_vm0, %v3706_v40, %v1510_v6  ;;  %v3965_v59 = vshll.u32 %v1705_v46, 8  ;;  %v1532_v42 = vand.u32 3, %v1531_v47  ;;  %v2326_v28 = vperm.slane %v3582_v41, 3 }
 0x1f2   :  { %v1515_v51 = vmul.f32 %v1513_v52, %v1513_v52  ;;  %v1639_v60 = vsel %vm1637_vm1, %v1638_v24, %v1634_v35  ;;  %vm1708_vm2 = vcmp.gt.s32.totalorder %v1707_v58, 0  ;;  %vm1544_vm3 = vcmp.lt.s32.totalorder %v3743_v62, 0 }
 0x1f3   :  { %v1640_v49 = vadd.s32 %v1639_v60, %v1635_v38  ;;  %v1709_v8 = vsel %vm1708_vm2, %v1707_v58, 0  ;;  %v3974_v13 = vadd.s32 %v1631_v11, %v1612_v34  ;;  %v3977_v10 = vand.u32 65535, %v3965_v59 }
 0x1f4   :  { %v1516_v7 = vmul.f32 -0.001358992, %v1515_v51  ;;  %v1523_v33 = vmul.f32 -0.00019511016, %v1515_v51  ;;  %v1711_v39 = vand.u32 31, %v1709_v8  ;;  %v3980_v45 = vshrl.u32 %v1709_v8, 5 }
 0x1f5   :  { %v1641_v17 = vadd.s32 536870912, %v1640_v49  ;;  %v1852_v63 = vand.u32 2147483647, %v3968_v25  ;;  %vm1534_vm4 = vcmp.eq.s32.totalorder %v1532_v42, 0  ;;  %vm1537_vm5 = vcmp.eq.s32.totalorder %v1532_v42, 2 }
 0x1f6   :  { %v1517_v36 = vadd.f32 0.041655596, %v1516_v7  ;;  %v1524_v55 = vadd.f32 0.008332121, %v1523_v33  ;;  %v3970_v57 = vsub.s32 32, %v1711_v39  ;;  %v1714_v27 = vshll.u32 %v2915_v61, %v1711_v39 }
 0x1f7   :  { %v1642_v3 = vshrl.u32 %v1641_v17, 30  ;;  %vm1533_vm6 = vcmp.lt.s32.totalorder %v1532_v42, 2  ;;  %vm3989_vm7 = vcmp.eq.s32.totalorder %v2326_v28, 1  ;;  %v1717_v22 = vshll.u32 %v2916_v19, %v1711_v39 }
 0x1f8   :  { %v1518_v4 = vmul.f32 %v1517_v36, %v1515_v51  ;;  %v1525_v18 = vmul.f32 %v1524_v55, %v1515_v51  ;;  %v1715_v1 = vshrl.u32 %v2916_v19, %v3970_v57  ;;  %v1718_v34 = vshrl.u32 %v2917_v54, %v3970_v57 }
 0x1f9   :  { %v1643_v53 = vshll.u32 %v1642_v3, 30  ;;  %v1724_v21 = vshrl.u32 %v2919_v30, %v3970_v57  ;;  %vm1530_vm8 = vweird.f32 %v3706_v40  ;;  %v1666_v6 = vsub.s32 4, %v1642_v3 }
 0x1fa   :  { %v1519_v9 = vadd.f32 -0.4999988, %v1518_v4  ;;  %v1526_v5 = vadd.f32 -0.16666654, %v1525_v18  ;;  %v1721_v29 = vshrl.u32 %v2918_v37, %v3970_v57  ;;  %v1723_v24 = vshll.u32 %v2918_v37, %v1711_v39 }
 0x1fb   :  { %v1644_v35 = vsub.s32 %v1640_v49, %v1643_v53  ;;  %v1727_v46 = vshrl.u32 %v2920_v14, %v3970_v57  ;;  %vm4002_vm10 = vcmp.le.f32.partialorder %v1542_v31, 0.7853982  ;;  %v1716_v47 = vor.u32 %v1715_v1, %v1714_v27 }
 0x1fc   :  { %v1520_v11 = vmul.f32 %v1519_v9, %v1515_v51  ;;  %v1527_v43 = vmul.f32 %v1526_v5, %v1515_v51  ;;  %v1719_v60 = vor.u32 %v1718_v34, %v1717_v22  ;;  %v1720_v7 = vshll.u32 %v2917_v54, %v1711_v39 }
 0x1fd   :  { %vm1645_vm9 = vcmp.lt.s32.totalorder %v1644_v35, 0  ;;  %v1646_v51 = vsub.s32 0, %v1644_v35  ;;  %v1725_v33 = vor.u32 %v1724_v21, %v1723_v24  ;;  %v1726_v55 = vshll.u32 %v2919_v30, %v1711_v39 }
 0x1fe   :  { %v1521_v58 = vadd.f32 1.0, %v1520_v11  ;;  %v1528_v2 = vadd.f32 1.0, %v1527_v43  ;;  %v1722_v4 = vor.u32 %v1721_v29, %v1720_v7  ;;  %v1747_v18 = vshrl.u32 %v3965_v59, 16 }
 0x1ff   :  { %v1647_v36 = vsel %vm1645_vm9, %v1646_v51, %v1644_v35  ;;  %v1855_v28 = vand.u32 2139095040, %v3968_v25  ;;  %v1667_v9 = vsel %vm1544_vm3, %v1666_v6, %v1642_v3  ;;  %v1728_v5 = vor.u32 %v1727_v46, %v1726_v55 }
 0x200   :  { %v1529_v49 = vmul.f32 %v1528_v2, %v1513_v52  ;;  %v1538_v8 = vxor.u32 2147483648, %v1521_v58  ;;  %v1648_v17 = vclz %v1647_v36  ;;  %vm1729_vm11 = vcmp.lt.s32.totalorder %v3980_v45, 1 }
 0x201   :  { %vm1730_vm12 = vcmp.lt.s32.totalorder %v3980_v45, 2  ;;  %vm1732_vm13 = vcmp.lt.s32.totalorder %v3980_v45, 4  ;;  %v1737_v52 = vsel %vm1729_vm11, %v1716_v47, %v1719_v60  ;;  %vm1731_vm14 = vcmp.lt.s32.totalorder %v3980_v45, 3 }
 0x202   :  { %v1535_v31 = vxor.u32 2147483648, %v1529_v49  ;;  %v2679_v53 = vadd.s32 4294967294, %v1648_v17  ;;  %v1539_v27 = vsel %vm1537_vm5, %v1538_v8, %v1529_v49  ;;  %v1738_v3 = vsel %vm1732_vm13, %v1725_v33, 920167782 }
 0x203   :  { %v1739_v34 = vsel %vm1731_vm14, %v1722_v4, %v1738_v3  ;;  %v1741_v21 = vsel %vm1729_vm11, %v1719_v60, %v1722_v4  ;;  %v1742_v6 = vsel %vm1732_vm13, %v1728_v5, 1326507024  ;;  %v1856_v46 = vshrl.u32 %v1855_v28, 23 }
 0x204   :  { %v1536_v39 = vsel %vm1534_vm4, %v1521_v58, %v1535_v31  ;;  %vm2680_vm15 = vcmp.lt.s32.totalorder %v2679_v53, 0  ;;  %v1740_v22 = vsel %vm1730_vm12, %v1737_v52, %v1739_v34  ;;  %v1669_v58 = vsel %vm4002_vm10, 0, %v1667_v9 }
 0x205   :  { %v1540_v1 = vsel %vm1533_vm6, %v1536_v39, %v1539_v27  ;;  %v1651_v43 = vsel %vm2680_vm15, 0, %v2679_v53  ;;  %v1743_v40 = vsel %vm1731_vm14, %v1725_v33, %v1742_v6  ;;  %v1770_v2 = vand.u32 65535, %v1740_v22 }
 0x206   :  { %v1541_v11 = vsel %vm1530_vm8, nan, %v1540_v1  ;;  %v1652_v29 = vsub.s32 32, %v1651_v43  ;;  %v1656_v24 = vsub.s32 4294967266, %v1651_v43  ;;  %v1771_v51 = vshrl.u32 %v1740_v22, 16 }
 0x207   :  { %v2344_v42 = vsel %vm3989_vm7, %v3549_v20, %v1541_v11  ;;  %v1653_v7 = vshll.u32 %v1644_v35, %v1651_v43  ;;  %v1744_v16 = vsel %vm1730_vm12, %v1741_v21, %v1743_v40  ;;  %v1734_v20 = vsel %vm1732_vm13, %v1722_v4, 2102212464 }
 0x208   :  { %2353 = vst [vmem:[#allocation10 + $0x18] sm:$0xff] %v2344_v42  ;;  %v1654_v49 = vshrl.u32 %v3974_v13, %v1652_v29  ;;  %v1657_v8 = vadd.s32 127, %v1656_v24  ;;  %v1748_v36 = vand.u32 65535, %v1744_v16  ;;  %v1749_v55 = vshrl.u32 %v1744_v16, 16  ;;  %v4059_v24 = vpop.f32.mrf.mxu1 }
 0x209   :  { %v4047_v17 = vand.u32 8388607, %v1852_v63  ;;  %v1713_v35 = vshrl.u32 %v2915_v61, %v3970_v57  ;;  %v1773_v13 = vmul.u32 %v1771_v51, %v3977_v10  ;;  %v1686_v31 = vadd.s32 3, %v1669_v58 }
 0x20a   :  { %v1655_v28 = vor.u32 %v1654_v49, %v1653_v7  ;;  %v1658_v33 = vshll.u32 %v1657_v8, 23  ;;  %v1751_v9 = vmul.u32 %v1749_v55, %v3977_v10  ;;  %v1752_v5 = vmul.u32 %v1748_v36, %v1747_v18 }
 0x20b   :  { %v1774_v53 = vmul.u32 %v1770_v2, %v1747_v18  ;;  %v1733_v4 = vsel %vm1729_vm11, %v1713_v35, %v1716_v47  ;;  %v1735_v39 = vsel %vm1731_vm14, %v1719_v60, %v1734_v20  ;;  %v2684_v27 = vadd.s32 4294967169, %v1856_v46 }
 0x20c   :  { %v1659_v52 = vor.u32 4788187, %v1658_v33  ;;  %v1750_v3 = vmul.u32 %v1748_v36, %v3977_v10  ;;  %v1753_v1 = vmul.u32 %v1749_v55, %v1747_v18  ;;  %v1754_v34 = vshll.u32 %v1751_v9, 16 }
 0x20d   :  { %v1772_v57 = vmul.u32 %v1770_v2, %v3977_v10  ;;  %v1662_v11 = vcvt.s32.f32 %v1655_v28  ;;  %v1775_v43 = vmul.u32 %v1771_v51, %v1747_v18  ;;  %v1776_v22 = vshll.u32 %v1773_v13, 16 }
 0x20e   :  { %v1660_v21 = vand.u32 2147483647, %v1659_v52  ;;  %v1756_v6 = vshll.u32 %v1752_v5, 16  ;;  %vm1758_vm0 = vc.u32 %v1750_v3, %v1754_v34  ;;  %v1760_v42 = vadd.s32 %v1754_v34, %v1750_v3 }
 0x20f   :  { %v1778_v29 = vshll.u32 %v1774_v53, 16  ;;  %v1759_v60 = vsel %vm1758_vm0, 1, %v2921_v44  ;;  %vm1780_vm1 = vc.u32 %v1772_v57, %v1776_v22  ;;  %v1782_v46 = vadd.s32 %v1776_v22, %v1772_v57 }
 0x210   :  { %v1663_v47 = vmul.f32 %v1662_v11, %v1660_v21  ;;  %v1761_v58 = vadd.s32 %v1759_v60, %v1753_v1  ;;  %vm1762_vm2 = vc.u32 %v1760_v42, %v1756_v6  ;;  %v1781_v40 = vsel %vm1780_vm1, 1, %v2921_v44  ;;  %v867_v21 = vpop.f32.mrf.mxu1 }
 0x211   :  { %v1862_v10 = vadd.s32 1, %v2684_v27  ;;  %v1763_v18 = vsel %vm1762_vm2, 1, %v2921_v44  ;;  %v1783_v51 = vadd.s32 %v1781_v40, %v1775_v43  ;;  %vm1784_vm4 = vc.u32 %v1782_v46, %v1778_v29 }
 0x212   :  { %v1664_v2 = vxor.u32 2147483648, %v1663_v47  ;;  %v1755_v7 = vshrl.u32 %v1751_v9, 16  ;;  %v1765_v49 = vadd.s32 %v1763_v18, %v1761_v58  ;;  %v1785_v8 = vsel %vm1784_vm4, 1, %v2921_v44 }
 0x213   :  { %vm1863_vm5 = vcmp.gt.s32.totalorder %v1862_v10, 0  ;;  %v1777_v20 = vshrl.u32 %v1773_v13, 16  ;;  %v1787_v36 = vadd.s32 %v1785_v8, %v1783_v51  ;;  %v1757_v33 = vshrl.u32 %v1752_v5, 16 }
 0x214   :  { %v1665_v16 = vsel %vm1544_vm3, %v1664_v2, %v1663_v47  ;;  %v1864_v55 = vsel %vm1863_vm5, %v1862_v10, 0  ;;  %v1766_v35 = vadd.s32 %v1765_v49, %v1755_v7  ;;  %v1736_v9 = vsel %vm1730_vm12, %v1733_v4, %v1735_v39 }
 0x215   :  { %v1668_v28 = vsel %vm4002_vm10, %v3743_v62, %v1665_v16  ;;  %v1866_v52 = vand.u32 31, %v1864_v55  ;;  %v1779_v3 = vshrl.u32 %v1774_v53, 16  ;;  %v1788_v1 = vadd.s32 %v1787_v36, %v1777_v20 }
 0x216   :  { %v1670_v27 = vmul.f32 %v1668_v28, %v1668_v28  ;;  %v4072_v34 = vadd.s32 %v1766_v35, %v1757_v33  ;;  %v4074_v57 = vadd.s32 %v1782_v46, %v1778_v29  ;;  %v4078_v38 = vand.u32 3, %v1686_v31 }
 0x217   :  { %v4076_v13 = vsub.s32 32, %v1866_v52  ;;  %v1789_v5 = vadd.s32 %v1788_v1, %v1779_v3  ;;  %v1790_v22 = vmul.u32 %v3965_v59, %v1736_v9  ;;  %v1860_v45 = vor.u32 8388608, %v4047_v17 }
 0x218   :  { %v1671_v11 = vmul.f32 -0.001358992, %v1670_v27  ;;  %v1678_v43 = vmul.f32 -0.00019511016, %v1670_v27  ;;  %vm1792_vm3 = vc.u32 %v4072_v34, %v4074_v57  ;;  %v4084_v53 = vshrl.u32 %v1864_v55, 5 }
 0x219   :  { %v1793_v6 = vadd.s32 1, %v1789_v5  ;;  %v1870_v42 = vshrl.u32 %v2916_v19, %v4076_v13  ;;  %v1873_v31 = vshrl.u32 %v2917_v54, %v4076_v13  ;;  %v1876_v29 = vshrl.u32 %v2918_v37, %v4076_v13 }
 0x21a   :  { %v1672_v4 = vadd.f32 0.041655596, %v1671_v11  ;;  %v1679_v39 = vadd.f32 0.008332121, %v1678_v43  ;;  %v1878_v59 = vshll.u32 %v2918_v37, %v1866_v52  ;;  %v1879_v47 = vshrl.u32 %v2919_v30, %v4076_v13 }
 0x21b   :  { %v1794_v46 = vsel %vm1792_vm3, %v1793_v6, %v1789_v5  ;;  %v1869_v58 = vshll.u32 %v2915_v61, %v1866_v52  ;;  %v1872_v10 = vshll.u32 %v2916_v19, %v1866_v52  ;;  %v1875_v2 = vshll.u32 %v2917_v54, %v1866_v52 }
 0x21c   :  { %v1673_v17 = vmul.f32 %v1672_v4, %v1670_v27  ;;  %v1680_v60 = vmul.f32 %v1679_v39, %v1670_v27  ;;  %v1795_v40 = vadd.s32 %v1794_v46, %v1790_v22  ;;  %v1880_v18 = vor.u32 %v1879_v47, %v1878_v59 }
 0x21d   :  { %v1881_v49 = vshll.u32 %v2919_v30, %v1866_v52  ;;  %v1882_v8 = vshrl.u32 %v2920_v14, %v4076_v13  ;;  %v4101_v20 = vor.u32 %v1870_v42, %v1869_v58  ;;  %v4103_v36 = vor.u32 %v1873_v31, %v1872_v10  ;;  %v4147_v58 = vpop.f32.mrf.mxu2 }
 0x21e   :  { %v1674_v51 = vadd.f32 -0.4999988, %v1673_v17  ;;  %v1681_v7 = vadd.f32 -0.16666654, %v1680_v60  ;;  %v1796_v16 = vadd.s32 536870912, %v1795_v40  ;;  %v4105_v55 = vor.u32 %v1876_v29, %v1875_v2 }
 0x21f   :  { %vm1688_vm6 = vcmp.lt.s32.totalorder %v4078_v38, 2  ;;  %v1883_v9 = vor.u32 %v1882_v8, %v1881_v49  ;;  %vm1887_vm7 = vcmp.lt.s32.totalorder %v4084_v53, 4  ;;  %vm1685_vm8 = vweird.f32 %v3743_v62 }
 0x220   :  { %v1675_v33 = vmul.f32 %v1674_v51, %v1670_v27  ;;  %v1682_v35 = vmul.f32 %v1681_v7, %v1670_v27  ;;  %vm1689_vm9 = vcmp.eq.s32.totalorder %v4078_v38, 0  ;;  %v2327_v52 = vperm.slane %v3582_v41, 4 }
 0x221   :  { %v4112_v3 = vshrl.u32 %v1796_v16, 30  ;;  %v1893_v1 = vsel %vm1887_vm7, %v1880_v18, 920167782  ;;  %vm1884_vm10 = vcmp.lt.s32.totalorder %v4084_v53, 1  ;;  %vm1886_vm11 = vcmp.lt.s32.totalorder %v4084_v53, 3 }
 0x222   :  { %v1676_v21 = vadd.f32 1.0, %v1675_v33  ;;  %v1683_v11 = vadd.f32 1.0, %v1682_v35  ;;  %v1892_v43 = vsel %vm1884_vm10, %v4101_v20, %v4103_v36  ;;  %v1894_v5 = vsel %vm1886_vm11, %v4105_v55, %v1893_v1 }
 0x223   :  { %v1798_v27 = vshll.u32 %v4112_v3, 30  ;;  %v4126_v22 = vshll.u32 %v1860_v45, 8  ;;  %v1896_v6 = vsel %vm1884_vm10, %v4103_v36, %v4105_v55  ;;  %v1897_v42 = vsel %vm1887_vm7, %v1883_v9, 1326507024 }
 0x224   :  { %v1684_v4 = vmul.f32 %v1683_v11, %v1668_v28  ;;  %v1693_v39 = vxor.u32 2147483648, %v1676_v21  ;;  %vm1692_vm12 = vcmp.eq.s32.totalorder %v4078_v38, 2  ;;  %vm1885_vm13 = vcmp.lt.s32.totalorder %v4084_v53, 2 }
 0x225   :  { %v1799_v31 = vsub.s32 %v1795_v40, %v1798_v27  ;;  %v1898_v29 = vsel %vm1886_vm11, %v1880_v18, %v1897_v42  ;;  %vm4138_vm14 = vcmp.eq.s32.totalorder %v2327_v52, 1  ;;  %v1895_v59 = vsel %vm1885_vm13, %v1892_v43, %v1894_v5 }
 0x226   :  { %v1690_v45 = vxor.u32 2147483648, %v1684_v4  ;;  %v1899_v47 = vsel %vm1885_vm13, %v1896_v6, %v1898_v29  ;;  %v1901_v60 = vand.u32 65535, %v4126_v22  ;;  %v1694_v10 = vsel %vm1692_vm12, %v1693_v39, %v1684_v4  ;;  %v880_v29 = vpop.f32.mrf.mxu2 }
 0x227   :  { %vm1800_vm15 = vcmp.lt.s32.totalorder %v1799_v31, 0  ;;  %v1801_v17 = vsub.s32 0, %v1799_v31  ;;  %v1903_v46 = vand.u32 65535, %v1899_v47  ;;  %v1902_v2 = vshrl.u32 %v4126_v22, 16 }
 0x228   :  { %v1691_v40 = vsel %vm1689_vm9, %v1676_v21, %v1690_v45  ;;  %v1904_v18 = vshrl.u32 %v1899_v47, 16  ;;  %v1925_v49 = vand.u32 65535, %v1895_v59  ;;  %v1926_v8 = vshrl.u32 %v1895_v59, 16 }
 0x229   :  { %v1695_v51 = vsel %vm1688_vm6, %v1691_v40, %v1694_v10  ;;  %v1802_v7 = vsel %vm1800_vm15, %v1801_v17, %v1799_v31  ;;  %v1907_v9 = vmul.u32 %v1903_v46, %v1902_v2  ;;  %v746_v52 = vadd.f32 %v3372_v32, %v3345_v23 }
 0x22a   :  { %v1696_v16 = vsel %vm1685_vm8, nan, %v1695_v51  ;;  %v1803_v33 = vclz %v1802_v7  ;;  %v1906_v35 = vmul.u32 %v1904_v18, %v1901_v60  ;;  %v1791_v38 = vadd.s32 %v4074_v57, %v4072_v34 }
 0x22b   :  { %v2345_v1 = vsel %vm4138_vm14, %v3731_v12, %v1696_v16  ;;  %v1905_v11 = vmul.u32 %v1903_v46, %v1901_v60  ;;  %v1868_v62 = vshrl.u32 %v2915_v61, %v4076_v13  ;;  %v1908_v43 = vmul.u32 %v1904_v18, %v1902_v2 }
 0x22c   :  { %2354 = vst [vmem:[#allocation10 + $0x20] sm:$0xff] %v2345_v1  ;;  %v2682_v21 = vadd.s32 4294967294, %v1803_v33  ;;  %v1909_v27 = vshll.u32 %v1906_v35, 16  ;;  %v1927_v5 = vmul.u32 %v1925_v49, %v1901_v60  ;;  %v1928_v4 = vmul.u32 %v1926_v8, %v1901_v60 }
 0x22d   :  { %v1911_v39 = vshll.u32 %v1907_v9, 16  ;;  %v1929_v6 = vmul.u32 %v1925_v49, %v1902_v2  ;;  %v1910_v45 = vshrl.u32 %v1906_v35, 16  ;;  %v1930_v13 = vmul.u32 %v1926_v8, %v1902_v2 }
 0x22e   :  { %vm2683_vm0 = vcmp.lt.s32.totalorder %v2682_v21, 0  ;;  %vm1913_vm1 = vc.u32 %v1905_v11, %v1909_v27  ;;  %v1915_v23 = vadd.s32 %v1909_v27, %v1905_v11  ;;  %v1931_v42 = vshll.u32 %v1928_v4, 16 }
 0x22f   :  { %v1806_v32 = vsel %vm2683_vm0, 0, %v2682_v21  ;;  %v1914_v12 = vsel %vm1913_vm1, 1, %v2921_v44  ;;  %v1933_v10 = vshll.u32 %v1929_v6, 16  ;;  %v1821_v16 = vsub.s32 4, %v4112_v3 }
 0x230   :  { %v1807_v34 = vsub.s32 32, %v1806_v32  ;;  %v1811_v57 = vsub.s32 4294967266, %v1806_v32  ;;  %v1916_v28 = vadd.s32 %v1914_v12, %v1908_v43  ;;  %v1808_v59 = vshll.u32 %v1799_v31, %v1806_v32 }
 0x231   :  { %vm1917_vm2 = vc.u32 %v1915_v23, %v1911_v39  ;;  %vm1935_vm4 = vc.u32 %v1927_v5, %v1931_v42  ;;  %v1937_v18 = vadd.s32 %v1931_v42, %v1927_v5  ;;  %v1889_v31 = vsel %vm1887_vm7, %v4105_v55, 2102212464 }
 0x232   :  { %v1809_v47 = vshrl.u32 %v1791_v38, %v1807_v34  ;;  %v1812_v17 = vadd.s32 127, %v1811_v57  ;;  %v1918_v60 = vsel %vm1917_vm2, 1, %v2921_v44  ;;  %v1936_v46 = vsel %vm1935_vm4, 1, %v2921_v44 }
 0x233   :  { %v1920_v40 = vadd.s32 %v1918_v60, %v1916_v28  ;;  %v1938_v51 = vadd.s32 %v1936_v46, %v1930_v13  ;;  %vm1699_vm5 = vcmp.lt.s32.totalorder %v3924_v0, 0  ;;  %v1888_v2 = vsel %vm1884_vm10, %v1868_v62, %v4101_v20 }
 0x234   :  { %v1810_v7 = vor.u32 %v1809_v47, %v1808_v59  ;;  %v1813_v49 = vshll.u32 %v1812_v17, 23  ;;  %vm1939_vm3 = vc.u32 %v1937_v18, %v1933_v10  ;;  %v1912_v35 = vshrl.u32 %v1907_v9, 16 }
 0x235   :  { %v1921_v8 = vadd.s32 %v1920_v40, %v1910_v45  ;;  %v1940_v1 = vsel %vm1939_vm3, 1, %v2921_v44  ;;  %v4178_v38 = vadd.f32 %v4059_v24, %v746_v52  ;;  %v1890_v21 = vsel %vm1886_vm11, %v4103_v36, %v1889_v31  ;;  %v2779_v36 = vld [vmem:[#allocation7 + $0x8] ss:$0 sm:$0xff] }
 0x236   :  { %v1814_v33 = vor.u32 4788187, %v1813_v49  ;;  %v1932_v55 = vshrl.u32 %v1928_v4, 16  ;;  %v1942_v11 = vadd.s32 %v1940_v1, %v1938_v51  ;;  %v902_v27 = vperm.slane %v3913_v15, 7 }
 0x237   :  { %v1817_v5 = vcvt.s32.f32 %v1810_v7  ;;  %v1822_v20 = vsel %vm1699_vm5, %v1821_v16, %v4112_v3  ;;  %v1922_v9 = vadd.s32 %v1921_v8, %v1912_v35  ;;  %v1934_v62 = vshrl.u32 %v1929_v6, 16 }
 0x238   :  { %v1815_v43 = vand.u32 2147483647, %v1814_v33  ;;  %v1943_v39 = vadd.s32 %v1942_v11, %v1932_v55  ;;  %v4188_v24 = vadd.f32 %v902_v27, %v4178_v38  ;;  %v4192_v52 = vadd.f32 %v4147_v58, %v3374_v48 }
 0x239   :  { %vm4196_vm6 = vcmp.le.f32.partialorder %v1697_v56, 0.7853982  ;;  %v1941_v23 = vadd.s32 %v1937_v18, %v1933_v10  ;;  %v1891_v3 = vsel %vm1885_vm13, %v1888_v2, %v1890_v21  ;;  %v2328_v11 = vperm.slane %v3582_v41, 5 }
 0x23a   :  { %v1818_v4 = vmul.f32 %v1817_v5, %v1815_v43  ;;  %v1944_v32 = vadd.s32 %v1943_v39, %v1934_v62  ;;  %v2007_v12 = vand.u32 2147483647, %v4188_v24  ;;  %v2010_v6 = vand.u32 2139095040, %v4188_v24 }
 0x23b   :  { %v1824_v48 = vsel %vm4196_vm6, 0, %v1822_v20  ;;  %vm1947_vm7 = vc.u32 %v1922_v9, %v1941_v23  ;;  %v4209_v34 = vadd.f32 %v2779_v36, %v4192_v52  ;;  %v1945_v57 = vmul.u32 %v4126_v22, %v1891_v3 }
 0x23c   :  { %v1819_v42 = vxor.u32 2147483648, %v1818_v4  ;;  %v1948_v58 = vadd.s32 1, %v1944_v32  ;;  %v2011_v56 = vshrl.u32 %v2010_v6, 23  ;;  %v2014_v29 = vand.u32 8388607, %v2007_v12 }
 0x23d   :  { %v1841_v28 = vadd.s32 3, %v1824_v48  ;;  %v2162_v40 = vand.u32 2147483647, %v4209_v34  ;;  %v2165_v10 = vand.u32 2139095040, %v4209_v34  ;;  %vm1854_vm10 = vcmp.lt.s32.totalorder %v3968_v25, 0 }
 0x23e   :  { %v1820_v53 = vsel %vm1699_vm5, %v1819_v42, %v1818_v4  ;;  %v1949_v59 = vsel %vm1947_vm7, %v1948_v58, %v1944_v32  ;;  %v2687_v13 = vadd.s32 4294967169, %v2011_v56  ;;  %v2015_v60 = vor.u32 8388608, %v2014_v29 }
 0x23f   :  { %v1823_v45 = vsel %vm4196_vm6, %v3924_v0, %v1820_v53  ;;  %v1950_v17 = vadd.s32 %v1949_v59, %v1945_v57  ;;  %v4219_v49 = vand.u32 3, %v1841_v28  ;;  %v2166_v35 = vshrl.u32 %v2165_v10, 23 }
 0x240   :  { %v1825_v47 = vmul.f32 %v1823_v45, %v1823_v45  ;;  %v2017_v46 = vadd.s32 1, %v2687_v13  ;;  %v4221_v33 = vshll.u32 %v2015_v60, 8  ;;  %v4225_v1 = vand.u32 8388607, %v2162_v40 }
 0x241   :  { %v1951_v7 = vadd.s32 536870912, %v1950_v17  ;;  %vm1847_vm9 = vcmp.eq.s32.totalorder %v4219_v49, 2  ;;  %vm1844_vm11 = vcmp.eq.s32.totalorder %v4219_v49, 0  ;;  %v1946_v39 = vadd.s32 %v1941_v23, %v1922_v9 }
 0x242   :  { %v1826_v18 = vmul.f32 -0.001358992, %v1825_v47  ;;  %v1833_v51 = vmul.f32 -0.00019511016, %v1825_v47  ;;  %vm2018_vm8 = vcmp.gt.s32.totalorder %v2017_v46, 0  ;;  %v4236_v36 = vand.u32 65535, %v4221_v33 }
 0x243   :  { %v1952_v31 = vshrl.u32 %v1951_v7, 30  ;;  %v2019_v2 = vsel %vm2018_vm8, %v2017_v46, 0  ;;  %v4238_v15 = vadd.s32 4294967169, %v2166_v35  ;;  %v2170_v4 = vor.u32 8388608, %v4225_v1 }
 0x244   :  { %v1827_v22 = vadd.f32 0.041655596, %v1826_v18  ;;  %v1834_v16 = vadd.f32 0.008332121, %v1833_v51  ;;  %v2021_v8 = vand.u32 31, %v2019_v2  ;;  %vm1843_vm12 = vcmp.lt.s32.totalorder %v4219_v49, 2 }
 0x245   :  { %v1953_v27 = vshll.u32 %v1952_v31, 30  ;;  %vm4242_vm13 = vcmp.eq.s32.totalorder %v2328_v11, 1  ;;  %vm1840_vm15 = vweird.f32 %v3924_v0  ;;  %v1976_v9 = vsub.s32 4, %v1952_v31 }
 0x246   :  { %v1828_v21 = vmul.f32 %v1827_v22, %v1825_v47  ;;  %v1835_v55 = vmul.f32 %v1834_v16, %v1825_v47  ;;  %v4228_v43 = vsub.s32 32, %v2021_v8  ;;  %v4249_v23 = vshrl.u32 %v2019_v2, 5 }
 0x247   :  { %v4232_v62 = vsub.s32 %v1950_v17, %v1953_v27  ;;  %v2024_v48 = vshll.u32 %v2915_v61, %v2021_v8  ;;  %v2027_v59 = vshll.u32 %v2916_v19, %v2021_v8  ;;  %vm4264_vm0 = vcmp.le.f32.partialorder %v1852_v63, 0.7853982 }
 0x248   :  { %v1829_v5 = vadd.f32 -0.4999988, %v1828_v21  ;;  %v1836_v20 = vadd.f32 -0.16666654, %v1835_v55  ;;  %v2025_v58 = vshrl.u32 %v2916_v19, %v4228_v43  ;;  %v2028_v57 = vshrl.u32 %v2917_v54, %v4228_v43 }
 0x249   :  { %vm1955_vm14 = vcmp.lt.s32.totalorder %v4232_v62, 0  ;;  %v1956_v42 = vsub.s32 0, %v4232_v62  ;;  %v2031_v13 = vshrl.u32 %v2918_v37, %v4228_v43  ;;  %v2033_v10 = vshll.u32 %v2918_v37, %v2021_v8 }
 0x24a   :  { %v1830_v3 = vmul.f32 %v1829_v5, %v1825_v47  ;;  %v1837_v32 = vmul.f32 %v1836_v20, %v1825_v47  ;;  %v2034_v47 = vshrl.u32 %v2919_v30, %v4228_v43  ;;  %v2037_v18 = vshrl.u32 %v2920_v14, %v4228_v43 }
 0x24b   :  { %v1957_v53 = vsel %vm1955_vm14, %v1956_v42, %v4232_v62  ;;  %v2026_v7 = vor.u32 %v2025_v58, %v2024_v48  ;;  %v2030_v22 = vshll.u32 %v2917_v54, %v2021_v8  ;;  %v2057_v16 = vshrl.u32 %v4221_v33, 16 }
 0x24c   :  { %v1831_v56 = vadd.f32 1.0, %v1830_v3  ;;  %v1838_v29 = vadd.f32 1.0, %v1837_v32  ;;  %v1958_v28 = vclz %v1957_v53  ;;  %v2035_v35 = vor.u32 %v2034_v47, %v2033_v10 }
 0x24d   :  { %v2036_v21 = vshll.u32 %v2919_v30, %v2021_v8  ;;  %v1977_v55 = vsel %vm1854_vm10, %v1976_v9, %v1952_v31  ;;  %v2032_v11 = vor.u32 %v2031_v13, %v2030_v22  ;;  %vm2039_vm2 = vcmp.lt.s32.totalorder %v4249_v23, 1 }
 0x24e   :  { %v1839_v17 = vmul.f32 %v1838_v29, %v1823_v45  ;;  %v1848_v60 = vxor.u32 2147483648, %v1831_v56  ;;  %v2685_v51 = vadd.s32 4294967294, %v1958_v28  ;;  %v2029_v45 = vor.u32 %v2028_v57, %v2027_v59 }
 0x24f   :  { %v2038_v20 = vor.u32 %v2037_v18, %v2036_v21  ;;  %vm2042_vm4 = vcmp.lt.s32.totalorder %v4249_v23, 4  ;;  %vm2041_vm5 = vcmp.lt.s32.totalorder %v4249_v23, 3  ;;  %vm2040_vm3 = vcmp.lt.s32.totalorder %v4249_v23, 2 }
 0x250   :  { %v1845_v2 = vxor.u32 2147483648, %v1839_v17  ;;  %v1849_v63 = vsel %vm1847_vm9, %v1848_v60, %v1839_v17  ;;  %vm2686_vm1 = vcmp.lt.s32.totalorder %v2685_v51, 0  ;;  %v2047_v31 = vsel %vm2039_vm2, %v2026_v7, %v2029_v45 }
 0x251   :  { %v1961_v5 = vsel %vm2686_vm1, 0, %v2685_v51  ;;  %v2048_v9 = vsel %vm2042_vm4, %v2035_v35, 920167782  ;;  %v2051_v29 = vsel %vm2039_vm2, %v2029_v45, %v2032_v11  ;;  %v2052_v53 = vsel %vm2042_vm4, %v2038_v20, 1326507024 }
 0x252   :  { %v1846_v27 = vsel %vm1844_vm11, %v1831_v56, %v1845_v2  ;;  %v1962_v32 = vsub.s32 32, %v1961_v5  ;;  %v1966_v8 = vsub.s32 4294967266, %v1961_v5  ;;  %v1963_v48 = vshll.u32 %v4232_v62, %v1961_v5 }
 0x253   :  { %v1850_v3 = vsel %vm1843_vm12, %v1846_v27, %v1849_v63  ;;  %v2049_v0 = vsel %vm2041_vm5, %v2032_v11, %v2048_v9  ;;  %v2172_v13 = vadd.s32 1, %v4238_v15  ;;  %v2023_v17 = vshrl.u32 %v2915_v61, %v4228_v43 }
 0x254   :  { %v1851_v42 = vsel %vm1840_vm15, nan, %v1850_v3  ;;  %v1964_v58 = vshrl.u32 %v1946_v39, %v1962_v32  ;;  %v1967_v56 = vadd.s32 127, %v1966_v8  ;;  %v2050_v62 = vsel %vm2040_vm3, %v2047_v31, %v2049_v0 }
 0x255   :  { %v2346_v49 = vsel %vm4242_vm13, %v3820_v50, %v1851_v42  ;;  %v1979_v50 = vsel %vm4264_vm0, 0, %v1977_v55  ;;  %v2053_v39 = vsel %vm2041_vm5, %v2035_v35, %v2052_v53  ;;  %v2080_v6 = vand.u32 65535, %v2050_v62 }
 0x256   :  { %2355 = vst [vmem:[#allocation10 + $0x28] sm:$0xff] %v2346_v49  ;;  %v1965_v57 = vor.u32 %v1964_v58, %v1963_v48  ;;  %v1968_v28 = vshll.u32 %v1967_v56, 23  ;;  %v2081_v59 = vshrl.u32 %v2050_v62, 16  ;;  %v2044_v60 = vsel %vm2042_vm4, %v2032_v11, 2102212464 }
 0x257   :  { %v2054_v10 = vsel %vm2040_vm3, %v2051_v29, %v2053_v39  ;;  %v1996_v18 = vadd.s32 3, %v1979_v50  ;;  %v2043_v15 = vsel %vm2039_vm2, %v2023_v17, %v2026_v7  ;;  %v2084_v63 = vmul.u32 %v2080_v6, %v2057_v16 }
 0x258   :  { %v1969_v47 = vor.u32 4788187, %v1968_v28  ;;  %v2058_v51 = vand.u32 65535, %v2054_v10  ;;  %v2059_v22 = vshrl.u32 %v2054_v10, 16  ;;  %v2083_v2 = vmul.u32 %v2081_v59, %v4236_v36 }
 0x259   :  { %v1972_v21 = vcvt.s32.f32 %v1965_v57  ;;  %v2045_v43 = vsel %vm2041_vm5, %v2029_v45, %v2044_v60  ;;  %v2082_v27 = vmul.u32 %v2080_v6, %v4236_v36  ;;  %v2085_v20 = vmul.u32 %v2081_v59, %v2057_v16 }
 0x25a   :  { %v1970_v35 = vand.u32 2147483647, %v1969_v47  ;;  %v2061_v55 = vmul.u32 %v2059_v22, %v4236_v36  ;;  %v2062_v11 = vmul.u32 %v2058_v51, %v2057_v16  ;;  %v2086_v3 = vshll.u32 %v2083_v2, 16 }
 0x25b   :  { %vm2173_vm6 = vcmp.gt.s32.totalorder %v2172_v13, 0  ;;  %v2060_v32 = vmul.u32 %v2058_v51, %v4236_v36  ;;  %v2063_v8 = vmul.u32 %v2059_v22, %v2057_v16  ;;  %v2088_v31 = vshll.u32 %v2084_v63, 16 }
 0x25c   :  { %v1973_v5 = vmul.f32 %v1972_v21, %v1970_v35  ;;  %v2064_v42 = vshll.u32 %v2061_v55, 16  ;;  %v2066_v7 = vshll.u32 %v2062_v11, 16  ;;  %vm2090_vm7 = vc.u32 %v2082_v27, %v2086_v3 }
 0x25d   :  { %v2092_v49 = vadd.s32 %v2086_v3, %v2082_v27  ;;  %v2091_v48 = vsel %vm2090_vm7, 1, %v2921_v44  ;;  %v2174_v58 = vsel %vm2173_vm6, %v2172_v13, 0  ;;  %v2087_v50 = vshrl.u32 %v2083_v2, 16 }
 0x25e   :  { %v1974_v9 = vxor.u32 2147483648, %v1973_v5  ;;  %vm2068_vm8 = vc.u32 %v2060_v32, %v2064_v42  ;;  %v2070_v45 = vadd.s32 %v2064_v42, %v2060_v32  ;;  %v2093_v29 = vadd.s32 %v2091_v48, %v2085_v20 }
 0x25f   :  { %v2069_v0 = vsel %vm2068_vm8, 1, %v2921_v44  ;;  %vm2094_vm9 = vc.u32 %v2092_v49, %v2088_v31  ;;  %v2046_v39 = vsel %vm2040_vm3, %v2043_v15, %v2045_v43  ;;  %v2065_v6 = vshrl.u32 %v2061_v55, 16 }
 0x260   :  { %v1975_v56 = vsel %vm1854_vm10, %v1974_v9, %v1973_v5  ;;  %v2071_v16 = vadd.s32 %v2069_v0, %v2063_v8  ;;  %vm2072_vm11 = vc.u32 %v2070_v45, %v2066_v7  ;;  %v2095_v53 = vsel %vm2094_vm9, 1, %v2921_v44 }
 0x261   :  { %v1978_v36 = vsel %vm4264_vm0, %v3968_v25, %v1975_v56  ;;  %v2073_v28 = vsel %vm2072_vm11, 1, %v2921_v44  ;;  %v2097_v62 = vadd.s32 %v2095_v53, %v2093_v29  ;;  %v2176_v13 = vand.u32 31, %v2174_v58 }
 0x262   :  { %v1980_v57 = vmul.f32 %v1978_v36, %v1978_v36  ;;  %v2075_v59 = vadd.s32 %v2073_v28, %v2071_v16  ;;  %v2089_v60 = vshrl.u32 %v2084_v63, 16  ;;  %v4334_v10 = vand.u32 3, %v1996_v18 }
 0x263   :  { %v2098_v46 = vadd.s32 %v2097_v62, %v2087_v50  ;;  %v2067_v51 = vshrl.u32 %v2062_v11, 16  ;;  %v4336_v35 = vsub.s32 32, %v2176_v13  ;;  %v2100_v5 = vmul.u32 %v4221_v33, %v2046_v39 }
 0x264   :  { %v1981_v47 = vmul.f32 -0.001358992, %v1980_v57  ;;  %v1988_v17 = vmul.f32 -0.00019511016, %v1980_v57  ;;  %v2076_v22 = vadd.s32 %v2075_v59, %v2065_v6  ;;  %v4341_v15 = vadd.s32 %v2092_v49, %v2088_v31 }
 0x265   :  { %v2099_v2 = vadd.s32 %v2098_v46, %v2089_v60  ;;  %v4343_v43 = vshrl.u32 %v2174_v58, 5  ;;  %v2180_v63 = vshrl.u32 %v2916_v19, %v4336_v35  ;;  %v2183_v20 = vshrl.u32 %v2917_v54, %v4336_v35 }
 0x266   :  { %v1982_v21 = vadd.f32 0.041655596, %v1981_v47  ;;  %v1989_v27 = vadd.f32 0.008332121, %v1988_v17  ;;  %v4339_v23 = vadd.s32 %v2076_v22, %v2067_v51  ;;  %v2179_v33 = vshll.u32 %v2915_v61, %v2176_v13 }
 0x267   :  { %v2103_v11 = vadd.s32 1, %v2099_v2  ;;  %v2182_v3 = vshll.u32 %v2916_v19, %v2176_v13  ;;  %v2186_v32 = vshrl.u32 %v2918_v37, %v4336_v35  ;;  %v2185_v9 = vshll.u32 %v2917_v54, %v2176_v13 }
 0x268   :  { %v1983_v18 = vmul.f32 %v1982_v21, %v1980_v57  ;;  %v1990_v55 = vmul.f32 %v1989_v27, %v1980_v57  ;;  %vm2102_vm10 = vc.u32 %v4339_v23, %v4341_v15  ;;  %v4356_v49 = vor.u32 %v2180_v63, %v2179_v33 }
 0x269   :  { %v2104_v31 = vsel %vm2102_vm10, %v2103_v11, %v2099_v2  ;;  %v2188_v45 = vshll.u32 %v2918_v37, %v2176_v13  ;;  %v2189_v48 = vshrl.u32 %v2919_v30, %v4336_v35  ;;  %v4361_v0 = vor.u32 %v2183_v20, %v2182_v3 }
 0x26a   :  { %v1984_v8 = vadd.f32 -0.4999988, %v1983_v18  ;;  %v1991_v42 = vadd.f32 -0.16666654, %v1990_v55  ;;  %v2105_v7 = vadd.s32 %v2104_v31, %v2100_v5  ;;  %v2192_v19 = vshrl.u32 %v2920_v14, %v4336_v35 }
 0x26b   :  { %v4365_v16 = vor.u32 %v2186_v32, %v2185_v9  ;;  %v2190_v53 = vor.u32 %v2189_v48, %v2188_v45  ;;  %v2191_v54 = vshll.u32 %v2919_v30, %v2176_v13  ;;  %v2329_v37 = vperm.slane %v3582_v41, 6 }
 0x26c   :  { %v1985_v58 = vmul.f32 %v1984_v8, %v1980_v57  ;;  %v1992_v56 = vmul.f32 %v1991_v42, %v1980_v57  ;;  %v2106_v29 = vadd.s32 536870912, %v2105_v7  ;;  %vm2194_vm12 = vcmp.lt.s32.totalorder %v4343_v43, 1 }
 0x26d   :  { %v2193_v57 = vor.u32 %v2192_v19, %v2191_v54  ;;  %vm2196_vm13 = vcmp.lt.s32.totalorder %v4343_v43, 3  ;;  %vm2197_vm14 = vcmp.lt.s32.totalorder %v4343_v43, 4  ;;  %v2202_v30 = vsel %vm2194_vm12, %v4356_v49, %v4361_v0 }
 0x26e   :  { %v1986_v28 = vadd.f32 1.0, %v1985_v58  ;;  %v1993_v50 = vadd.f32 1.0, %v1992_v56  ;;  %v4370_v62 = vshrl.u32 %v2106_v29, 30  ;;  %v2203_v6 = vsel %vm2197_vm14, %v2190_v53, 920167782 }
 0x26f   :  { %vm1998_vm15 = vcmp.lt.s32.totalorder %v4334_v10, 2  ;;  %vm1999_vm0 = vcmp.eq.s32.totalorder %v4334_v10, 0  ;;  %v2204_v13 = vsel %vm2196_vm13, %v4365_v16, %v2203_v6  ;;  %vm2002_vm1 = vcmp.eq.s32.totalorder %v4334_v10, 2 }
 0x270   :  { %v1994_v14 = vmul.f32 %v1993_v50, %v1978_v36  ;;  %v2003_v39 = vxor.u32 2147483648, %v1986_v28  ;;  %v2108_v59 = vshll.u32 %v4370_v62, 30  ;;  %vm2195_vm2 = vcmp.lt.s32.totalorder %v4343_v43, 2 }
 0x271   :  { %v4390_v47 = vshll.u32 %v2170_v4, 8  ;;  %v2205_v60 = vsel %vm2195_vm2, %v2202_v30, %v2204_v13  ;;  %v2206_v46 = vsel %vm2194_vm12, %v4361_v0, %v4365_v16  ;;  %v2207_v51 = vsel %vm2197_vm14, %v2193_v57, 1326507024 }
 0x272   :  { %v2000_v36 = vxor.u32 2147483648, %v1994_v14  ;;  %v2109_v17 = vsub.s32 %v2105_v7, %v2108_v59  ;;  %v2004_v21 = vsel %vm2002_vm1, %v2003_v39, %v1994_v14  ;;  %vm2338_vm4 = vcmp.eq.s32.totalorder %v2329_v37, 1 }
 0x273   :  { %v2208_v1 = vsel %vm2196_vm13, %v2190_v53, %v2207_v51  ;;  %vm1995_vm5 = vweird.f32 %v3968_v25  ;;  %v2211_v63 = vand.u32 65535, %v4390_v47  ;;  %v2236_v18 = vshrl.u32 %v2205_v60, 16 }
 0x274   :  { %v2001_v22 = vsel %vm1999_vm0, %v1986_v28, %v2000_v36  ;;  %vm2110_vm3 = vcmp.lt.s32.totalorder %v2109_v17, 0  ;;  %v2111_v27 = vsub.s32 0, %v2109_v17  ;;  %v2209_v5 = vsel %vm2195_vm2, %v2206_v46, %v2208_v1 }
 0x275   :  { %v2005_v4 = vsel %vm1998_vm15, %v2001_v22, %v2004_v21  ;;  %v2213_v20 = vand.u32 65535, %v2209_v5  ;;  %v2235_v33 = vand.u32 65535, %v2205_v60  ;;  %v2212_v25 = vshrl.u32 %v4390_v47, 16 }
 0x276   :  { %v2006_v2 = vsel %vm1995_vm5, nan, %v2005_v4  ;;  %v2112_v11 = vsel %vm2110_vm3, %v2111_v27, %v2109_v17  ;;  %v2214_v10 = vshrl.u32 %v2209_v5, 16  ;;  %v2238_v32 = vmul.u32 %v2236_v18, %v2211_v63 }
 0x277   :  { %v2347_v55 = vsel %vm2338_vm4, %v3958_v26, %v2006_v2  ;;  %v2113_v3 = vclz %v2112_v11  ;;  %v2217_v31 = vmul.u32 %v2213_v20, %v2212_v25  ;;  %v2101_v9 = vadd.s32 %v4341_v15, %v4339_v23 }
 0x278   :  { %2356 = vst [vmem:[#allocation10 + $0x30] sm:$0xff] %v2347_v55  ;;  %v2216_v42 = vmul.u32 %v2214_v10, %v2211_v63  ;;  %v2237_v7 = vmul.u32 %v2235_v33, %v2211_v63  ;;  %v2239_v45 = vmul.u32 %v2235_v33, %v2212_v25  ;;  %v2241_v48 = vshll.u32 %v2238_v32, 16 }
 0x279   :  { %v2688_v8 = vadd.s32 4294967294, %v2113_v3  ;;  %v2215_v26 = vmul.u32 %v2213_v20, %v2211_v63  ;;  %v2218_v58 = vmul.u32 %v2214_v10, %v2212_v25  ;;  %v2221_v29 = vshll.u32 %v2217_v31, 16 }
 0x27a   :  { %v2219_v56 = vshll.u32 %v2216_v42, 16  ;;  %v2240_v53 = vmul.u32 %v2236_v18, %v2212_v25  ;;  %v2243_v54 = vshll.u32 %v2239_v45, 16  ;;  %vm2245_vm8 = vc.u32 %v2237_v7, %v2241_v48 }
 0x27b   :  { %vm2689_vm6 = vcmp.lt.s32.totalorder %v2688_v8, 0  ;;  %v2247_v23 = vadd.s32 %v2241_v48, %v2237_v7  ;;  %v2246_v6 = vsel %vm2245_vm8, 1, %v2921_v44  ;;  %v2178_v46 = vshrl.u32 %v2915_v61, %v4336_v35 }
 0x27c   :  { %v2116_v19 = vsel %vm2689_vm6, 0, %v2688_v8  ;;  %vm2223_vm7 = vc.u32 %v2215_v26, %v2219_v56  ;;  %v2225_v14 = vadd.s32 %v2219_v56, %v2215_v26  ;;  %v2248_v59 = vadd.s32 %v2246_v6, %v2240_v53 }
 0x27d   :  { %v2117_v28 = vsub.s32 32, %v2116_v19  ;;  %v2118_v50 = vshll.u32 %v2109_v17, %v2116_v19  ;;  %v2121_v37 = vsub.s32 4294967266, %v2116_v19  ;;  %v2224_v57 = vsel %vm2223_vm7, 1, %v2921_v44 }
 0x27e   :  { %v2226_v30 = vadd.s32 %v2224_v57, %v2218_v58  ;;  %vm2227_vm9 = vc.u32 %v2225_v14, %v2221_v29  ;;  %vm2249_vm11 = vc.u32 %v2247_v23, %v2243_v54  ;;  %v2199_v17 = vsel %vm2197_vm14, %v4365_v16, 2102212464 }
 0x27f   :  { %v2119_v15 = vshrl.u32 %v2101_v9, %v2117_v28  ;;  %v2122_v39 = vadd.s32 127, %v2121_v37  ;;  %v2228_v60 = vsel %vm2227_vm9, 1, %v2921_v44  ;;  %v2220_v51 = vshrl.u32 %v2216_v42, 16 }
 0x280   :  { %v2230_v22 = vadd.s32 %v2228_v60, %v2226_v30  ;;  %v2250_v21 = vsel %vm2249_vm11, 1, %v2921_v44  ;;  %v2242_v4 = vshrl.u32 %v2238_v32, 16  ;;  %v2198_v2 = vsel %vm2194_vm12, %v2178_v46, %v4356_v49 }
 0x281   :  { %v2120_v13 = vor.u32 %v2119_v15, %v2118_v50  ;;  %v2123_v36 = vshll.u32 %v2122_v39, 23  ;;  %v2252_v27 = vadd.s32 %v2250_v21, %v2248_v59  ;;  %v2200_v16 = vsel %vm2196_vm13, %v4361_v0, %v2199_v17 }
 0x282   :  { %v2222_v5 = vshrl.u32 %v2217_v31, 16  ;;  %v2231_v63 = vadd.s32 %v2230_v22, %v2220_v51  ;;  %v2244_v61 = vshrl.u32 %v2239_v45, 16  ;;  %v2251_v20 = vadd.s32 %v2247_v23, %v2243_v54 }
 0x283   :  { %v2124_v1 = vor.u32 4788187, %v2123_v36  ;;  %v2127_v55 = vcvt.s32.f32 %v2120_v13  ;;  %v2253_v35 = vadd.s32 %v2252_v27, %v2242_v4  ;;  %v2201_v3 = vsel %vm2195_vm2, %v2198_v2, %v2200_v16 }
 0x284   :  { %v2232_v11 = vadd.s32 %v2231_v63, %v2222_v5  ;;  %vm2009_vm12 = vcmp.lt.s32.totalorder %v4188_v24, 0  ;;  %v2255_v0 = vmul.u32 %v4390_v47, %v2201_v3  ;;  %vm4433_vm13 = vcmp.le.f32.partialorder %v2007_v12, 0.7853982 }
 0x285   :  { %v2125_v18 = vand.u32 2147483647, %v2124_v1  ;;  %v2254_v25 = vadd.s32 %v2253_v35, %v2244_v61  ;;  %v2131_v42 = vsub.s32 4, %v4370_v62  ;;  %v2330_v13 = vperm.slane %v3582_v41, 7 }
 0x286   :  { %vm2257_vm10 = vc.u32 %v2232_v11, %v2251_v20  ;;  %v2256_v51 = vadd.s32 %v2251_v20, %v2232_v11  ;;  %vm2150_vm5 = vweird.f32 %v4188_v24  ;;  %vm2164_vm3 = vcmp.lt.s32.totalorder %v4209_v34, 0 }
 0x287   :  { %v2128_v33 = vmul.f32 %v2127_v55, %v2125_v18  ;;  %v2258_v49 = vadd.s32 1, %v2254_v25  ;;  %v2132_v48 = vsel %vm2009_vm12, %v2131_v42, %v4370_v62  ;;  %vm2339_vm4 = vcmp.eq.s32.totalorder %v2330_v13, 1 }
 0x288   :  { %v2134_v19 = vsel %vm4433_vm13, 0, %v2132_v48  ;;  %vm4450_vm6 = vcmp.le.f32.partialorder %v2162_v40, 0.7853982 }
 0x289   :  { %v2129_v10 = vxor.u32 2147483648, %v2128_v33  ;;  %v2259_v31 = vsel %vm2257_vm10, %v2258_v49, %v2254_v25  ;;  %v2151_v57 = vadd.s32 3, %v2134_v19 }
 0x28a   :  { %v2260_v9 = vadd.s32 %v2259_v31, %v2255_v0 }
 0x28b   :  { %v2130_v8 = vsel %vm2009_vm12, %v2129_v10, %v2128_v33  ;;  %v2152_v6 = vand.u32 3, %v2151_v57  ;;  %vm2305_vm12 = vweird.f32 %v4209_v34 }
 0x28c   :  { %v2133_v43 = vsel %vm4433_vm13, %v4188_v24, %v2130_v8  ;;  %v2261_v45 = vadd.s32 536870912, %v2260_v9 }
 0x28d   :  { %v2135_v7 = vmul.f32 %v2133_v43, %v2133_v43  ;;  %vm2153_vm15 = vcmp.lt.s32.totalorder %v2152_v6, 2  ;;  %vm2154_vm0 = vcmp.eq.s32.totalorder %v2152_v6, 0  ;;  %vm2157_vm2 = vcmp.eq.s32.totalorder %v2152_v6, 2 }
 0x28e   :  { %v2262_v58 = vshrl.u32 %v2261_v45, 30 }
 0x28f   :  { %v2136_v47 = vmul.f32 -0.001358992, %v2135_v7  ;;  %v2143_v26 = vmul.f32 -0.00019511016, %v2135_v7 }
 0x290   :  { %v2263_v29 = vshll.u32 %v2262_v58, 30  ;;  %v2286_v10 = vsub.s32 4, %v2262_v58 }
 0x291   :  { %v2137_v12 = vadd.f32 0.041655596, %v2136_v47  ;;  %v2144_v56 = vadd.f32 0.008332121, %v2143_v26 }
 0x292   :  { %v2264_v28 = vsub.s32 %v2260_v9, %v2263_v29  ;;  %v2287_v8 = vsel %vm2164_vm3, %v2286_v10, %v2262_v58 }
 0x293   :  { %v2138_v53 = vmul.f32 %v2137_v12, %v2135_v7  ;;  %v2145_v54 = vmul.f32 %v2144_v56, %v2135_v7  ;;  %v2289_v9 = vsel %vm4450_vm6, 0, %v2287_v8 }
 0x294   :  { %vm2265_vm14 = vcmp.lt.s32.totalorder %v2264_v28, 0  ;;  %v2266_v14 = vsub.s32 0, %v2264_v28  ;;  %v2306_v47 = vadd.s32 3, %v2289_v9 }
 0x295   :  { %v2139_v50 = vadd.f32 -0.4999988, %v2138_v53  ;;  %v2146_v37 = vadd.f32 -0.16666654, %v2145_v54 }
 0x296   :  { %v2267_v62 = vsel %vm2265_vm14, %v2266_v14, %v2264_v28  ;;  %v2307_v53 = vand.u32 3, %v2306_v47 }
 0x297   :  { %v2140_v23 = vmul.f32 %v2139_v50, %v2135_v7  ;;  %v2147_v15 = vmul.f32 %v2146_v37, %v2135_v7  ;;  %v2268_v59 = vclz %v2267_v62 }
 0x298   :  { %vm2309_vm8 = vcmp.eq.s32.totalorder %v2307_v53, 0  ;;  %vm2312_vm9 = vcmp.eq.s32.totalorder %v2307_v53, 2  ;;  %vm2308_vm11 = vcmp.lt.s32.totalorder %v2307_v53, 2 }
 0x299   :  { %v2141_v39 = vadd.f32 1.0, %v2140_v23  ;;  %v2148_v30 = vadd.f32 1.0, %v2147_v15  ;;  %v2691_v60 = vadd.s32 4294967294, %v2268_v59 }
 0x29b   :  { %v2149_v36 = vmul.f32 %v2148_v30, %v2133_v43  ;;  %v2158_v17 = vxor.u32 2147483648, %v2141_v39  ;;  %vm2692_vm1 = vcmp.lt.s32.totalorder %v2691_v60, 0  ;;  %v2318_v43 = vld [vmem:[#allocation8 + $0x8] sm:$0x1] }
 0x29c   :  { %v2271_v22 = vsel %vm2692_vm1, 0, %v2691_v60  ;;  %vm2320_vm7 = vcmp.ne.f32.partialorder %v2318_v43, 0.0 }
 0x29d   :  { %v2155_v46 = vxor.u32 2147483648, %v2149_v36  ;;  %v2159_v1 = vsel %vm2157_vm2, %v2158_v17, %v2149_v36  ;;  %v2272_v4 = vsub.s32 32, %v2271_v22  ;;  %v2276_v27 = vsub.s32 4294967266, %v2271_v22 }
 0x29e   :  { %v2273_v41 = vshll.u32 %v2264_v28, %v2271_v22  ;;  %v2322_v56 = vsel %vm2320_vm7, 1, %v2921_v44 }
 0x29f   :  { %v2156_v21 = vsel %vm2154_vm0, %v2141_v39, %v2155_v46  ;;  %v2274_v5 = vshrl.u32 %v2256_v51, %v2272_v4  ;;  %v2277_v63 = vadd.s32 127, %v2276_v27  ;;  %v2331_v28 = vperm.slane %v2322_v56, 0 }
 0x2a0   :  { %v2160_v2 = vsel %vm2153_vm15, %v2156_v21, %v2159_v1 }
 0x2a1   :  { %v2161_v16 = vsel %vm2150_vm5, nan, %v2160_v2  ;;  %v2275_v55 = vor.u32 %v2274_v5, %v2273_v41  ;;  %v2278_v61 = vshll.u32 %v2277_v63, 23  ;;  %vm2340_vm10 = vcmp.eq.s32.totalorder %v2331_v28, 1 }
 0x2a2   :  { %v2348_v18 = vsel %vm2339_vm4, %v4178_v38, %v2161_v16 }
 0x2a3   :  { %2357 = vst [vmem:[#allocation10 + $0x38] sm:$0xff] %v2348_v18  ;;  %v2279_v35 = vor.u32 4788187, %v2278_v61  ;;  %v2282_v11 = vcvt.s32.f32 %v2275_v55 }
 0x2a5   :  { %v2280_v33 = vand.u32 2147483647, %v2279_v35 }
 0x2a7   :  { %v2283_v20 = vmul.f32 %v2282_v11, %v2280_v33 }
 0x2a9   :  { %v2284_v3 = vxor.u32 2147483648, %v2283_v20 }
 0x2ab   :  { %v2285_v25 = vsel %vm2164_vm3, %v2284_v3, %v2283_v20 }
 0x2ac   :  { %v2288_v38 = vsel %vm4450_vm6, %v4209_v34, %v2285_v25 }
 0x2ad   :  { %v2290_v49 = vmul.f32 %v2288_v38, %v2288_v38 }
 0x2af   :  { %v2291_v0 = vmul.f32 -0.001358992, %v2290_v49  ;;  %v2298_v32 = vmul.f32 -0.00019511016, %v2290_v49 }
 0x2b1   :  { %v2292_v42 = vadd.f32 0.041655596, %v2291_v0  ;;  %v2299_v31 = vadd.f32 0.008332121, %v2298_v32 }
 0x2b3   :  { %v2293_v40 = vmul.f32 %v2292_v42, %v2290_v49  ;;  %v2300_v7 = vmul.f32 %v2299_v31, %v2290_v49 }
 0x2b5   :  { %v2294_v45 = vadd.f32 -0.4999988, %v2293_v40  ;;  %v2301_v48 = vadd.f32 -0.16666654, %v2300_v7 }
 0x2b7   :  { %v2295_v26 = vmul.f32 %v2294_v45, %v2290_v49  ;;  %v2302_v12 = vmul.f32 %v2301_v48, %v2290_v49 }
 0x2b9   :  { %v2296_v19 = vadd.f32 1.0, %v2295_v26  ;;  %v2303_v29 = vadd.f32 1.0, %v2302_v12 }
 0x2bb   :  { %v2304_v58 = vmul.f32 %v2303_v29, %v2288_v38  ;;  %v2313_v54 = vxor.u32 2147483648, %v2296_v19 }
 0x2bd   :  { %v2310_v50 = vxor.u32 2147483648, %v2304_v58  ;;  %v2314_v57 = vsel %vm2312_vm9, %v2313_v54, %v2304_v58 }
 0x2bf   :  { %v2311_v37 = vsel %vm2309_vm8, %v2296_v19, %v2310_v50 }
 0x2c0   :  { %v2315_v44 = vsel %vm2308_vm11, %v2311_v37, %v2314_v57 }
 0x2c1   :  { %v2316_v14 = vsel %vm2305_vm12, nan, %v2315_v44 }
 0x2c2   :  { %v2349_v23 = vsel %vm2340_vm10, %v4192_v52, %v2316_v14 }
 0x2c3   :  { %2358 = vst [vmem:[#allocation10 + $0x40] sm:$0xff] %v2349_v23 }
 0x2c4   :  { %2369 = dma.vmem_to_hbm [thread:$0]  %s2365_s3, 1152, %s2367_s11, [#allocation4]  }
 0x2c5   :  { %2907 = dma.done.wait [#allocation4], 1152  }
 0x2c6   :  { %2908 = vsyncadd [#allocation4], 4294966144 }
 0x2c7   :  { %2374 = vsyncpa [#allocation3], 1 }
 0x2c8   :  { %2375 = vsyncpa [#allocation6], 1 }
 0x2c9   :  { %2376 = vsyncpa [#allocation9], 1 }
 0x2ca   :  { %2377 = vsyncpa [#allocation4], 1 }

// kernel: tpu_custom_call.1
= control target key start
LH: loop header
LB: loop body
LE: loop exit
PB: predicated region body
PF: predicated region fallthrough
CT: control target
= control target key end

     0   :  { %9 = vsyncpa [#allocation3], 0  ;;  %s4465_s0 = inlined_call_operand.hbm [shape: f32[8,128], index: 0, kind: input, shape index: {}]   ;;  %s4466_s1 = inlined_call_operand.hbm [shape: bf16[128,1152], index: 1, kind: input, shape index: {}]   ;;  %s4467_s2 = inlined_call_operand.hbm [shape: f32[1,1152], index: 2, kind: input, shape index: {}]   ;;  %s4468_s3 = inlined_call_operand.hbm [shape: f32[1,1152], index: 3, kind: input, shape index: {}]   ;;  %s4469_s4 = inlined_call_operand.hbm [shape: f32[8,1152], index: 4, kind: output, shape index: {}]  }
   0x1   :  { %10 = vsyncpa [#allocation6], 0 }
   0x2   :  { %11 = vsyncpa [#allocation9], 0  ;;  %s28_s17 = sshll.u32 %s4466_s1, 4  ;;  %s29_s17 = int_to_ptr.hbm [resolvable:$true] %s28_s17 }
   0x3   :  { %12 = vsyncpa [#allocation4], 0  ;;  %s2909_s18 = smov [#allocation5]   ;;  %s18_s22 = sshll.u32 %s4465_s0, 4  ;;  %s19_s22 = int_to_ptr.hbm [resolvable:$true] %s18_s22 }
   0x4   :  { %s30_s19 = sshll.u32 %s2909_s18, 4  ;;  %s2910_s23 = smov 576   ;;  %s31_s19 = int_to_ptr.vmem [resolvable:$true] %s30_s19 }
   0x5   :  { %s2911_s24 = smov 36   ;;  %s2912_s25 = smov [#allocation2]  }
   0x6   :  { %36 = dma.hbm_to_vmem [thread:$0]  %s29_s17, 9216, %s31_s19, [#allocation6], %s2910_s23, %s2910_s23, %s2911_s24  }
   0x7   :  { %s20_s26 = sshll.u32 %s2912_s25, 4  ;;  %s42_s29 = sshll.u32 %s4467_s2, 4  ;;  %s21_s26 = int_to_ptr.vmem [resolvable:$true] %s20_s26  ;;  %s43_s29 = int_to_ptr.hbm [resolvable:$true] %s42_s29 }
   0x8   :  { %23 = dma.hbm_to_vmem [thread:$0]  %s19_s22, 128, %s21_s26, [#allocation3]  }
   0x9   :  { %s53_s5 = sshll.u32 %s4468_s3, 4  ;;  %s2913_s6 = smov [#allocation7]   ;;  %s54_s5 = int_to_ptr.hbm [resolvable:$true] %s53_s5 }
   0xa   :  { %s44_s7 = sshll.u32 %s2913_s6, 4  ;;  %s2914_s0 = smov [#allocation8]   ;;  %s45_s7 = int_to_ptr.vmem [resolvable:$true] %s44_s7 }
   0xb   :  { %47 = dma.hbm_to_vmem [thread:$0]  %s43_s29, 144, %s45_s7, [#allocation6]  }
   0xc   :  { %s55_s8 = sshll.u32 %s2914_s0, 4  ;;  %s56_s8 = int_to_ptr.vmem [resolvable:$true] %s55_s8 }
   0xd   :  { %58 = dma.hbm_to_vmem [thread:$0]  %s54_s5, 144, %s56_s8, [#allocation9]  }
   0xe   :  { %2901 = dma.done.wait [#allocation3], 128  }
   0xf   :  { %2902 = vsyncadd [#allocation3], 4294967168 }
  0x10   :  { %2903 = dma.done.wait [#allocation6], 9360  }
  0x11   :  { %2904 = vsyncadd [#allocation6], 4294957936 }
  0x12   :  { %2905 = dma.done.wait [#allocation9], 144  }
  0x13   :  { %2906 = vsyncadd [#allocation9], 4294967152  ;;  %v2632_v0 = vld [vmem:[#allocation5 + $0x1f8] sm:$0xf]  ;;  %v2760_v1 = vld [vmem:[#allocation5 + $0x218] sm:$0xf0] }
  0x14   :  { %v2756_v2 = vld [vmem:[#allocation5 + $0x1fc] sm:$0xf]  ;;  %v2960_v3 = vor.u32 %v2760_v1, %v2632_v0  ;;  %v2634_v4 = vld [vmem:[#allocation5 + $0x21c] sm:$0xf0]  ;;  %v2761_v6 = vld [vmem:[#allocation5 + $0x220] sm:$0xf0] }
  0x15   :  { %v2640_v5 = vld [vmem:[#allocation5 + $0x200] sm:$0xf]  ;;  %v2962_v7 = vor.u32 %v2756_v2, %v2634_v4  ;;  %v2757_v9 = vld [vmem:[#allocation5 + $0x204] sm:$0xf]  ;;  %v2642_v10 = vld [vmem:[#allocation5 + $0x224] sm:$0xf0] }
  0x16   :  { %v2964_v8 = vor.u32 %v2761_v6, %v2640_v5  ;;  %v2596_v11 = vld [vmem:[#allocation5 + $0x1b0] sm:$0xf]  ;;  %528 = vmatpush.bf16.msra.mxu0 %v2960_v3  ;;  %v2967_v12 = vor.u32 %v2757_v9, %v2642_v10  ;;  %v2751_v13 = vld [vmem:[#allocation5 + $0x1d0] sm:$0xf0]  ;;  %v2598_v15 = vld [vmem:[#allocation5 + $0x1d4] sm:$0xf0] }
  0x17   :  { %v2747_v14 = vld [vmem:[#allocation5 + $0x1b4] sm:$0xf]  ;;  %541 = vmatpush.bf16.msra.mxu1 %v2962_v7  ;;  %v2971_v16 = vor.u32 %v2751_v13, %v2596_v11  ;;  %v2604_v18 = vld [vmem:[#allocation5 + $0x1b8] sm:$0xf]  ;;  %v2752_v19 = vld [vmem:[#allocation5 + $0x1d8] sm:$0xf0] }
  0x18   :  { %554 = vmatpush.bf16.msra.mxu2 %v2964_v8  ;;  %v2973_v17 = vor.u32 %v2747_v14, %v2598_v15  ;;  %v2748_v20 = vld [vmem:[#allocation5 + $0x1bc] sm:$0xf]  ;;  %567 = vmatpush.bf16.msra.mxu3 %v2967_v12  ;;  %v2976_v21 = vor.u32 %v2752_v19, %v2604_v18  ;;  %v2606_v22 = vld [vmem:[#allocation5 + $0x1dc] sm:$0xf0]  ;;  %v2560_v23 = vld [vmem:[#allocation5 + $0x168] sm:$0xf] }
  0x19   :  { %v2742_v24 = vld [vmem:[#allocation5 + $0x188] sm:$0xf0]  ;;  %v2978_v25 = vor.u32 %v2748_v20, %v2606_v22  ;;  %v2562_v27 = vld [vmem:[#allocation5 + $0x18c] sm:$0xf0]  ;;  %v2743_v30 = vld [vmem:[#allocation5 + $0x190] sm:$0xf0] }
  0x1a   :  { %v2738_v26 = vld [vmem:[#allocation5 + $0x16c] sm:$0xf]  ;;  %v2568_v28 = vld [vmem:[#allocation5 + $0x170] sm:$0xf]  ;;  %529 = vmatpush.bf16.msra.mxu0 %v2971_v16  ;;  %v2981_v29 = vor.u32 %v2742_v24, %v2560_v23  ;;  %v2739_v31 = vld [vmem:[#allocation5 + $0x174] sm:$0xf] }
  0x1b   :  { %v2570_v32 = vld [vmem:[#allocation5 + $0x194] sm:$0xf0]  ;;  %542 = vmatpush.bf16.msra.mxu1 %v2973_v17  ;;  %v2985_v33 = vor.u32 %v2738_v26, %v2562_v27  ;;  %v2987_v34 = vor.u32 %v2743_v30, %v2568_v28  ;;  %v2524_v35 = vld [vmem:[#allocation5 + $0x120] sm:$0xf]  ;;  %v2733_v36 = vld [vmem:[#allocation5 + $0x140] sm:$0xf0] }
  0x1c   :  { %555 = vmatpush.bf16.msra.mxu2 %v2976_v21  ;;  %v2729_v37 = vld [vmem:[#allocation5 + $0x124] sm:$0xf]  ;;  %568 = vmatpush.bf16.msra.mxu3 %v2978_v25  ;;  %v2990_v38 = vor.u32 %v2739_v31, %v2570_v32  ;;  %v2526_v39 = vld [vmem:[#allocation5 + $0x144] sm:$0xf0]  ;;  %v2734_v41 = vld [vmem:[#allocation5 + $0x148] sm:$0xf0]  ;;  %v2993_v44 = vor.u32 %v2733_v36, %v2524_v35 }
  0x1d   :  { %v2532_v40 = vld [vmem:[#allocation5 + $0x128] sm:$0xf]  ;;  %v2730_v42 = vld [vmem:[#allocation5 + $0x12c] sm:$0xf]  ;;  %v2534_v43 = vld [vmem:[#allocation5 + $0x14c] sm:$0xf0]  ;;  %v2997_v45 = vor.u32 %v2729_v37, %v2526_v39 }
  0x1e   :  { %530 = vmatpush.bf16.msra.mxu0 %v2981_v29  ;;  %v2999_v46 = vor.u32 %v2734_v41, %v2532_v40  ;;  %v2488_v47 = vld [vmem:[#allocation5 + $0xd8] sm:$0xf]  ;;  %v2724_v48 = vld [vmem:[#allocation5 + $0xf8] sm:$0xf0]  ;;  %v3002_v50 = vor.u32 %v2730_v42, %v2534_v43  ;;  %v2490_v51 = vld [vmem:[#allocation5 + $0xfc] sm:$0xf0] }
  0x1f   :  { %543 = vmatpush.bf16.msra.mxu1 %v2985_v33  ;;  %v2720_v49 = vld [vmem:[#allocation5 + $0xdc] sm:$0xf]  ;;  %v2496_v52 = vld [vmem:[#allocation5 + $0xe0] sm:$0xf]  ;;  %v2725_v53 = vld [vmem:[#allocation5 + $0x100] sm:$0xf0]  ;;  %v3005_v56 = vor.u32 %v2724_v48, %v2488_v47 }
  0x20   :  { %556 = vmatpush.bf16.msra.mxu2 %v2987_v34  ;;  %569 = vmatpush.bf16.msra.mxu3 %v2990_v38  ;;  %v2721_v54 = vld [vmem:[#allocation5 + $0xe4] sm:$0xf]  ;;  %v2498_v55 = vld [vmem:[#allocation5 + $0x104] sm:$0xf0]  ;;  %v3009_v57 = vor.u32 %v2720_v49, %v2490_v51  ;;  %v3011_v58 = vor.u32 %v2725_v53, %v2496_v52  ;;  %v2452_v59 = vld [vmem:[#allocation5 + $0x90] sm:$0xf] }
  0x21   :  { %v2715_v60 = vld [vmem:[#allocation5 + $0xb0] sm:$0xf0]  ;;  %v3014_v62 = vor.u32 %v2721_v54, %v2498_v55  ;;  %v2454_v63 = vld [vmem:[#allocation5 + $0xb4] sm:$0xf0]  ;;  %v2716_v1 = vld [vmem:[#allocation5 + $0xb8] sm:$0xf0] }
  0x22   :  { %531 = vmatpush.bf16.msra.mxu0 %v2993_v44  ;;  %v2711_v61 = vld [vmem:[#allocation5 + $0x94] sm:$0xf]  ;;  %v2460_v0 = vld [vmem:[#allocation5 + $0x98] sm:$0xf]  ;;  %v2712_v2 = vld [vmem:[#allocation5 + $0x9c] sm:$0xf]  ;;  %v3017_v5 = vor.u32 %v2715_v60, %v2452_v59 }
  0x23   :  { %544 = vmatpush.bf16.msra.mxu1 %v2997_v45  ;;  %4507 = vst [vmem:[#allocation15_spill] sm:$0xff] %v3014_v62  ;;  %v2462_v4 = vld [vmem:[#allocation5 + $0xbc] sm:$0xf0]  ;;  %v3021_v6 = vor.u32 %v2711_v61, %v2454_v63  ;;  %v3023_v9 = vor.u32 %v2716_v1, %v2460_v0  ;;  %v2416_v10 = vld [vmem:[#allocation5 + $0x48] sm:$0xf]  ;;  %s2922_s2 = smov [#allocation10]  }
  0x24   :  { %557 = vmatpush.bf16.msra.mxu2 %v2999_v46  ;;  %570 = vmatpush.bf16.msra.mxu3 %v3002_v50  ;;  %v2706_v11 = vld [vmem:[#allocation5 + $0x68] sm:$0xf0]  ;;  %v3026_v14 = vor.u32 %v2712_v2, %v2462_v4  ;;  %v2418_v15 = vld [vmem:[#allocation5 + $0x6c] sm:$0xf0]  ;;  %v2707_v19 = vld [vmem:[#allocation5 + $0x70] sm:$0xf0] }
  0x25   :  { %v2702_v13 = vld [vmem:[#allocation5 + $0x4c] sm:$0xf]  ;;  %v2424_v18 = vld [vmem:[#allocation5 + $0x50] sm:$0xf]  ;;  %v2703_v20 = vld [vmem:[#allocation5 + $0x54] sm:$0xf]  ;;  %v3029_v23 = vor.u32 %v2706_v11, %v2416_v10 }
  0x26   :  { %532 = vmatpush.bf16.msra.mxu0 %v3005_v56  ;;  %4508 = vst [vmem:[#allocation16_spill] sm:$0xff] %v3026_v14  ;;  %v2426_v22 = vld [vmem:[#allocation5 + $0x74] sm:$0xf0]  ;;  %v2380_v24 = vld [vmem:[#allocation5] sm:$0xf]  ;;  %v3033_v27 = vor.u32 %v2702_v13, %v2418_v15  ;;  %v3035_v28 = vor.u32 %v2707_v19, %v2424_v18  ;;  %s2364_s3 = sshll.u32 %s2922_s2, 4  ;;  %s2365_s3 = int_to_ptr.vmem [resolvable:$true] %s2364_s3 }
  0x27   :  { %545 = vmatpush.bf16.msra.mxu1 %v3009_v57  ;;  %v2697_v26 = vld [vmem:[#allocation5 + $0x20] sm:$0xf0]  ;;  %v2382_v31 = vld [vmem:[#allocation5 + $0x24] sm:$0xf0]  ;;  %v3038_v35 = vor.u32 %v2703_v20, %v2426_v22  ;;  %v2698_v36 = vld [vmem:[#allocation5 + $0x28] sm:$0xf0] }
  0x28   :  { %558 = vmatpush.bf16.msra.mxu2 %v3011_v58  ;;  %571 = vmatpush.bf16.msra.mxu3 %v3014_v62  ;;  %v2693_v30 = vld [vmem:[#allocation5 + $0x4] sm:$0xf]  ;;  %v2388_v32 = vld [vmem:[#allocation5 + $0x8] sm:$0xf]  ;;  %v2694_v37 = vld [vmem:[#allocation5 + $0xc] sm:$0xf]  ;;  %v3041_v43 = vor.u32 %v2697_v26, %v2380_v24 }
  0x29   :  { %4509 = vst [vmem:[#allocation17_spill] sm:$0xff] %v3038_v35  ;;  %v2390_v39 = vld [vmem:[#allocation5 + $0x2c] sm:$0xf0]  ;;  %v2648_v40 = vld [vmem:[#allocation5 + $0x208] sm:$0xf]  ;;  %v3045_v51 = vor.u32 %v2693_v30, %v2382_v31  ;;  %v3047_v52 = vor.u32 %v2698_v36, %v2388_v32  ;;  %s2366_s11 = sshll.u32 %s4469_s4, 4  ;;  %s2367_s11 = int_to_ptr.hbm [resolvable:$true] %s2366_s11 }
  0x2a   :  { %533 = vmatpush.bf16.msra.mxu0 %v3017_v5  ;;  %v2762_v41 = vld [vmem:[#allocation5 + $0x228] sm:$0xf0]  ;;  %v2650_v47 = vld [vmem:[#allocation5 + $0x22c] sm:$0xf0]  ;;  %v2763_v49 = vld [vmem:[#allocation5 + $0x230] sm:$0xf0]  ;;  %v3050_v55 = vor.u32 %v2694_v37, %v2390_v39 }
  0x2b   :  { %546 = vmatpush.bf16.msra.mxu1 %v3021_v6  ;;  %v2758_v42 = vld [vmem:[#allocation5 + $0x20c] sm:$0xf]  ;;  %v2656_v48 = vld [vmem:[#allocation5 + $0x210] sm:$0xf]  ;;  %4510 = vst [vmem:[#allocation18_spill] sm:$0xff] %v3047_v52  ;;  %v3052_v59 = vor.u32 %v2762_v41, %v2648_v40  ;;  %v75_v41 = vld [vmem:[#allocation2] sm:$0xff] }
  0x2c   :  { %559 = vmatpush.bf16.msra.mxu2 %v3023_v9  ;;  %572 = vmatpush.bf16.msra.mxu3 %v3026_v14  ;;  %v2759_v53 = vld [vmem:[#allocation5 + $0x214] sm:$0xf]  ;;  %v2658_v54 = vld [vmem:[#allocation5 + $0x234] sm:$0xf0]  ;;  %4511 = vst [vmem:[#allocation19_spill] sm:$0xff] %v3050_v55  ;;  %v3054_v60 = vor.u32 %v2758_v42, %v2650_v47  ;;  %v3056_v61 = vor.u32 %v2763_v49, %v2656_v48 }
  0x2d   :  { %v2612_v63 = vld [vmem:[#allocation5 + $0x1c0] sm:$0xf]  ;;  %v2753_v0 = vld [vmem:[#allocation5 + $0x1e0] sm:$0xf0]  ;;  %v3059_v2 = vor.u32 %v2759_v53, %v2658_v54  ;;  %v2614_v4 = vld [vmem:[#allocation5 + $0x1e4] sm:$0xf0]  ;;  %v3085_v54 = vpack.c.bf16 %v75_v41, %v75_v41 }
  0x2e   :  { %534 = vmatpush.bf16.msra.mxu0 %v3029_v23  ;;  %4512 = vst [vmem:[#allocation20_spill] sm:$0xff] %v3056_v61  ;;  %v2749_v1 = vld [vmem:[#allocation5 + $0x1c4] sm:$0xf]  ;;  %v2620_v10 = vld [vmem:[#allocation5 + $0x1c8] sm:$0xf]  ;;  %v3065_v18 = vor.u32 %v2753_v0, %v2612_v63 }
  0x2f   :  { %547 = vmatpush.bf16.msra.mxu1 %v3033_v27  ;;  %4513 = vst [vmem:[#allocation21_spill] sm:$0xff] %v3059_v2  ;;  %v2754_v11 = vld [vmem:[#allocation5 + $0x1e8] sm:$0xf0]  ;;  %v2622_v15 = vld [vmem:[#allocation5 + $0x1ec] sm:$0xf0]  ;;  %v3069_v19 = vor.u32 %v2749_v1, %v2614_v4 }
  0x30   :  { %560 = vmatpush.bf16.msra.mxu2 %v3035_v28  ;;  %573 = vmatpush.bf16.msra.mxu3 %v3038_v35  ;;  %v2750_v13 = vld [vmem:[#allocation5 + $0x1cc] sm:$0xf]  ;;  %v3071_v20 = vor.u32 %v2754_v11, %v2620_v10  ;;  %v2576_v22 = vld [vmem:[#allocation5 + $0x178] sm:$0xf]  ;;  %v2744_v24 = vld [vmem:[#allocation5 + $0x198] sm:$0xf0] }
  0x31   :  { %v2740_v26 = vld [vmem:[#allocation5 + $0x17c] sm:$0xf]  ;;  %v3074_v30 = vor.u32 %v2750_v13, %v2622_v15  ;;  %v2578_v31 = vld [vmem:[#allocation5 + $0x19c] sm:$0xf0]  ;;  %v2745_v36 = vld [vmem:[#allocation5 + $0x1a0] sm:$0xf0]  ;;  %v3077_v40 = vor.u32 %v2744_v24, %v2576_v22  ;;  %v157_v13 = vunpack.c.l.bf16 %v3085_v54 }
  0x32   :  { %535 = vmatpush.bf16.msra.mxu0 %v3041_v43  ;;  %4514 = vst [vmem:[#allocation22_spill] sm:$0xff] %v3071_v20  ;;  %v2584_v32 = vld [vmem:[#allocation5 + $0x180] sm:$0xf]  ;;  %v2741_v37 = vld [vmem:[#allocation5 + $0x184] sm:$0xf]  ;;  %v3081_v42 = vor.u32 %v2740_v26, %v2578_v31 }
  0x33   :  { %548 = vmatpush.bf16.msra.mxu1 %v3045_v51  ;;  %4515 = vst [vmem:[#allocation23_spill] sm:$0xff] %v3074_v30  ;;  %v2586_v39 = vld [vmem:[#allocation5 + $0x1a4] sm:$0xf0]  ;;  %v3083_v47 = vor.u32 %v2745_v36, %v2584_v32  ;;  %v2540_v48 = vld [vmem:[#allocation5 + $0x130] sm:$0xf]  ;;  %v3100_v36 = vsub.f32 %v75_v41, %v157_v13 }
  0x34   :  { %561 = vmatpush.bf16.msra.mxu2 %v3047_v52  ;;  %574 = vmatpush.bf16.msra.mxu3 %v3050_v55  ;;  %v2735_v49 = vld [vmem:[#allocation5 + $0x150] sm:$0xf0]  ;;  %v3088_v63 = vor.u32 %v2741_v37, %v2586_v39  ;;  %v2542_v0 = vld [vmem:[#allocation5 + $0x154] sm:$0xf0]  ;;  %v2736_v4 = vld [vmem:[#allocation5 + $0x158] sm:$0xf0] }
  0x35   :  { %4516 = vst [vmem:[#allocation24_spill] sm:$0xff] %v3083_v47  ;;  %v2731_v53 = vld [vmem:[#allocation5 + $0x134] sm:$0xf]  ;;  %v2548_v1 = vld [vmem:[#allocation5 + $0x138] sm:$0xf]  ;;  %v3092_v15 = vor.u32 %v2735_v49, %v2540_v48 }
  0x36   :  { %580 = vmatpush.bf16.msrb.mxu0 %v3052_v59  ;;  %4517 = vst [vmem:[#allocation25_spill] sm:$0xff] %v3088_v63  ;;  %v2732_v10 = vld [vmem:[#allocation5 + $0x13c] sm:$0xf]  ;;  %v2550_v11 = vld [vmem:[#allocation5 + $0x15c] sm:$0xf0]  ;;  %v3096_v22 = vor.u32 %v2731_v53, %v2542_v0  ;;  %v3098_v24 = vor.u32 %v2736_v4, %v2548_v1  ;;  %v3107_v53 = vpack.c.bf16 %v3100_v36, %v3100_v36 }
  0x37   :  { %593 = vmatpush.bf16.msrb.mxu1 %v3054_v60  ;;  %v2504_v26 = vld [vmem:[#allocation5 + $0xe8] sm:$0xf]  ;;  %v2726_v31 = vld [vmem:[#allocation5 + $0x108] sm:$0xf0]  ;;  %4519 = vst [vmem:[#allocation27_spill] sm:$0xff] %v3100_v36  ;;  %v3103_v37 = vor.u32 %v2732_v10, %v2550_v11 }
  0x38   :  { %606 = vmatpush.bf16.msrb.mxu2 %v3056_v61  ;;  %619 = vmatpush.bf16.msrb.mxu3 %v3059_v2  ;;  %4518 = vst [vmem:[#allocation26_spill] sm:$0xff] %v3098_v24  ;;  %v2722_v32 = vld [vmem:[#allocation5 + $0xec] sm:$0xf]  ;;  %v2506_v39 = vld [vmem:[#allocation5 + $0x10c] sm:$0xf0]  ;;  %v3110_v0 = vor.u32 %v2726_v31, %v2504_v26 }
  0x39   :  { %4520 = vst [vmem:[#allocation28_spill] sm:$0xff] %v3103_v37  ;;  %v2512_v48 = vld [vmem:[#allocation5 + $0xf0] sm:$0xf]  ;;  %v2727_v49 = vld [vmem:[#allocation5 + $0x110] sm:$0xf0]  ;;  %v3114_v41 = vor.u32 %v2722_v32, %v2506_v39  ;;  %562 = vmatmul.bf16.vlgmr.msra.gmra.mxu2 %v3107_v53  ;;  %536 = vmatmul.bf16.vlgmr.msra.gmra.mxu0 %v3107_v53 }
  0x3a   :  { %581 = vmatpush.bf16.msrb.mxu0 %v3065_v18  ;;  %v2514_v2 = vld [vmem:[#allocation5 + $0x114] sm:$0xf0]  ;;  %4521 = vst [vmem:[#allocation29_spill] sm:$0xff] %v3110_v0  ;;  %v2468_v1 = vld [vmem:[#allocation5 + $0xa0] sm:$0xf]  ;;  %v3116_v4 = vor.u32 %v2727_v49, %v2512_v48  ;;  %549 = vmatmul.bf16.vlgmr.msra.gmra.mxu1 %v3107_v53 }
  0x3b   :  { %594 = vmatpush.bf16.msrb.mxu1 %v3069_v19  ;;  %4522 = vst [vmem:[#allocation30_spill] sm:$0xff] %v3114_v41  ;;  %v2717_v10 = vld [vmem:[#allocation5 + $0xc0] sm:$0xf0]  ;;  %v2470_v36 = vld [vmem:[#allocation5 + $0xc4] sm:$0xf0]  ;;  %575 = vmatmul.bf16.vlgmr.msra.gmra.mxu3 %v3107_v53 }
  0x3c   :  { %607 = vmatpush.bf16.msrb.mxu2 %v3071_v20  ;;  %620 = vmatpush.bf16.msrb.mxu3 %v3074_v30  ;;  %v2723_v30 = vld [vmem:[#allocation5 + $0xf4] sm:$0xf]  ;;  %4523 = vst [vmem:[#allocation31_spill] sm:$0xff] %v3116_v4  ;;  %v2713_v11 = vld [vmem:[#allocation5 + $0xa4] sm:$0xf]  ;;  %v3125_v32 = vor.u32 %v2717_v10, %v2468_v1 }
  0x3d   :  { %v3119_v13 = vor.u32 %v2723_v30, %v2514_v2  ;;  %v2718_v55 = vld [vmem:[#allocation5 + $0xc8] sm:$0xf0]  ;;  %v2478_v31 = vld [vmem:[#allocation5 + $0xcc] sm:$0xf0]  ;;  %v3130_v2 = vor.u32 %v2713_v11, %v2470_v36  ;;  %v2432_v39 = vld [vmem:[#allocation5 + $0x58] sm:$0xf] }
  0x3e   :  { %582 = vmatpush.bf16.msrb.mxu0 %v3077_v40  ;;  %v2714_v26 = vld [vmem:[#allocation5 + $0xac] sm:$0xf]  ;;  %4525 = vst [vmem:[#allocation33_spill] sm:$0xff] %v3125_v32  ;;  %v2708_v48 = vld [vmem:[#allocation5 + $0x78] sm:$0xf0] }
  0x3f   :  { %595 = vmatpush.bf16.msrb.mxu1 %v3081_v42  ;;  %4524 = vst [vmem:[#allocation32_spill] sm:$0xff] %v3119_v13  ;;  %v2704_v49 = vld [vmem:[#allocation5 + $0x5c] sm:$0xf]  ;;  %v2434_v35 = vld [vmem:[#allocation5 + $0x7c] sm:$0xf0] }
  0x40   :  { %608 = vmatpush.bf16.msrb.mxu2 %v3083_v47  ;;  %621 = vmatpush.bf16.msrb.mxu3 %v3088_v63  ;;  %v2476_v63 = vld [vmem:[#allocation5 + $0xa8] sm:$0xf]  ;;  %v2440_v1 = vld [vmem:[#allocation5 + $0x60] sm:$0xf]  ;;  %v2709_v10 = vld [vmem:[#allocation5 + $0x80] sm:$0xf0] }
  0x41   :  { %v3132_v30 = vor.u32 %v2718_v55, %v2476_v63  ;;  %v2705_v14 = vld [vmem:[#allocation5 + $0x64] sm:$0xf]  ;;  %v2396_v36 = vld [vmem:[#allocation5 + $0x10] sm:$0xf]  ;;  %v3142_v55 = vor.u32 %v2704_v49, %v2434_v35  ;;  %v3144_v63 = vor.u32 %v2709_v10, %v2440_v1  ;;  %v2699_v11 = vld [vmem:[#allocation5 + $0x30] sm:$0xf0] }
  0x42   :  { %583 = vmatpush.bf16.msrb.mxu0 %v3092_v15  ;;  %v2664_v62 = vld [vmem:[#allocation5 + $0x218] sm:$0xf]  ;;  %v2628_v1 = vld [vmem:[#allocation5 + $0x1d0] sm:$0xf]  ;;  %v2755_v10 = vld [vmem:[#allocation5 + $0x1f0] sm:$0xf0] }
  0x43   :  { %596 = vmatpush.bf16.msrb.mxu1 %v3096_v22  ;;  %4526 = vst [vmem:[#allocation34_spill] sm:$0xff] %v3132_v30 }
  0x44   :  { %609 = vmatpush.bf16.msrb.mxu2 %v3098_v24  ;;  %622 = vmatpush.bf16.msrb.mxu3 %v3103_v37  ;;  %v3135_v37 = vor.u32 %v2714_v26, %v2478_v31  ;;  %4527 = vst [vmem:[#allocation35_spill] sm:$0xff] %v3144_v63  ;;  %v2695_v26 = vld [vmem:[#allocation5 + $0x14] sm:$0xf]  ;;  %v2398_v31 = vld [vmem:[#allocation5 + $0x34] sm:$0xf0] }
  0x45   :  { %v2764_v24 = vld [vmem:[#allocation5 + $0x238] sm:$0xf0]  ;;  %v3154_v35 = vor.u32 %v2695_v26, %v2398_v31  ;;  %v2520_v31 = vld [vmem:[#allocation5 + $0xf8] sm:$0xf] }
  0x46   :  { %584 = vmatpush.bf16.msrb.mxu0 %v3110_v0  ;;  %v2442_v0 = vld [vmem:[#allocation5 + $0x84] sm:$0xf0] }
  0x47   :  { %597 = vmatpush.bf16.msrb.mxu1 %v3114_v41  ;;  %v3138_v41 = vor.u32 %v2708_v48, %v2432_v39  ;;  %v2696_v39 = vld [vmem:[#allocation5 + $0x1c] sm:$0xf]  ;;  %v2406_v48 = vld [vmem:[#allocation5 + $0x3c] sm:$0xf0] }
  0x48   :  { %610 = vmatpush.bf16.msrb.mxu2 %v3116_v4  ;;  %623 = vmatpush.bf16.msrb.mxu3 %v3119_v13  ;;  %v3147_v13 = vor.u32 %v2705_v14, %v2442_v0  ;;  %v2404_v4 = vld [vmem:[#allocation5 + $0x18] sm:$0xf]  ;;  %v3159_v14 = vor.u32 %v2696_v39, %v2406_v48  ;;  %v3161_v0 = vor.u32 %v2764_v24, %v2664_v62  ;;  %v2592_v62 = vld [vmem:[#allocation5 + $0x188] sm:$0xf]  ;;  %v2746_v24 = vld [vmem:[#allocation5 + $0x1a8] sm:$0xf0] }
  0x49   :  { %v2728_v39 = vld [vmem:[#allocation5 + $0x118] sm:$0xf0] }
  0x4a   :  { %585 = vmatpush.bf16.msrb.mxu0 %v3125_v32  ;;  %v2700_v32 = vld [vmem:[#allocation5 + $0x38] sm:$0xf0]  ;;  %v3190_v48 = vor.u32 %v2728_v39, %v2520_v31  ;;  %v2412_v31 = vld [vmem:[#allocation5 + $0x20] sm:$0xf]  ;;  %v2701_v39 = vld [vmem:[#allocation5 + $0x40] sm:$0xf0] }
  0x4b   :  { %598 = vmatpush.bf16.msrb.mxu1 %v3130_v2  ;;  %v3156_v49 = vor.u32 %v2700_v32, %v2404_v4  ;;  %v3168_v4 = vor.u32 %v2755_v10, %v2628_v1  ;;  %v3177_v32 = vor.u32 %v2746_v24, %v2592_v62  ;;  %v2484_v1 = vld [vmem:[#allocation5 + $0xb0] sm:$0xf]  ;;  %v2719_v10 = vld [vmem:[#allocation5 + $0xd0] sm:$0xf0]  ;;  %v2448_v24 = vld [vmem:[#allocation5 + $0x68] sm:$0xf] }
  0x4c   :  { %611 = vmatpush.bf16.msrb.mxu2 %v3132_v30  ;;  %624 = vmatpush.bf16.msrb.mxu3 %v3135_v37  ;;  %v3150_v30 = vor.u32 %v2699_v11, %v2396_v36  ;;  %v2556_v36 = vld [vmem:[#allocation5 + $0x140] sm:$0xf]  ;;  %v2737_v11 = vld [vmem:[#allocation5 + $0x160] sm:$0xf0]  ;;  %v3196_v62 = vor.u32 %v2719_v10, %v2484_v1  ;;  %v3208_v1 = vor.u32 %v2701_v39, %v2412_v31  ;;  %v4529_v10 = vld [vmem:[#allocation26_spill] sm:$0xff] }
  0x4d   :  { %4528 = vst [vmem:[#allocation36_spill] sm:$0xff] %v3156_v49  ;;  %v3184_v26 = vor.u32 %v2737_v11, %v2556_v36  ;;  %v2710_v36 = vld [vmem:[#allocation5 + $0x88] sm:$0xf0]  ;;  %v4532_v31 = vld [vmem:[#allocation30_spill] sm:$0xff]  ;;  %v4533_v39 = vld [vmem:[#allocation31_spill] sm:$0xff] }
  0x4e   :  { %586 = vmatpush.bf16.msrb.mxu0 %v3138_v41  ;;  %v3202_v11 = vor.u32 %v2710_v36, %v2448_v24  ;;  %v4530_v24 = vld [vmem:[#allocation15_spill] sm:$0xff]  ;;  %v4531_v36 = vld [vmem:[#allocation29_spill] sm:$0xff] }
  0x4f   :  { %599 = vmatpush.bf16.msrb.mxu1 %v3142_v55 }
  0x50   :  { %612 = vmatpush.bf16.msrb.mxu2 %v3144_v63  ;;  %625 = vmatpush.bf16.msrb.mxu3 %v3147_v13 }
  0x52   :  { %587 = vmatpush.bf16.msrb.mxu0 %v3150_v30 }
  0x53   :  { %600 = vmatpush.bf16.msrb.mxu1 %v3154_v35 }
  0x54   :  { %613 = vmatpush.bf16.msrb.mxu2 %v3156_v49  ;;  %626 = vmatpush.bf16.msrb.mxu3 %v3159_v14 }
  0x55   :  { %588 = vmatmul.bf16.vlgmr.msrb.gmra.mxu0 %v3107_v53 }
  0x56   :  { %632 = vmatpush.bf16.msra.mxu0 %v3161_v0  ;;  %601 = vmatmul.bf16.vlgmr.msrb.gmra.mxu1 %v3107_v53 }
  0x57   :  { %645 = vmatpush.bf16.msra.mxu1 %v2960_v3  ;;  %614 = vmatmul.bf16.vlgmr.msrb.gmra.mxu2 %v3107_v53 }
  0x58   :  { %658 = vmatpush.bf16.msra.mxu2 %v2962_v7  ;;  %671 = vmatpush.bf16.msra.mxu3 %v2964_v8 }
  0x59   :  { %627 = vmatmul.bf16.vlgmr.msrb.gmra.mxu3 %v3107_v53 }
  0x5a   :  { %633 = vmatpush.bf16.msra.mxu0 %v3168_v4 }
  0x5b   :  { %646 = vmatpush.bf16.msra.mxu1 %v2971_v16 }
  0x5c   :  { %659 = vmatpush.bf16.msra.mxu2 %v2973_v17  ;;  %672 = vmatpush.bf16.msra.mxu3 %v2976_v21 }
  0x5e   :  { %634 = vmatpush.bf16.msra.mxu0 %v3177_v32 }
  0x5f   :  { %647 = vmatpush.bf16.msra.mxu1 %v2981_v29 }
  0x60   :  { %660 = vmatpush.bf16.msra.mxu2 %v2985_v33  ;;  %673 = vmatpush.bf16.msra.mxu3 %v2987_v34 }
  0x62   :  { %635 = vmatpush.bf16.msra.mxu0 %v3184_v26 }
  0x63   :  { %648 = vmatpush.bf16.msra.mxu1 %v2993_v44 }
  0x64   :  { %661 = vmatpush.bf16.msra.mxu2 %v2997_v45  ;;  %674 = vmatpush.bf16.msra.mxu3 %v2999_v46 }
  0x66   :  { %636 = vmatpush.bf16.msra.mxu0 %v3190_v48 }
  0x67   :  { %649 = vmatpush.bf16.msra.mxu1 %v3005_v56 }
  0x68   :  { %662 = vmatpush.bf16.msra.mxu2 %v3009_v57  ;;  %675 = vmatpush.bf16.msra.mxu3 %v3011_v58 }
  0x6a   :  { %637 = vmatpush.bf16.msra.mxu0 %v3196_v62 }
  0x6b   :  { %650 = vmatpush.bf16.msra.mxu1 %v3017_v5 }
  0x6c   :  { %663 = vmatpush.bf16.msra.mxu2 %v3021_v6  ;;  %676 = vmatpush.bf16.msra.mxu3 %v3023_v9 }
  0x6e   :  { %638 = vmatpush.bf16.msra.mxu0 %v3202_v11 }
  0x6f   :  { %651 = vmatpush.bf16.msra.mxu1 %v3029_v23 }
  0x70   :  { %664 = vmatpush.bf16.msra.mxu2 %v3033_v27  ;;  %677 = vmatpush.bf16.msra.mxu3 %v3035_v28 }
  0x72   :  { %639 = vmatpush.bf16.msra.mxu0 %v3208_v1 }
  0x73   :  { %652 = vmatpush.bf16.msra.mxu1 %v3041_v43 }
  0x74   :  { %665 = vmatpush.bf16.msra.mxu2 %v3045_v51  ;;  %678 = vmatpush.bf16.msra.mxu3 %v3047_v52  ;;  %v4537_v52 = vld [vmem:[#allocation17_spill] sm:$0xff] }
  0x75   :  { %640 = vmatmul.bf16.vlgmr.msra.gmra.mxu0 %v3107_v53 }
  0x76   :  { %684 = vmatpush.bf16.msrb.mxu0 %v2967_v12  ;;  %653 = vmatmul.bf16.vlgmr.msra.gmra.mxu1 %v3085_v54 }
  0x77   :  { %697 = vmatpush.bf16.msrb.mxu1 %v3052_v59  ;;  %666 = vmatmul.bf16.vlgmr.msra.gmra.mxu2 %v3085_v54 }
  0x78   :  { %710 = vmatpush.bf16.msrb.mxu2 %v3054_v60  ;;  %723 = vmatpush.bf16.msrb.mxu3 %v3056_v61  ;;  %v4535_v61 = vld [vmem:[#allocation33_spill] sm:$0xff] }
  0x79   :  { %679 = vmatmul.bf16.vlgmr.msra.gmra.mxu3 %v3085_v54 }
  0x7a   :  { %685 = vmatpush.bf16.msrb.mxu0 %v2978_v25 }
  0x7b   :  { %698 = vmatpush.bf16.msrb.mxu1 %v3065_v18 }
  0x7c   :  { %711 = vmatpush.bf16.msrb.mxu2 %v3069_v19  ;;  %724 = vmatpush.bf16.msrb.mxu3 %v3071_v20  ;;  %v4534_v20 = vld [vmem:[#allocation16_spill] sm:$0xff] }
  0x7e   :  { %686 = vmatpush.bf16.msrb.mxu0 %v2990_v38 }
  0x7f   :  { %699 = vmatpush.bf16.msrb.mxu1 %v3077_v40 }
  0x80   :  { %712 = vmatpush.bf16.msrb.mxu2 %v3081_v42  ;;  %725 = vmatpush.bf16.msrb.mxu3 %v3083_v47  ;;  %v4536_v47 = vld [vmem:[#allocation34_spill] sm:$0xff] }
  0x82   :  { %687 = vmatpush.bf16.msrb.mxu0 %v3002_v50 }
  0x83   :  { %700 = vmatpush.bf16.msrb.mxu1 %v3092_v15 }
  0x84   :  { %713 = vmatpush.bf16.msrb.mxu2 %v3096_v22  ;;  %726 = vmatpush.bf16.msrb.mxu3 %v4529_v10  ;;  %v4538_v10 = vld [vmem:[#allocation19_spill] sm:$0xff] }
  0x86   :  { %688 = vmatpush.bf16.msrb.mxu0 %v4530_v24 }
  0x87   :  { %701 = vmatpush.bf16.msrb.mxu1 %v4531_v36 }
  0x88   :  { %714 = vmatpush.bf16.msrb.mxu2 %v4532_v31  ;;  %727 = vmatpush.bf16.msrb.mxu3 %v4533_v39  ;;  %v4539_v39 = vld [vmem:[#allocation21_spill] sm:$0xff] }
  0x8a   :  { %689 = vmatpush.bf16.msrb.mxu0 %v4534_v20 }
  0x8b   :  { %702 = vmatpush.bf16.msrb.mxu1 %v4535_v61 }
  0x8c   :  { %715 = vmatpush.bf16.msrb.mxu2 %v3130_v2  ;;  %728 = vmatpush.bf16.msrb.mxu3 %v4536_v47 }
  0x8e   :  { %690 = vmatpush.bf16.msrb.mxu0 %v4537_v52 }
  0x8f   :  { %703 = vmatpush.bf16.msrb.mxu1 %v3138_v41 }
  0x90   :  { %716 = vmatpush.bf16.msrb.mxu2 %v3142_v55  ;;  %729 = vmatpush.bf16.msrb.mxu3 %v3144_v63  ;;  %v4540_v63 = vld [vmem:[#allocation23_spill] sm:$0xff] }
  0x92   :  { %691 = vmatpush.bf16.msrb.mxu0 %v4538_v10 }
  0x93   :  { %704 = vmatpush.bf16.msrb.mxu1 %v3150_v30 }
  0x94   :  { %717 = vmatpush.bf16.msrb.mxu2 %v3154_v35  ;;  %730 = vmatpush.bf16.msrb.mxu3 %v3156_v49  ;;  %v4541_v49 = vld [vmem:[#allocation25_spill] sm:$0xff] }
  0x95   :  { %692 = vmatmul.bf16.vlgmr.msrb.gmra.mxu0 %v3085_v54 }
  0x96   :  { %736 = vmatpush.bf16.msra.mxu0 %v4539_v39  ;;  %705 = vmatmul.bf16.vlgmr.msrb.gmra.mxu1 %v3085_v54 }
  0x97   :  { %749 = vmatpush.bf16.msra.mxu1 %v3161_v0  ;;  %718 = vmatmul.bf16.vlgmr.msrb.gmra.mxu2 %v3085_v54 }
  0x98   :  { %765 = vmatpush.bf16.msra.mxu2 %v2960_v3  ;;  %778 = vmatpush.bf16.msra.mxu3 %v2962_v7  ;;  %v4542_v3 = vld [vmem:[#allocation28_spill] sm:$0xff] }
  0x99   :  { %731 = vmatmul.bf16.vlgmr.msrb.gmra.mxu3 %v3085_v54  ;;  %v4543_v7 = vld [vmem:[#allocation32_spill] sm:$0xff] }
  0x9a   :  { %737 = vmatpush.bf16.msra.mxu0 %v4540_v63 }
  0x9b   :  { %750 = vmatpush.bf16.msra.mxu1 %v3168_v4 }
  0x9c   :  { %766 = vmatpush.bf16.msra.mxu2 %v2971_v16  ;;  %779 = vmatpush.bf16.msra.mxu3 %v2973_v17  ;;  %v762_v16 = vunpack.c.l.bf16 %v3107_v53  ;;  %v4544_v17 = vld [vmem:[#allocation27_spill] sm:$0xff] }
  0x9e   :  { %738 = vmatpush.bf16.msra.mxu0 %v4541_v49 }
  0x9f   :  { %751 = vmatpush.bf16.msra.mxu1 %v3177_v32 }
  0xa0   :  { %767 = vmatpush.bf16.msra.mxu2 %v2981_v29  ;;  %780 = vmatpush.bf16.msra.mxu3 %v2985_v33  ;;  %v763_v29 = vsub.f32 %v4544_v17, %v762_v16 }
  0xa2   :  { %739 = vmatpush.bf16.msra.mxu0 %v4542_v3  ;;  %v3290_v33 = vpack.c.bf16 %v763_v29, %v763_v29 }
  0xa3   :  { %752 = vmatpush.bf16.msra.mxu1 %v3184_v26 }
  0xa4   :  { %768 = vmatpush.bf16.msra.mxu2 %v2993_v44  ;;  %781 = vmatpush.bf16.msra.mxu3 %v2997_v45  ;;  %v4546_v45 = vld [vmem:[#allocation20_spill] sm:$0xff] }
  0xa6   :  { %740 = vmatpush.bf16.msra.mxu0 %v4543_v7 }
  0xa7   :  { %753 = vmatpush.bf16.msra.mxu1 %v3190_v48 }
  0xa8   :  { %769 = vmatpush.bf16.msra.mxu2 %v3005_v56  ;;  %782 = vmatpush.bf16.msra.mxu3 %v3009_v57 }
  0xaa   :  { %741 = vmatpush.bf16.msra.mxu0 %v3135_v37 }
  0xab   :  { %754 = vmatpush.bf16.msra.mxu1 %v3196_v62 }
  0xac   :  { %770 = vmatpush.bf16.msra.mxu2 %v3017_v5  ;;  %783 = vmatpush.bf16.msra.mxu3 %v3021_v6  ;;  %v4549_v6 = vld [vmem:[#allocation26_spill] sm:$0xff] }
  0xae   :  { %742 = vmatpush.bf16.msra.mxu0 %v3147_v13 }
  0xaf   :  { %755 = vmatpush.bf16.msra.mxu1 %v3202_v11 }
  0xb0   :  { %771 = vmatpush.bf16.msra.mxu2 %v3029_v23  ;;  %784 = vmatpush.bf16.msra.mxu3 %v3033_v27 }
  0xb2   :  { %743 = vmatpush.bf16.msra.mxu0 %v3159_v14 }
  0xb3   :  { %756 = vmatpush.bf16.msra.mxu1 %v3208_v1 }
  0xb4   :  { %772 = vmatpush.bf16.msra.mxu2 %v3041_v43  ;;  %785 = vmatpush.bf16.msra.mxu3 %v3045_v51 }
  0xb5   :  { %744 = vmatmul.bf16.vlgmr.msra.gmra.mxu0 %v3085_v54 }
  0xb6   :  { %791 = vmatpush.bf16.msrb.mxu0 %v2964_v8  ;;  %757 = vmatmul.bf16.vlgmr.msra.gmra.mxu1 %v3085_v54  ;;  %v537_v8 = vpop.f32.mrf.mxu0 }
  0xb7   :  { %804 = vmatpush.bf16.msrb.mxu1 %v2967_v12  ;;  %773 = vmatmul.bf16.vlgmr.msra.gmra.mxu2 %v3290_v33  ;;  %v550_v12 = vpop.f32.mrf.mxu1 }
  0xb8   :  { %817 = vmatpush.bf16.msrb.mxu2 %v3052_v59  ;;  %830 = vmatpush.bf16.msrb.mxu3 %v3054_v60  ;;  %v4551_v59 = vld [vmem:[#allocation35_spill] sm:$0xff]  ;;  %v4552_v60 = vld [vmem:[#allocation36_spill] sm:$0xff] }
  0xb9   :  { %786 = vmatmul.bf16.vlgmr.msra.gmra.mxu3 %v3290_v33 }
  0xba   :  { %792 = vmatpush.bf16.msrb.mxu0 %v2976_v21 }
  0xbb   :  { %805 = vmatpush.bf16.msrb.mxu1 %v2978_v25 }
  0xbc   :  { %818 = vmatpush.bf16.msrb.mxu2 %v3065_v18  ;;  %831 = vmatpush.bf16.msrb.mxu3 %v3069_v19  ;;  %v563_v21 = vpop.f32.mrf.mxu2 }
  0xbe   :  { %793 = vmatpush.bf16.msrb.mxu0 %v2987_v34  ;;  %v576_v25 = vpop.f32.mrf.mxu3  ;;  %v4545_v34 = vld [vmem:[#allocation18_spill] sm:$0xff] }
  0xbf   :  { %806 = vmatpush.bf16.msrb.mxu1 %v2990_v38  ;;  %v539_v38 = vpop.f32.mrf.mxu0  ;;  %v552_v44 = vpop.f32.mrf.mxu1 }
  0xc0   :  { %819 = vmatpush.bf16.msrb.mxu2 %v3077_v40  ;;  %832 = vmatpush.bf16.msrb.mxu3 %v3081_v42 }
  0xc2   :  { %794 = vmatpush.bf16.msrb.mxu0 %v2999_v46 }
  0xc3   :  { %807 = vmatpush.bf16.msrb.mxu1 %v3002_v50  ;;  %v4547_v50 = vld [vmem:[#allocation22_spill] sm:$0xff] }
  0xc4   :  { %820 = vmatpush.bf16.msrb.mxu2 %v3092_v15  ;;  %833 = vmatpush.bf16.msrb.mxu3 %v3096_v22  ;;  %v565_v46 = vpop.f32.mrf.mxu2 }
  0xc6   :  { %795 = vmatpush.bf16.msrb.mxu0 %v3011_v58  ;;  %v578_v56 = vpop.f32.mrf.mxu3  ;;  %v4548_v58 = vld [vmem:[#allocation24_spill] sm:$0xff] }
  0xc7   :  { %808 = vmatpush.bf16.msrb.mxu1 %v4530_v24 }
  0xc8   :  { %821 = vmatpush.bf16.msrb.mxu2 %v4531_v36  ;;  %834 = vmatpush.bf16.msrb.mxu3 %v4532_v31 }
  0xca   :  { %796 = vmatpush.bf16.msrb.mxu0 %v3023_v9 }
  0xcb   :  { %809 = vmatpush.bf16.msrb.mxu1 %v4534_v20 }
  0xcc   :  { %822 = vmatpush.bf16.msrb.mxu2 %v4535_v61  ;;  %835 = vmatpush.bf16.msrb.mxu3 %v3130_v2 }
  0xce   :  { %797 = vmatpush.bf16.msrb.mxu0 %v3035_v28  ;;  %v4550_v28 = vld [vmem:[#allocation31_spill] sm:$0xff] }
  0xcf   :  { %810 = vmatpush.bf16.msrb.mxu1 %v4537_v52 }
  0xd0   :  { %823 = vmatpush.bf16.msrb.mxu2 %v3138_v41  ;;  %836 = vmatpush.bf16.msrb.mxu3 %v3142_v55 }
  0xd2   :  { %798 = vmatpush.bf16.msrb.mxu0 %v4545_v34  ;;  %v589_v5 = vpop.f32.mrf.mxu0 }
  0xd3   :  { %811 = vmatpush.bf16.msrb.mxu1 %v4538_v10  ;;  %v602_v57 = vpop.f32.mrf.mxu1 }
  0xd4   :  { %824 = vmatpush.bf16.msrb.mxu2 %v3150_v30  ;;  %837 = vmatpush.bf16.msrb.mxu3 %v3154_v35 }
  0xd5   :  { %799 = vmatmul.bf16.vlgmr.msrb.gmra.mxu0 %v3290_v33 }
  0xd6   :  { %843 = vmatpush.bf16.msra.mxu0 %v4546_v45  ;;  %812 = vmatmul.bf16.vlgmr.msrb.gmra.mxu1 %v3290_v33 }
  0xd7   :  { %856 = vmatpush.bf16.msra.mxu1 %v4539_v39  ;;  %825 = vmatmul.bf16.vlgmr.msrb.gmra.mxu2 %v3290_v33 }
  0xd8   :  { %869 = vmatpush.bf16.msra.mxu2 %v3161_v0  ;;  %838 = vmatmul.bf16.vlgmr.msrb.gmra.mxu3 %v3290_v33 }
  0xda   :  { %844 = vmatpush.bf16.msra.mxu0 %v4547_v50  ;;  %v615_v9 = vpop.f32.mrf.mxu2  ;;  %v591_v43 = vpop.f32.mrf.mxu0 }
  0xdb   :  { %857 = vmatpush.bf16.msra.mxu1 %v4540_v63  ;;  %v604_v27 = vpop.f32.mrf.mxu1 }
  0xdc   :  { %870 = vmatpush.bf16.msra.mxu2 %v3168_v4  ;;  %v3345_v23 = vpop.f32.mrf.mxu3 }
  0xde   :  { %845 = vmatpush.bf16.msra.mxu0 %v4548_v58 }
  0xdf   :  { %858 = vmatpush.bf16.msra.mxu1 %v4541_v49 }
  0xe0   :  { %871 = vmatpush.bf16.msra.mxu2 %v3177_v32 }
  0xe2   :  { %846 = vmatpush.bf16.msra.mxu0 %v4549_v6  ;;  %v617_v51 = vpop.f32.mrf.mxu2 }
  0xe3   :  { %859 = vmatpush.bf16.msra.mxu1 %v4542_v3 }
  0xe4   :  { %872 = vmatpush.bf16.msra.mxu2 %v3184_v26  ;;  %v630_v52 = vpop.f32.mrf.mxu3 }
  0xe6   :  { %847 = vmatpush.bf16.msra.mxu0 %v4550_v28 }
  0xe7   :  { %860 = vmatpush.bf16.msra.mxu1 %v4543_v7 }
  0xe8   :  { %873 = vmatpush.bf16.msra.mxu2 %v3190_v48 }
  0xea   :  { %848 = vmatpush.bf16.msra.mxu0 %v4536_v47 }
  0xeb   :  { %861 = vmatpush.bf16.msra.mxu1 %v3135_v37 }
  0xec   :  { %874 = vmatpush.bf16.msra.mxu2 %v3196_v62  ;;  %v3376_v62 = vld [vmem:[#allocation7] sm:$0xff] }
  0xed   :  { %v896_v10 = vperm.slane %v3376_v62, 1 }
  0xee   :  { %849 = vmatpush.bf16.msra.mxu0 %v4551_v59 }
  0xef   :  { %862 = vmatpush.bf16.msra.mxu1 %v3147_v13 }
  0xf0   :  { %875 = vmatpush.bf16.msra.mxu2 %v3202_v11  ;;  %v895_v11 = vperm.slane %v3376_v62, 0 }
  0xf2   :  { %850 = vmatpush.bf16.msra.mxu0 %v4552_v60  ;;  %v641_v19 = vpop.f32.mrf.mxu0 }
  0xf3   :  { %863 = vmatpush.bf16.msra.mxu1 %v3159_v14  ;;  %v654_v61 = vpop.f32.mrf.mxu1 }
  0xf4   :  { %876 = vmatpush.bf16.msra.mxu2 %v3208_v1  ;;  %v655_v18 = vadd.f32 %v654_v61, %v537_v8  ;;  %v2915_v61 = vmov 683565275  }
  0xf5   :  { %851 = vmatmul.bf16.vlgmr.msra.gmra.mxu0 %v3290_v33 }
  0xf6   :  { %864 = vmatmul.bf16.vlgmr.msra.gmra.mxu1 %v3290_v33 }
  0xf7   :  { %877 = vmatmul.bf16.vlgmr.msra.gmra.mxu2 %v3290_v33 }
  0xfa   :  { %v667_v20 = vpop.f32.mrf.mxu2  ;;  %v643_v15 = vpop.f32.mrf.mxu0 }
  0xfb   :  { %v668_v42 = vadd.f32 %v667_v20, %v550_v12  ;;  %v656_v54 = vpop.f32.mrf.mxu1 }
  0xfc   :  { %v680_v40 = vpop.f32.mrf.mxu3  ;;  %v2917_v54 = vmov 2131351028  }
  0xfd   :  { %v3362_v47 = vadd.f32 %v680_v40, %v563_v21 }
 0x102   :  { %v669_v22 = vpop.f32.mrf.mxu2 }
 0x104   :  { %v682_v37 = vpop.f32.mrf.mxu3 }
 0x105   :  { %v2918_v37 = vmov 2102212464  }
 0x112   :  { %v693_v53 = vpop.f32.mrf.mxu0 }
 0x113   :  { %v3364_v41 = vadd.f32 %v693_v53, %v576_v25  ;;  %v706_v13 = vpop.f32.mrf.mxu1 }
 0x114   :  { %v3366_v2 = vadd.f32 %v706_v13, %v589_v5 }
 0x11a   :  { %v719_v30 = vpop.f32.mrf.mxu2  ;;  %v695_v35 = vpop.f32.mrf.mxu0 }
 0x11b   :  { %v3368_v55 = vadd.f32 %v719_v30, %v602_v57  ;;  %v708_v14 = vpop.f32.mrf.mxu1  ;;  %v2919_v30 = vmov 920167782  }
 0x11c   :  { %v732_v63 = vpop.f32.mrf.mxu3  ;;  %v2920_v14 = vmov 1326507024  }
 0x11d   :  { %v3370_v49 = vadd.f32 %v732_v63, %v615_v9 }
 0x122   :  { %v721_v0 = vpop.f32.mrf.mxu2 }
 0x124   :  { %v734_v4 = vpop.f32.mrf.mxu3 }
 0x132   :  { %v3372_v32 = vpop.f32.mrf.mxu0 }
 0x133   :  { %v758_v26 = vpop.f32.mrf.mxu1 }
 0x134   :  { %v3374_v48 = vadd.f32 %v758_v26, %v641_v19  ;;  %v2916_v19 = vmov 2475754826  }
 0x13a   :  { %v774_v1 = vpop.f32.mrf.mxu2  ;;  %v747_v31 = vpop.f32.mrf.mxu0 }
 0x13b   :  { %v3380_v24 = vadd.f32 %v774_v1, %v655_v18  ;;  %v760_v3 = vpop.f32.mrf.mxu1 }
 0x13c   :  { %v787_v36 = vpop.f32.mrf.mxu3 }
 0x13d   :  { %v3382_v39 = vadd.f32 %v787_v36, %v668_v42  ;;  %v3385_v7 = vadd.f32 %v895_v11, %v3380_v24 }
 0x13f   :  { %v3388_v16 = vadd.f32 %v896_v10, %v3382_v39  ;;  %v922_v17 = vand.u32 2147483647, %v3385_v7  ;;  %v925_v29 = vand.u32 2139095040, %v3385_v7 }
 0x141   :  { %v1077_v33 = vand.u32 2147483647, %v3388_v16  ;;  %v1080_v8 = vand.u32 2139095040, %v3388_v16  ;;  %v926_v12 = vshrl.u32 %v925_v29, 23  ;;  %v929_v21 = vand.u32 8388607, %v922_v17 }
 0x142   :  { %v776_v38 = vpop.f32.mrf.mxu2 }
 0x143   :  { %v1081_v25 = vshrl.u32 %v1080_v8, 23  ;;  %v1084_v34 = vand.u32 8388607, %v1077_v33  ;;  %v2666_v44 = vadd.s32 4294967169, %v926_v12  ;;  %v930_v45 = vor.u32 8388608, %v929_v21 }
 0x144   :  { %v789_v46 = vpop.f32.mrf.mxu3 }
 0x145   :  { %v2669_v50 = vadd.s32 4294967169, %v1081_v25  ;;  %v1085_v56 = vor.u32 8388608, %v1084_v34  ;;  %v932_v57 = vadd.s32 1, %v2666_v44  ;;  %v3398_v5 = vshll.u32 %v930_v45, 8 }
 0x147   :  { %v1087_v58 = vadd.s32 1, %v2669_v50  ;;  %vm933_vm0 = vcmp.gt.s32.totalorder %v932_v57, 0  ;;  %v3400_v9 = vshll.u32 %v1085_v56, 8  ;;  %v3403_v51 = vand.u32 65535, %v3398_v5 }
 0x148   :  { %v934_v6 = vsel %vm933_vm0, %v932_v57, 0  ;;  %v3406_v52 = vshrl.u32 %v3398_v5, 16 }
 0x149   :  { %vm1088_vm1 = vcmp.gt.s32.totalorder %v1087_v58, 0  ;;  %v936_v27 = vand.u32 31, %v934_v6  ;;  %v3410_v60 = vshrl.u32 %v934_v6, 5  ;;  %v3415_v40 = vand.u32 65535, %v3400_v9 }
 0x14a   :  { %v1089_v28 = vsel %vm1088_vm1, %v1087_v58, 0 }
 0x14b   :  { %v937_v43 = vsub.s32 32, %v936_v27  ;;  %v3408_v59 = vand.u32 31, %v1089_v28  ;;  %v939_v18 = vshll.u32 %v2915_v61, %v936_v27  ;;  %v942_v20 = vshll.u32 %v2916_v19, %v936_v27 }
 0x14c   :  { %v945_v22 = vshll.u32 %v2917_v54, %v936_v27  ;;  %v948_v13 = vshll.u32 %v2918_v37, %v936_v27  ;;  %v951_v35 = vshll.u32 %v2919_v30, %v936_v27  ;;  %vm954_vm2 = vcmp.lt.s32.totalorder %v3410_v60, 1 }
 0x14d   :  { %v940_v42 = vshrl.u32 %v2916_v19, %v937_v43  ;;  %v943_v15 = vshrl.u32 %v2917_v54, %v937_v43  ;;  %v946_v53 = vshrl.u32 %v2918_v37, %v937_v43  ;;  %v949_v63 = vshrl.u32 %v2919_v30, %v937_v43 }
 0x14e   :  { %v952_v0 = vshrl.u32 %v2920_v14, %v937_v43  ;;  %v3426_v1 = vsub.s32 32, %v3408_v59  ;;  %vm955_vm3 = vcmp.lt.s32.totalorder %v3410_v60, 2  ;;  %v938_v31 = vshrl.u32 %v2915_v61, %v937_v43 }
 0x14f   :  { %v941_v4 = vor.u32 %v940_v42, %v939_v18  ;;  %v944_v26 = vor.u32 %v943_v15, %v942_v20  ;;  %v947_v11 = vor.u32 %v946_v53, %v945_v22  ;;  %v950_v10 = vor.u32 %v949_v63, %v948_v13 }
 0x150   :  { %v953_v36 = vor.u32 %v952_v0, %v951_v35  ;;  %vm957_vm4 = vcmp.lt.s32.totalorder %v3410_v60, 4  ;;  %vm956_vm5 = vcmp.lt.s32.totalorder %v3410_v60, 3  ;;  %v1094_v25 = vshll.u32 %v2915_v61, %v3408_v59 }
 0x151   :  { %v962_v3 = vsel %vm954_vm2, %v941_v4, %v944_v26  ;;  %v966_v29 = vsel %vm954_vm2, %v944_v26, %v947_v11  ;;  %v963_v12 = vsel %vm957_vm4, %v950_v10, 920167782  ;;  %v959_v34 = vsel %vm957_vm4, %v947_v11, 2102212464 }
 0x152   :  { %v3436_v8 = vpop.f32.mrf.mxu0  ;;  %v967_v21 = vsel %vm957_vm4, %v953_v36, 1326507024  ;;  %v964_v38 = vsel %vm956_vm5, %v947_v11, %v963_v12  ;;  %v1095_v45 = vshrl.u32 %v2916_v19, %v3426_v1  ;;  %v1097_v56 = vshll.u32 %v2916_v19, %v3408_v59 }
 0x153   :  { %v968_v44 = vsel %vm956_vm5, %v950_v10, %v967_v21  ;;  %v965_v46 = vsel %vm955_vm3, %v962_v3, %v964_v38  ;;  %v1098_v57 = vshrl.u32 %v2917_v54, %v3426_v1  ;;  %v958_v18 = vsel %vm954_vm2, %v938_v31, %v941_v4 }
 0x154   :  { %v969_v50 = vsel %vm955_vm3, %v966_v29, %v968_v44  ;;  %v995_v27 = vand.u32 65535, %v965_v46  ;;  %v996_v43 = vshrl.u32 %v965_v46, 16  ;;  %v960_v20 = vsel %vm956_vm5, %v944_v26, %v959_v34 }
 0x155   :  { %v973_v58 = vand.u32 65535, %v969_v50  ;;  %v974_v6 = vshrl.u32 %v969_v50, 16  ;;  %v3459_v42 = vshrl.u32 %v1089_v28, 5  ;;  %v3461_v15 = vor.u32 %v1095_v45, %v1094_v25 }
 0x156   :  { %v3465_v13 = vor.u32 %v1098_v57, %v1097_v56  ;;  %v1101_v63 = vshrl.u32 %v2918_v37, %v3426_v1  ;;  %v998_v0 = vmul.u32 %v996_v43, %v3403_v51  ;;  %v999_v4 = vmul.u32 %v995_v27, %v3406_v52 }
 0x157   :  { %v976_v22 = vmul.u32 %v974_v6, %v3403_v51  ;;  %v977_v53 = vmul.u32 %v973_v58, %v3406_v52  ;;  %v975_v35 = vmul.u32 %v973_v58, %v3403_v51  ;;  %v1100_v28 = vshll.u32 %v2917_v54, %v3408_v59 }
 0x158   :  { %v978_v26 = vmul.u32 %v974_v6, %v3406_v52  ;;  %v997_v10 = vmul.u32 %v995_v27, %v3403_v51  ;;  %v1000_v36 = vmul.u32 %v996_v43, %v3406_v52  ;;  %v1001_v21 = vshll.u32 %v998_v0, 16 }
 0x159   :  { %v979_v11 = vshll.u32 %v976_v22, 16  ;;  %v980_v3 = vshrl.u32 %v976_v22, 16  ;;  %v981_v29 = vshll.u32 %v977_v53, 16  ;;  %v982_v12 = vshrl.u32 %v977_v53, 16 }
 0x15a   :  { %v802_v31 = vpop.f32.mrf.mxu0  ;;  %v1003_v34 = vshll.u32 %v999_v4, 16  ;;  %v1102_v38 = vor.u32 %v1101_v63, %v1100_v28  ;;  %v2921_v44 = vmov 0   ;;  %vm1005_vm7 = vc.u32 %v997_v10, %v1001_v21 }
 0x15b   :  { %vm983_vm6 = vc.u32 %v975_v35, %v979_v11  ;;  %v985_v25 = vadd.s32 %v979_v11, %v975_v35  ;;  %v1007_v46 = vadd.s32 %v1001_v21, %v997_v10  ;;  %v1104_v50 = vshrl.u32 %v2919_v30, %v3426_v1 }
 0x15c   :  { %v984_v45 = vsel %vm983_vm6, 1, %v2921_v44  ;;  %v1006_v52 = vsel %vm1005_vm7, 1, %v2921_v44  ;;  %v1103_v56 = vshll.u32 %v2918_v37, %v3408_v59  ;;  %v1106_v6 = vshll.u32 %v2919_v30, %v3408_v59 }
 0x15d   :  { %v986_v51 = vadd.s32 %v984_v45, %v978_v26  ;;  %vm987_vm8 = vc.u32 %v985_v25, %v981_v29  ;;  %v1008_v58 = vadd.s32 %v1006_v52, %v1000_v36  ;;  %vm1009_vm9 = vc.u32 %v1007_v46, %v1003_v34 }
 0x15e   :  { %v988_v57 = vsel %vm987_vm8, 1, %v2921_v44  ;;  %v1010_v43 = vsel %vm1009_vm9, 1, %v2921_v44  ;;  %v1105_v22 = vor.u32 %v1104_v50, %v1103_v56  ;;  %v1107_v53 = vshrl.u32 %v2920_v14, %v3426_v1 }
 0x15f   :  { %v990_v27 = vadd.s32 %v988_v57, %v986_v51  ;;  %v1002_v63 = vshrl.u32 %v998_v0, 16  ;;  %v1004_v35 = vshrl.u32 %v999_v4, 16  ;;  %v3489_v28 = vadd.s32 %v1007_v46, %v1003_v34  ;;  %v813_v34 = vpop.f32.mrf.mxu1 }
 0x160   :  { %v1012_v26 = vadd.s32 %v1010_v43, %v1008_v58  ;;  %v1108_v10 = vor.u32 %v1107_v53, %v1106_v6  ;;  %vm1109_vm10 = vcmp.lt.s32.totalorder %v3459_v42, 1  ;;  %vm1112_vm11 = vcmp.lt.s32.totalorder %v3459_v42, 4 }
 0x161   :  { %v991_v11 = vadd.s32 %v990_v27, %v980_v3  ;;  %vm1111_vm12 = vcmp.lt.s32.totalorder %v3459_v42, 3  ;;  %v1117_v59 = vsel %vm1109_vm10, %v3461_v15, %v3465_v13  ;;  %v1118_v0 = vsel %vm1112_vm11, %v1105_v22, 920167782 }
 0x162   :  { %v1013_v36 = vadd.s32 %v1012_v26, %v1002_v63  ;;  %vm1110_vm13 = vcmp.lt.s32.totalorder %v3459_v42, 2  ;;  %v1119_v31 = vsel %vm1111_vm12, %v1102_v38, %v1118_v0  ;;  %v1121_v3 = vsel %vm1109_vm10, %v3465_v13, %v1102_v38 }
 0x163   :  { %v3500_v4 = vadd.s32 %v991_v11, %v982_v12  ;;  %v961_v29 = vsel %vm955_vm3, %v958_v18, %v960_v20  ;;  %v1120_v25 = vsel %vm1110_vm13, %v1117_v59, %v1119_v31  ;;  %v1122_v12 = vsel %vm1112_vm11, %v1108_v10, 1326507024 }
 0x164   :  { %v1014_v21 = vadd.s32 %v1013_v36, %v1004_v35  ;;  %v1123_v45 = vsel %vm1111_vm12, %v1105_v22, %v1122_v12  ;;  %v1127_v46 = vshrl.u32 %v3400_v9, 16  ;;  %v1150_v50 = vand.u32 65535, %v1120_v25 }
 0x165   :  { %vm1017_vm14 = vc.u32 %v3500_v4, %v3489_v28  ;;  %v1093_v60 = vshrl.u32 %v2915_v61, %v3426_v1  ;;  %v1124_v18 = vsel %vm1110_vm13, %v1121_v3, %v1123_v45  ;;  %v1151_v20 = vshrl.u32 %v1120_v25, 16 }
 0x166   :  { %v1018_v51 = vadd.s32 1, %v1014_v21  ;;  %v1015_v52 = vmul.u32 %v3398_v5, %v961_v29  ;;  %v1128_v56 = vand.u32 65535, %v1124_v18  ;;  %v1129_v57 = vshrl.u32 %v1124_v18, 16 }
 0x167   :  { %v897_v58 = vperm.slane %v3376_v62, 2  ;;  %v1113_v27 = vsel %vm1109_vm10, %v1093_v60, %v3461_v15  ;;  %v1153_v43 = vmul.u32 %v1151_v20, %v3415_v40  ;;  %v1154_v22 = vmul.u32 %v1150_v50, %v1127_v46  ;;  %v815_v29 = vpop.f32.mrf.mxu1 }
 0x168   :  { %v1019_v6 = vsel %vm1017_vm14, %v1018_v51, %v1014_v21  ;;  %v1114_v1 = vsel %vm1112_vm11, %v1102_v38, 2102212464  ;;  %v1131_v63 = vmul.u32 %v1129_v57, %v3415_v40  ;;  %v1132_v35 = vmul.u32 %v1128_v56, %v1127_v46 }
 0x169   :  { %v1020_v53 = vadd.s32 %v1019_v6, %v1015_v52  ;;  %v1152_v5 = vmul.u32 %v1150_v50, %v3415_v40  ;;  %v1155_v26 = vmul.u32 %v1151_v20, %v1127_v46  ;;  %v1156_v11 = vshll.u32 %v1153_v43, 16 }
 0x16a   :  { %v3535_v10 = vadd.f32 %v3436_v8, %v3362_v47  ;;  %v1130_v15 = vmul.u32 %v1128_v56, %v3415_v40  ;;  %v1133_v59 = vmul.u32 %v1129_v57, %v1127_v46  ;;  %v1134_v0 = vshll.u32 %v1131_v63, 16 }
 0x16b   :  { %v1021_v36 = vadd.s32 536870912, %v1020_v53  ;;  %v1136_v31 = vshll.u32 %v1132_v35, 16  ;;  %v1158_v3 = vshll.u32 %v1154_v22, 16  ;;  %vm1160_vm15 = vc.u32 %v1152_v5, %v1156_v11 }
 0x16c   :  { %v1162_v38 = vadd.s32 %v1156_v11, %v1152_v5  ;;  %vm1138_vm0 = vc.u32 %v1130_v15, %v1134_v0  ;;  %v1140_v25 = vadd.s32 %v1134_v0, %v1130_v15  ;;  %v1161_v12 = vsel %vm1160_vm15, 1, %v2921_v44 }
 0x16d   :  { %v1022_v21 = vshrl.u32 %v1021_v36, 30  ;;  %v1115_v47 = vsel %vm1111_vm12, %v3465_v13, %v1114_v1  ;;  %v1139_v8 = vsel %vm1138_vm0, 1, %v2921_v44  ;;  %v1163_v45 = vadd.s32 %v1161_v12, %v1155_v26 }
 0x16e   :  { %vm1164_vm1 = vc.u32 %v1162_v38, %v1158_v3  ;;  %v1135_v46 = vshrl.u32 %v1131_v63, 16  ;;  %v1141_v50 = vadd.s32 %v1139_v8, %v1133_v59  ;;  %vm1142_vm2 = vc.u32 %v1140_v25, %v1136_v31 }
 0x16f   :  { %v1023_v40 = vshll.u32 %v1022_v21, 30  ;;  %v1143_v51 = vsel %vm1142_vm2, 1, %v2921_v44  ;;  %v1165_v60 = vsel %vm1164_vm1, 1, %v2921_v44  ;;  %v3546_v18 = vadd.f32 %v897_v58, %v3535_v10 }
 0x170   :  { %v3549_v20 = vadd.f32 %v813_v34, %v3364_v41  ;;  %v1046_v13 = vsub.s32 4, %v1022_v21  ;;  %v1145_v56 = vadd.s32 %v1143_v51, %v1141_v50  ;;  %v1167_v57 = vadd.s32 %v1165_v60, %v1163_v45  ;;  %v2317_v50 = vld [vmem:[#allocation8] sm:$0xff] }
 0x171   :  { %v1024_v52 = vsub.s32 %v1020_v53, %v1023_v40  ;;  %vm924_vm3 = vcmp.lt.s32.totalorder %v3385_v7, 0  ;;  %v1157_v6 = vshrl.u32 %v1153_v43, 16  ;;  %v1235_v1 = vand.u32 2139095040, %v3546_v18 }
 0x172   :  { %v1137_v5 = vshrl.u32 %v1132_v35, 16  ;;  %v1146_v26 = vadd.s32 %v1145_v56, %v1135_v46  ;;  %v1116_v58 = vsel %vm1110_vm13, %v1113_v27, %v1115_v47  ;;  %v1159_v11 = vshrl.u32 %v1154_v22, 16 }
 0x173   :  { %vm1025_vm4 = vcmp.lt.s32.totalorder %v1024_v52, 0  ;;  %v1026_v63 = vsub.s32 0, %v1024_v52  ;;  %v1168_v36 = vadd.s32 %v1167_v57, %v1157_v6  ;;  %v1236_v41 = vshrl.u32 %v1235_v1, 23 }
 0x174   :  { %v1047_v53 = vsel %vm924_vm3, %v1046_v13, %v1022_v21  ;;  %v1147_v15 = vadd.s32 %v1146_v26, %v1137_v5  ;;  %v1166_v59 = vadd.s32 %v1162_v38, %v1158_v3  ;;  %v1232_v31 = vand.u32 2147483647, %v3546_v18 }
 0x175   :  { %v1027_v34 = vsel %vm1025_vm4, %v1026_v63, %v1024_v52  ;;  %v1169_v43 = vadd.s32 %v1168_v36, %v1159_v11  ;;  %v2672_v29 = vadd.s32 4294967169, %v1236_v41  ;;  %vm3560_vm5 = vcmp.le.f32.partialorder %v922_v17, 0.7853982 }
 0x176   :  { %v1028_v0 = vclz %v1027_v34  ;;  %vm1172_vm6 = vc.u32 %v1147_v15, %v1166_v59  ;;  %v1049_v21 = vsel %vm3560_vm5, 0, %v1047_v53  ;;  %v1170_v3 = vmul.u32 %v3400_v9, %v1116_v58 }
 0x177   :  { %v1173_v27 = vadd.s32 1, %v1169_v43  ;;  %v1242_v22 = vadd.s32 1, %v2672_v29  ;;  %v1239_v25 = vand.u32 8388607, %v1232_v31  ;;  %v1016_v8 = vadd.s32 %v3489_v28, %v3500_v4 }
 0x178   :  { %v2667_v42 = vadd.s32 4294967294, %v1028_v0  ;;  %v1066_v46 = vadd.s32 3, %v1049_v21  ;;  %vm2319_vm9 = vcmp.ne.f32.partialorder %v2317_v50, 0.0  ;;  %v1171_v58 = vadd.s32 %v1166_v59, %v1147_v15 }
 0x179   :  { %v1174_v38 = vsel %vm1172_vm6, %v1173_v27, %v1169_v43  ;;  %vm1243_vm8 = vcmp.gt.s32.totalorder %v1242_v22, 0  ;;  %v1240_v57 = vor.u32 8388608, %v1239_v25  ;;  %v3582_v41 = vsel %vm2319_vm9, 1, %v2921_v44 }
 0x17a   :  { %vm2668_vm7 = vcmp.lt.s32.totalorder %v2667_v42, 0  ;;  %v1175_v17 = vadd.s32 %v1174_v38, %v1170_v3  ;;  %v1244_v47 = vsel %vm1243_vm8, %v1242_v22, 0  ;;  %v3573_v26 = vand.u32 3, %v1066_v46 }
 0x17b   :  { %v1031_v12 = vsel %vm2668_vm7, 0, %v2667_v42  ;;  %v1246_v60 = vand.u32 31, %v1244_v47  ;;  %v3576_v11 = vshrl.u32 %v1244_v47, 5  ;;  %v3578_v36 = vshll.u32 %v1240_v57, 8 }
 0x17c   :  { %v1032_v45 = vsub.s32 32, %v1031_v12  ;;  %v1036_v40 = vsub.s32 4294967266, %v1031_v12  ;;  %v1176_v51 = vadd.s32 536870912, %v1175_v17  ;;  %v1033_v13 = vshll.u32 %v1024_v52, %v1031_v12 }
 0x17d   :  { %v1247_v1 = vsub.s32 32, %v1246_v60  ;;  %v898_v52 = vperm.slane %v3376_v62, 3  ;;  %v1249_v59 = vshll.u32 %v2915_v61, %v1246_v60  ;;  %v1252_v27 = vshll.u32 %v2916_v19, %v1246_v60 }
 0x17e   :  { %v1034_v9 = vshrl.u32 %v1016_v8, %v1032_v45  ;;  %v1037_v56 = vadd.s32 127, %v1036_v40  ;;  %v3571_v6 = vshrl.u32 %v1176_v51, 30  ;;  %v1255_v22 = vshll.u32 %v2917_v54, %v1246_v60 }
 0x17f   :  { %v1250_v53 = vshrl.u32 %v2916_v19, %v1247_v1  ;;  %v1253_v0 = vshrl.u32 %v2917_v54, %v1247_v1  ;;  %v1256_v29 = vshrl.u32 %v2918_v37, %v1247_v1  ;;  %v1258_v3 = vshll.u32 %v2918_v37, %v1246_v60 }
 0x180   :  { %v1035_v63 = vor.u32 %v1034_v9, %v1033_v13  ;;  %v1038_v5 = vshll.u32 %v1037_v56, 23  ;;  %v1178_v28 = vshll.u32 %v3571_v6, 30  ;;  %v1259_v38 = vshrl.u32 %v2919_v30, %v1247_v1 }
 0x181   :  { %v1262_v25 = vshrl.u32 %v2920_v14, %v1247_v1  ;;  %v3598_v47 = vor.u32 %v1253_v0, %v1252_v27  ;;  %v1261_v8 = vshll.u32 %v2919_v30, %v1246_v60  ;;  %vm1079_vm11 = vcmp.lt.s32.totalorder %v3388_v16, 0 }
 0x182   :  { %v1039_v4 = vor.u32 4788187, %v1038_v5  ;;  %v3584_v34 = vsub.s32 %v1175_v17, %v1178_v28  ;;  %v1042_v15 = vcvt.s32.f32 %v1035_v63  ;;  %v1251_v17 = vor.u32 %v1250_v53, %v1249_v59 }
 0x183   :  { %v1257_v46 = vor.u32 %v1256_v29, %v1255_v22  ;;  %v1260_v50 = vor.u32 %v1259_v38, %v1258_v3  ;;  %v1263_v51 = vor.u32 %v1262_v25, %v1261_v8  ;;  %vm1264_vm12 = vcmp.lt.s32.totalorder %v3576_v11, 1  ;;  %v3636_v22 = vpop.f32.mrf.mxu2 }
 0x184   :  { %v1040_v43 = vand.u32 2147483647, %v1039_v4  ;;  %vm1180_vm10 = vcmp.lt.s32.totalorder %v3584_v34, 0  ;;  %v1181_v42 = vsub.s32 0, %v3584_v34  ;;  %v3604_v13 = vand.u32 65535, %v3578_v36 }
 0x185   :  { %v3607_v9 = vshrl.u32 %v3578_v36, 16  ;;  %v2323_v60 = vperm.slane %v3582_v41, 0  ;;  %vm1267_vm13 = vcmp.lt.s32.totalorder %v3576_v11, 4  ;;  %v1201_v5 = vsub.s32 4, %v3571_v6 }
 0x186   :  { %v1043_v21 = vmul.f32 %v1042_v15, %v1040_v43  ;;  %v1182_v12 = vsel %vm1180_vm10, %v1181_v42, %v3584_v34  ;;  %vm1266_vm14 = vcmp.lt.s32.totalorder %v3576_v11, 3  ;;  %v1273_v28 = vsel %vm1267_vm13, %v1260_v50, 920167782 }
 0x187   :  { %v1183_v40 = vclz %v1182_v12  ;;  %v1272_v53 = vsel %vm1264_vm12, %v1251_v17, %v3598_v47  ;;  %v1274_v35 = vsel %vm1266_vm14, %v1257_v46, %v1273_v28  ;;  %v1248_v43 = vshrl.u32 %v2915_v61, %v1247_v1 }
 0x188   :  { %v1044_v45 = vxor.u32 2147483648, %v1043_v21  ;;  %v1276_v15 = vsel %vm1264_vm12, %v3598_v47, %v1257_v46  ;;  %v1277_v59 = vsel %vm1267_vm13, %v1263_v51, 1326507024  ;;  %vm1265_vm0 = vcmp.lt.s32.totalorder %v3576_v11, 2 }
 0x189   :  { %v2670_v57 = vadd.s32 4294967294, %v1183_v40  ;;  %v1275_v1 = vsel %vm1265_vm0, %v1272_v53, %v1274_v35  ;;  %v1278_v38 = vsel %vm1266_vm14, %v1260_v50, %v1277_v59  ;;  %v3648_v51 = vsel %vm1079_vm11, %v1201_v5, %v3571_v6 }
 0x18a   :  { %v1045_v56 = vsel %vm924_vm3, %v1044_v45, %v1043_v21  ;;  %v1279_v45 = vsel %vm1265_vm0, %v1276_v15, %v1278_v38  ;;  %v1269_v50 = vsel %vm1267_vm13, %v1257_v46, 2102212464  ;;  %v1306_v15 = vshrl.u32 %v1275_v1, 16 }
 0x18b   :  { %v3616_v63 = vsel %vm3560_vm5, %v3385_v7, %v1045_v56  ;;  %vm2671_vm15 = vcmp.lt.s32.totalorder %v2670_v57, 0  ;;  %v1284_v56 = vshrl.u32 %v1279_v45, 16  ;;  %vm1072_vm1 = vcmp.eq.s32.totalorder %v3573_v26, 2 }
 0x18c   :  { %v1050_v4 = vmul.f32 %v3616_v63, %v3616_v63  ;;  %v1186_v0 = vsel %vm2671_vm15, 0, %v2670_v57  ;;  %v3659_v6 = vsel %vm1264_vm12, %v1248_v43, %v1251_v17  ;;  %v1305_v5 = vand.u32 65535, %v1275_v1  ;;  %v828_v1 = vpop.f32.mrf.mxu2 }
 0x18d   :  { %v1187_v27 = vsub.s32 32, %v1186_v0  ;;  %v1188_v21 = vshll.u32 %v3584_v34, %v1186_v0  ;;  %v1191_v3 = vsub.s32 4294967266, %v1186_v0  ;;  %v1283_v34 = vand.u32 65535, %v1279_v45 }
 0x18e   :  { %v1051_v29 = vmul.f32 -0.001358992, %v1050_v4  ;;  %v1058_v42 = vmul.f32 -0.00019511016, %v1050_v4  ;;  %vm1069_vm2 = vcmp.eq.s32.totalorder %v3573_v26, 0  ;;  %vm1068_vm4 = vcmp.lt.s32.totalorder %v3573_v26, 2 }
 0x18f   :  { %v1189_v8 = vshrl.u32 %v1171_v58, %v1187_v27  ;;  %v1192_v40 = vadd.s32 127, %v1191_v3  ;;  %v1286_v58 = vmul.u32 %v1284_v56, %v3604_v13  ;;  %v3654_v0 = vmul.u32 %v1283_v34, %v3607_v9 }
 0x190   :  { %v1052_v25 = vadd.f32 0.041655596, %v1051_v29  ;;  %v1059_v12 = vadd.f32 0.008332121, %v1058_v42  ;;  %vm3664_vm3 = vcmp.le.f32.partialorder %v1077_v33, 0.7853982  ;;  %v1288_v43 = vmul.u32 %v1284_v56, %v3607_v9 }
 0x191   :  { %v1190_v53 = vor.u32 %v1189_v8, %v1188_v21  ;;  %v1193_v35 = vshll.u32 %v1192_v40, 23  ;;  %v1285_v21 = vmul.u32 %v1283_v34, %v3604_v13  ;;  %v1289_v3 = vshll.u32 %v1286_v58, 16 }
 0x192   :  { %v1053_v57 = vmul.f32 %v1052_v25, %v1050_v4  ;;  %v1060_v28 = vmul.f32 %v1059_v12, %v1050_v4  ;;  %vm3670_vm5 = vcmp.eq.s32.totalorder %v2323_v60, 1  ;;  %v1291_v33 = vshll.u32 %v3654_v0, 16 }
 0x193   :  { %v1194_v42 = vor.u32 4788187, %v1193_v35  ;;  %v1197_v27 = vcvt.s32.f32 %v1190_v53  ;;  %vm1065_vm6 = vweird.f32 %v3385_v7  ;;  %vm1293_vm7 = vc.u32 %v1285_v21, %v1289_v3 }
 0x194   :  { %v1054_v59 = vadd.f32 -0.4999988, %v1053_v57  ;;  %v1061_v29 = vadd.f32 -0.16666654, %v1060_v28  ;;  %v1295_v8 = vadd.s32 %v1289_v3, %v1285_v21  ;;  %v1308_v45 = vmul.u32 %v1306_v15, %v3604_v13 }
 0x195   :  { %v1195_v12 = vand.u32 2147483647, %v1194_v42  ;;  %v1294_v34 = vsel %vm1293_vm7, 1, %v2921_v44  ;;  %v1309_v60 = vmul.u32 %v1305_v5, %v3607_v9  ;;  %v1307_v56 = vmul.u32 %v1305_v5, %v3604_v13 }
 0x196   :  { %v1055_v38 = vmul.f32 %v1054_v59, %v1050_v4  ;;  %v1062_v25 = vmul.f32 %v1061_v29, %v1050_v4  ;;  %v1296_v28 = vadd.s32 %v1294_v34, %v1288_v43  ;;  %vm1297_vm8 = vc.u32 %v1295_v8, %v1291_v33 }
 0x197   :  { %v1198_v57 = vmul.f32 %v1197_v27, %v1195_v12  ;;  %v1298_v59 = vsel %vm1297_vm8, 1, %v2921_v44  ;;  %v1311_v29 = vshll.u32 %v1308_v45, 16  ;;  %v1270_v21 = vsel %vm1266_vm14, %v3598_v47, %v1269_v50 }
 0x198   :  { %v1056_v40 = vadd.f32 1.0, %v1055_v38  ;;  %v1063_v4 = vadd.f32 1.0, %v1062_v25  ;;  %v1290_v3 = vshrl.u32 %v1286_v58, 16  ;;  %v1300_v38 = vadd.s32 %v1298_v59, %v1296_v28 }
 0x199   :  { %v1199_v42 = vxor.u32 2147483648, %v1198_v57  ;;  %v1310_v27 = vmul.u32 %v1306_v15, %v3607_v9  ;;  %v1313_v43 = vshll.u32 %v1309_v60, 16  ;;  %vm1315_vm9 = vc.u32 %v1307_v56, %v1311_v29 }
 0x19a   :  { %v1064_v53 = vmul.f32 %v1063_v4, %v3616_v63  ;;  %v1073_v35 = vxor.u32 2147483648, %v1056_v40  ;;  %v1316_v5 = vsel %vm1315_vm9, 1, %v2921_v44  ;;  %v1317_v33 = vadd.s32 %v1311_v29, %v1307_v56 }
 0x19b   :  { %v1200_v63 = vsel %vm1079_vm11, %v1199_v42, %v1198_v57  ;;  %v1301_v50 = vadd.s32 %v1300_v38, %v1290_v3  ;;  %v1318_v9 = vadd.s32 %v1316_v5, %v1310_v27  ;;  %v1292_v12 = vshrl.u32 %v3654_v0, 16 }
 0x19c   :  { %v1070_v25 = vxor.u32 2147483648, %v1064_v53  ;;  %v1074_v13 = vsel %vm1072_vm1, %v1073_v35, %v1064_v53  ;;  %v1203_v47 = vsel %vm3664_vm3, %v3388_v16, %v1200_v63  ;;  %vm1319_vm10 = vc.u32 %v1317_v33, %v1313_v43 }
 0x19d   :  { %v1205_v15 = vmul.f32 %v1203_v47, %v1203_v47  ;;  %v1312_v4 = vshrl.u32 %v1308_v45, 16  ;;  %v1320_v34 = vsel %vm1319_vm10, 1, %v2921_v44  ;;  %v1204_v7 = vsel %vm3664_vm3, 0, %v3648_v51 }
 0x19e   :  { %v1071_v1 = vsel %vm1069_vm2, %v1056_v40, %v1070_v25  ;;  %v3706_v40 = vadd.f32 %v898_v52, %v3549_v20  ;;  %v1322_v56 = vadd.s32 %v1320_v34, %v1318_v9  ;;  %v3714_v0 = vadd.s32 %v1301_v50, %v1292_v12 }
 0x19f   :  { %v1075_v58 = vsel %vm1068_vm4, %v1071_v1, %v1074_v13  ;;  %v1206_v57 = vmul.f32 -0.001358992, %v1205_v15  ;;  %v1213_v28 = vmul.f32 -0.00019511016, %v1205_v15  ;;  %v1314_v45 = vshrl.u32 %v1309_v60, 16 }
 0x1a0   :  { %v1076_v8 = vsel %vm1065_vm6, nan, %v1075_v58  ;;  %v1323_v59 = vadd.s32 %v1322_v56, %v1312_v4  ;;  %v1390_v52 = vand.u32 2139095040, %v3706_v40  ;;  %v3720_v17 = vadd.s32 %v1317_v33, %v1313_v43 }
 0x1a1   :  { %v2341_v26 = vsel %vm3670_vm5, %v3380_v24, %v1076_v8  ;;  %v1207_v53 = vadd.f32 0.041655596, %v1206_v57  ;;  %v1214_v35 = vadd.f32 0.008332121, %v1213_v28  ;;  %v1271_v24 = vsel %vm1265_vm0, %v3659_v6, %v1270_v21 }
 0x1a2   :  { %2350 = vst [vmem:[#allocation10] sm:$0xff] %v2341_v26  ;;  %v1387_v29 = vand.u32 2147483647, %v3706_v40  ;;  %v1324_v46 = vadd.s32 %v1323_v59, %v1314_v45  ;;  %v1391_v51 = vshrl.u32 %v1390_v52, 23  ;;  %v1221_v38 = vadd.s32 3, %v1204_v7  ;;  %v3747_v52 = vpop.f32.mrf.mxu3 }
 0x1a3   :  { %v1208_v42 = vmul.f32 %v1207_v53, %v1205_v15  ;;  %v1215_v3 = vmul.f32 %v1214_v35, %v1205_v15  ;;  %vm1327_vm11 = vc.u32 %v3714_v0, %v3720_v17  ;;  %v1325_v63 = vmul.u32 %v3578_v36, %v1271_v24 }
 0x1a4   :  { %v1328_v27 = vadd.s32 1, %v1324_v46  ;;  %v2675_v13 = vadd.s32 4294967169, %v1391_v51  ;;  %v1394_v11 = vand.u32 8388607, %v1387_v29  ;;  %v1222_v33 = vand.u32 3, %v1221_v38 }
 0x1a5   :  { %v1209_v60 = vadd.f32 -0.4999988, %v1208_v42  ;;  %v1216_v25 = vadd.f32 -0.16666654, %v1215_v3  ;;  %v2324_v1 = vperm.slane %v3582_v41, 1  ;;  %v3731_v12 = vadd.f32 %v3636_v22, %v3366_v2 }
 0x1a6   :  { %v1329_v43 = vsel %vm1327_vm11, %v1328_v27, %v1324_v46  ;;  %v1397_v5 = vadd.s32 1, %v2675_v13  ;;  %v1395_v36 = vor.u32 8388608, %v1394_v11  ;;  %v899_v34 = vperm.slane %v3376_v62, 4 }
 0x1a7   :  { %v1210_v6 = vmul.f32 %v1209_v60, %v1205_v15  ;;  %v1217_v21 = vmul.f32 %v1216_v25, %v1205_v15  ;;  %v1330_v50 = vadd.s32 %v1329_v43, %v1325_v63  ;;  %vm1220_vm13 = vweird.f32 %v3388_v16 }
 0x1a8   :  { %vm1398_vm12 = vcmp.gt.s32.totalorder %v1397_v5, 0  ;;  %vm1223_vm14 = vcmp.lt.s32.totalorder %v1222_v33, 2  ;;  %vm1224_vm15 = vcmp.eq.s32.totalorder %v1222_v33, 0  ;;  %vm1227_vm0 = vcmp.eq.s32.totalorder %v1222_v33, 2 }
 0x1a9   :  { %v1211_v9 = vadd.f32 1.0, %v1210_v6  ;;  %v1218_v58 = vadd.f32 1.0, %v1217_v21  ;;  %v1331_v8 = vadd.s32 536870912, %v1330_v50  ;;  %v1399_v4 = vsel %vm1398_vm12, %v1397_v5, 0 }
 0x1aa   :  { %v1401_v57 = vand.u32 31, %v1399_v4  ;;  %vm3735_vm1 = vcmp.eq.s32.totalorder %v2324_v1, 1  ;;  %vm1234_vm2 = vcmp.lt.s32.totalorder %v3546_v18, 0  ;;  %v3740_v22 = vshll.u32 %v1395_v36, 8 }
 0x1ab   :  { %v1219_v26 = vmul.f32 %v1218_v58, %v1203_v47  ;;  %v1228_v15 = vxor.u32 2147483648, %v1211_v9  ;;  %v1332_v28 = vshrl.u32 %v1331_v8, 30  ;;  %v3743_v62 = vadd.f32 %v899_v34, %v3731_v12 }
 0x1ac   :  { %v1402_v7 = vsub.s32 32, %v1401_v57  ;;  %v3752_v3 = vshrl.u32 %v1399_v4, 5  ;;  %v1404_v60 = vshll.u32 %v2915_v61, %v1401_v57  ;;  %v1407_v25 = vshll.u32 %v2916_v19, %v1401_v57 }
 0x1ad   :  { %v1225_v56 = vxor.u32 2147483648, %v1219_v26  ;;  %v1333_v2 = vshll.u32 %v1332_v28, 30  ;;  %v1229_v53 = vsel %vm1227_vm0, %v1228_v15, %v1219_v26  ;;  %v1356_v38 = vsub.s32 4, %v1332_v28 }
 0x1ae   :  { %v1405_v35 = vshrl.u32 %v2916_v19, %v1402_v7  ;;  %v1408_v59 = vshrl.u32 %v2917_v54, %v1402_v7  ;;  %v1411_v46 = vshrl.u32 %v2918_v37, %v1402_v7  ;;  %vm3764_vm3 = vcmp.le.f32.partialorder %v1232_v31, 0.7853982 }
 0x1af   :  { %v1226_v47 = vsel %vm1224_vm15, %v1211_v9, %v1225_v56  ;;  %v3750_v42 = vsub.s32 %v1330_v50, %v1333_v2  ;;  %v1410_v63 = vshll.u32 %v2917_v54, %v1401_v57  ;;  %v1413_v21 = vshll.u32 %v2918_v37, %v1401_v57 }
 0x1b0   :  { %v1230_v24 = vsel %vm1223_vm14, %v1226_v47, %v1229_v53  ;;  %v1406_v11 = vor.u32 %v1405_v35, %v1404_v60  ;;  %v1409_v6 = vor.u32 %v1408_v59, %v1407_v25  ;;  %v1414_v43 = vshrl.u32 %v2919_v30, %v1402_v7 }
 0x1b1   :  { %v1231_v51 = vsel %vm1220_vm13, nan, %v1230_v24  ;;  %vm1335_vm4 = vcmp.lt.s32.totalorder %v3750_v42, 0  ;;  %v1336_v16 = vsub.s32 0, %v3750_v42  ;;  %v1412_v5 = vor.u32 %v1411_v46, %v1410_v63 }
 0x1b2   :  { %v2342_v27 = vsel %vm3735_vm1, %v3382_v39, %v1231_v51  ;;  %v1416_v31 = vshll.u32 %v2919_v30, %v1401_v57  ;;  %v1417_v33 = vshrl.u32 %v2920_v14, %v1402_v7  ;;  %v1326_v1 = vadd.s32 %v3720_v17, %v3714_v0  ;;  %v841_v17 = vpop.f32.mrf.mxu3 }
 0x1b3   :  { %2351 = vst [vmem:[#allocation10 + $0x8] sm:$0xff] %v2342_v27  ;;  %v1337_v39 = vsel %vm1335_vm4, %v1336_v16, %v3750_v42  ;;  %v1415_v9 = vor.u32 %v1414_v43, %v1413_v21  ;;  %v1436_v58 = vand.u32 65535, %v3740_v22  ;;  %vm1419_vm5 = vcmp.lt.s32.totalorder %v3752_v3, 1 }
 0x1b4   :  { %v1338_v50 = vclz %v1337_v39  ;;  %v1418_v8 = vor.u32 %v1417_v33, %v1416_v31  ;;  %v1437_v36 = vshrl.u32 %v3740_v22, 16  ;;  %v1545_v4 = vand.u32 2139095040, %v3743_v62 }
 0x1b5   :  { %v1357_v26 = vsel %vm1234_vm2, %v1356_v38, %v1332_v28  ;;  %vm1422_vm6 = vcmp.lt.s32.totalorder %v3752_v3, 4  ;;  %v1427_v0 = vsel %vm1419_vm5, %v1406_v11, %v1409_v6  ;;  %vm1421_vm7 = vcmp.lt.s32.totalorder %v3752_v3, 3 }
 0x1b6   :  { %v2673_v34 = vadd.s32 4294967294, %v1338_v50  ;;  %v1428_v15 = vsel %vm1422_vm6, %v1415_v9, 920167782  ;;  %v1431_v57 = vsel %vm1419_vm5, %v1409_v6, %v1412_v5  ;;  %v1432_v56 = vsel %vm1422_vm6, %v1418_v8, 1326507024 }
 0x1b7   :  { %vm1420_vm9 = vcmp.lt.s32.totalorder %v3752_v3, 2  ;;  %v1429_v28 = vsel %vm1421_vm7, %v1412_v5, %v1428_v15  ;;  %v1433_v45 = vsel %vm1421_vm7, %v1415_v9, %v1432_v56  ;;  %v1403_v47 = vshrl.u32 %v2915_v61, %v1402_v7 }
 0x1b8   :  { %vm2674_vm8 = vcmp.lt.s32.totalorder %v2673_v34, 0  ;;  %v1430_v53 = vsel %vm1420_vm9, %v1427_v0, %v1429_v28  ;;  %v1434_v35 = vsel %vm1420_vm9, %v1431_v57, %v1433_v45  ;;  %v1359_v46 = vsel %vm3764_vm3, 0, %v1357_v26 }
 0x1b9   :  { %v1341_v2 = vsel %vm2674_vm8, 0, %v2673_v34  ;;  %v1438_v51 = vand.u32 65535, %v1434_v35  ;;  %v1424_v38 = vsel %vm1422_vm6, %v1412_v5, 2102212464  ;;  %v1439_v60 = vshrl.u32 %v1434_v35, 16 }
 0x1ba   :  { %v1342_v59 = vsub.s32 32, %v1341_v2  ;;  %v1346_v24 = vsub.s32 4294967266, %v1341_v2  ;;  %v1460_v25 = vand.u32 65535, %v1430_v53  ;;  %v1461_v27 = vshrl.u32 %v1430_v53, 16 }
 0x1bb   :  { %v1343_v7 = vshll.u32 %v3750_v42, %v1341_v2  ;;  %v1442_v21 = vmul.u32 %v1438_v51, %v1437_v36  ;;  %v1441_v43 = vmul.u32 %v1439_v60, %v1436_v58  ;;  %v1542_v31 = vand.u32 2147483647, %v3743_v62 }
 0x1bc   :  { %v1344_v16 = vshrl.u32 %v1326_v1, %v1342_v59  ;;  %v1347_v63 = vadd.s32 127, %v1346_v24  ;;  %v1463_v39 = vmul.u32 %v1461_v27, %v1436_v58  ;;  %v1546_v33 = vshrl.u32 %v1545_v4, 23 }
 0x1bd   :  { %v1376_v8 = vadd.s32 3, %v1359_v46  ;;  %v1423_v34 = vsel %vm1419_vm5, %v1403_v47, %v1406_v11  ;;  %v1425_v5 = vsel %vm1421_vm7, %v1409_v6, %v1424_v38  ;;  %v1440_v26 = vmul.u32 %v1438_v51, %v1436_v58 }
 0x1be   :  { %v1345_v50 = vor.u32 %v1344_v16, %v1343_v7  ;;  %v1348_v9 = vshll.u32 %v1347_v63, 23  ;;  %v1444_v0 = vshll.u32 %v1441_v43, 16  ;;  %v1464_v42 = vmul.u32 %v1460_v25, %v1437_v36 }
 0x1bf   :  { %v1443_v17 = vmul.u32 %v1439_v60, %v1437_v36  ;;  %v1446_v15 = vshll.u32 %v1442_v21, 16  ;;  %v1462_v57 = vmul.u32 %v1460_v25, %v1436_v58  ;;  %v1466_v4 = vshll.u32 %v1463_v39, 16 }
 0x1c0   :  { %v1349_v1 = vor.u32 4788187, %v1348_v9  ;;  %v1352_v56 = vcvt.s32.f32 %v1345_v50  ;;  %vm1448_vm10 = vc.u32 %v1440_v26, %v1444_v0  ;;  %v1450_v28 = vadd.s32 %v1444_v0, %v1440_v26 }
 0x1c1   :  { %v1449_v2 = vsel %vm1448_vm10, 1, %v2921_v44  ;;  %v1465_v53 = vmul.u32 %v1461_v27, %v1437_v36  ;;  %v1468_v35 = vshll.u32 %v1464_v42, 16  ;;  %vm1470_vm12 = vc.u32 %v1462_v57, %v1466_v4 }
 0x1c2   :  { %v1350_v45 = vand.u32 2147483647, %v1349_v1  ;;  %v1451_v11 = vadd.s32 %v1449_v2, %v1443_v17  ;;  %vm1452_vm11 = vc.u32 %v1450_v28, %v1446_v15  ;;  %v1472_v6 = vadd.s32 %v1466_v4, %v1462_v57 }
 0x1c3   :  { %v1453_v59 = vsel %vm1452_vm11, 1, %v2921_v44  ;;  %v1471_v24 = vsel %vm1470_vm12, 1, %v2921_v44  ;;  %v2678_v46 = vadd.s32 4294967169, %v1546_v33  ;;  %v1445_v58 = vshrl.u32 %v1441_v43, 16 }
 0x1c4   :  { %v1353_v47 = vmul.f32 %v1352_v56, %v1350_v45  ;;  %v1455_v51 = vadd.s32 %v1453_v59, %v1451_v11  ;;  %v1473_v38 = vadd.s32 %v1471_v24, %v1465_v53  ;;  %vm1474_vm13 = vc.u32 %v1472_v6, %v1468_v35 }
 0x1c5   :  { %v1447_v25 = vshrl.u32 %v1442_v21, 16  ;;  %v1475_v7 = vsel %vm1474_vm13, 1, %v2921_v44  ;;  %v1552_v36 = vadd.s32 1, %v2678_v46  ;;  %v1467_v16 = vshrl.u32 %v1463_v39, 16 }
 0x1c6   :  { %v1354_v60 = vxor.u32 2147483648, %v1353_v47  ;;  %v1456_v27 = vadd.s32 %v1455_v51, %v1445_v58  ;;  %v1477_v63 = vadd.s32 %v1475_v7, %v1473_v38  ;;  %v3820_v50 = vadd.f32 %v3747_v52, %v3368_v55 }
 0x1c7   :  { %v1469_v33 = vshrl.u32 %v1464_v42, 16  ;;  %v1549_v43 = vand.u32 8388607, %v1542_v31  ;;  %vm1553_vm14 = vcmp.gt.s32.totalorder %v1552_v36, 0  ;;  %v1426_v55 = vsel %vm1420_vm9, %v1423_v34, %v1425_v5 }
 0x1c8   :  { %v1355_v9 = vsel %vm1234_vm2, %v1354_v60, %v1353_v47  ;;  %v3829_v26 = vadd.s32 %v1456_v27, %v1447_v25  ;;  %v1478_v39 = vadd.s32 %v1477_v63, %v1467_v16  ;;  %v1554_v0 = vsel %vm1553_vm14, %v1552_v36, 0 }
 0x1c9   :  { %v1358_v21 = vsel %vm3764_vm3, %v3546_v18, %v1355_v9  ;;  %v3833_v52 = vadd.s32 %v1472_v6, %v1468_v35  ;;  %v1556_v17 = vand.u32 31, %v1554_v0  ;;  %v3835_v42 = vand.u32 3, %v1376_v8 }
 0x1ca   :  { %v1360_v1 = vmul.f32 %v1358_v21, %v1358_v21  ;;  %v1479_v15 = vadd.s32 %v1478_v39, %v1469_v33  ;;  %v1480_v28 = vmul.u32 %v3740_v22, %v1426_v55  ;;  %v1550_v45 = vor.u32 8388608, %v1549_v43 }
 0x1cb   :  { %vm1482_vm15 = vc.u32 %v3829_v26, %v3833_v52  ;;  %v3839_v13 = vsub.s32 32, %v1556_v17  ;;  %v3842_v2 = vshrl.u32 %v1554_v0, 5  ;;  %v1568_v5 = vshll.u32 %v2918_v37, %v1556_v17 }
 0x1cc   :  { %v1361_v57 = vmul.f32 -0.001358992, %v1360_v1  ;;  %v1368_v56 = vmul.f32 -0.00019511016, %v1360_v1  ;;  %v1483_v4 = vadd.s32 1, %v1479_v15  ;;  %v1559_v24 = vshll.u32 %v2915_v61, %v1556_v17 }
 0x1cd   :  { %v1560_v8 = vshrl.u32 %v2916_v19, %v3839_v13  ;;  %v1563_v35 = vshrl.u32 %v2917_v54, %v3839_v13  ;;  %v1566_v11 = vshrl.u32 %v2918_v37, %v3839_v13  ;;  %v1569_v22 = vshrl.u32 %v2919_v30, %v3839_v13 }
 0x1ce   :  { %v1362_v3 = vadd.f32 0.041655596, %v1361_v57  ;;  %v1369_v34 = vadd.f32 0.008332121, %v1368_v56  ;;  %v1484_v53 = vsel %vm1482_vm15, %v1483_v4, %v1479_v15  ;;  %v1562_v46 = vshll.u32 %v2916_v19, %v1556_v17 }
 0x1cf   :  { %v1485_v59 = vadd.s32 %v1484_v53, %v1480_v28  ;;  %v1565_v58 = vshll.u32 %v2917_v54, %v1556_v17  ;;  %v1570_v51 = vor.u32 %v1569_v22, %v1568_v5  ;;  %v1571_v38 = vshll.u32 %v2919_v30, %v1556_v17 }
 0x1d0   :  { %v1363_v6 = vmul.f32 %v1362_v3, %v1360_v1  ;;  %v1370_v47 = vmul.f32 %v1369_v34, %v1360_v1  ;;  %v1572_v36 = vshrl.u32 %v2920_v14, %v3839_v13  ;;  %v3859_v27 = vor.u32 %v1560_v8, %v1559_v24 }
 0x1d1   :  { %v1486_v7 = vadd.s32 536870912, %v1485_v59  ;;  %v3861_v16 = vor.u32 %v1563_v35, %v1562_v46  ;;  %v3863_v63 = vor.u32 %v1566_v11, %v1565_v58  ;;  %vm1577_vm0 = vcmp.lt.s32.totalorder %v3842_v2, 4 }
 0x1d2   :  { %v1364_v60 = vadd.f32 -0.4999988, %v1363_v6  ;;  %v1371_v25 = vadd.f32 -0.16666654, %v1370_v47  ;;  %vm1378_vm1 = vcmp.lt.s32.totalorder %v3835_v42, 2  ;;  %v1573_v39 = vor.u32 %v1572_v36, %v1571_v38 }
 0x1d3   :  { %v3867_v43 = vshrl.u32 %v1486_v7, 30  ;;  %vm1379_vm2 = vcmp.eq.s32.totalorder %v3835_v42, 0  ;;  %v2325_v0 = vperm.slane %v3582_v41, 2  ;;  %vm1574_vm3 = vcmp.lt.s32.totalorder %v3842_v2, 1 }
 0x1d4   :  { %v1365_v9 = vmul.f32 %v1364_v60, %v1360_v1  ;;  %v1372_v33 = vmul.f32 %v1371_v25, %v1360_v1  ;;  %v1583_v55 = vsel %vm1577_vm0, %v1570_v51, 920167782  ;;  %vm1576_vm4 = vcmp.lt.s32.totalorder %v3842_v2, 3 }
 0x1d5   :  { %v1488_v57 = vshll.u32 %v3867_v43, 30  ;;  %v1582_v1 = vsel %vm1574_vm3, %v3859_v27, %v3861_v16  ;;  %v1584_v56 = vsel %vm1576_vm4, %v3863_v63, %v1583_v55  ;;  %v1587_v28 = vsel %vm1577_vm0, %v1573_v39, 1326507024 }
 0x1d6   :  { %v1366_v17 = vadd.f32 1.0, %v1365_v9  ;;  %v1373_v15 = vadd.f32 1.0, %v1372_v33  ;;  %v3885_v4 = vshll.u32 %v1550_v45, 8  ;;  %v1586_v5 = vsel %vm1574_vm3, %v3861_v16, %v3863_v63 }
 0x1d7   :  { %v1489_v8 = vsub.s32 %v1485_v59, %v1488_v57  ;;  %vm1382_vm5 = vcmp.eq.s32.totalorder %v3835_v42, 2  ;;  %vm3892_vm6 = vcmp.eq.s32.totalorder %v2325_v0, 1  ;;  %vm1575_vm7 = vcmp.lt.s32.totalorder %v3842_v2, 2 }
 0x1d8   :  { %v1374_v3 = vmul.f32 %v1373_v15, %v1358_v21  ;;  %v1383_v34 = vxor.u32 2147483648, %v1366_v17  ;;  %v1588_v45 = vsel %vm1576_vm4, %v1570_v51, %v1587_v28  ;;  %v1585_v11 = vsel %vm1575_vm7, %v1582_v1, %v1584_v56  ;;  %v3913_v15 = vld [vmem:[#allocation7] sm:$0xff] }
 0x1d9   :  { %vm1490_vm8 = vcmp.lt.s32.totalorder %v1489_v8, 0  ;;  %v1491_v21 = vsub.s32 0, %v1489_v8  ;;  %v1589_v6 = vsel %vm1575_vm7, %v1586_v5, %v1588_v45  ;;  %v1591_v47 = vand.u32 65535, %v3885_v4 }
 0x1da   :  { %v1380_v35 = vxor.u32 2147483648, %v1374_v3  ;;  %v1384_v22 = vsel %vm1382_vm5, %v1383_v34, %v1374_v3  ;;  %v1592_v59 = vshrl.u32 %v3885_v4, 16  ;;  %v1593_v58 = vand.u32 65535, %v1589_v6 }
 0x1db   :  { %v1492_v46 = vsel %vm1490_vm8, %v1491_v21, %v1489_v8  ;;  %v1594_v51 = vshrl.u32 %v1589_v6, 16  ;;  %vm1375_vm9 = vweird.f32 %v3546_v18  ;;  %v1616_v25 = vshrl.u32 %v1585_v11, 16 }
 0x1dc   :  { %v1381_v24 = vsel %vm1379_vm2, %v1366_v17, %v1380_v35  ;;  %v1493_v60 = vclz %v1492_v46  ;;  %v1597_v9 = vmul.u32 %v1593_v58, %v1592_v59  ;;  %v1615_v0 = vand.u32 65535, %v1585_v11 }
 0x1dd   :  { %v1385_v38 = vsel %vm1378_vm1, %v1381_v24, %v1384_v22  ;;  %v1596_v36 = vmul.u32 %v1594_v51, %v1591_v47  ;;  %v1595_v55 = vmul.u32 %v1593_v58, %v1591_v47  ;;  %v900_v18 = vperm.slane %v3913_v15, 5 }
 0x1de   :  { %v1386_v7 = vsel %vm1375_vm9, nan, %v1385_v38  ;;  %v2676_v39 = vadd.s32 4294967294, %v1493_v60  ;;  %v1481_v42 = vadd.s32 %v3833_v52, %v3829_v26  ;;  %v1598_v57 = vmul.u32 %v1594_v51, %v1592_v59 }
 0x1df   :  { %v2343_v33 = vsel %vm3892_vm6, %v3535_v10, %v1386_v7  ;;  %v1599_v17 = vshll.u32 %v1596_v36, 16  ;;  %v1618_v1 = vmul.u32 %v1616_v25, %v1591_v47  ;;  %v1601_v28 = vshll.u32 %v1597_v9, 16 }
 0x1e0   :  { %2352 = vst [vmem:[#allocation10 + $0x10] sm:$0xff] %v2343_v33  ;;  %vm2677_vm10 = vcmp.lt.s32.totalorder %v2676_v39, 0  ;;  %v1617_v53 = vmul.u32 %v1615_v0, %v1591_v47  ;;  %v1619_v35 = vmul.u32 %v1615_v0, %v1592_v59  ;;  %v1620_v24 = vmul.u32 %v1616_v25, %v1592_v59 }
 0x1e1   :  { %v1496_v56 = vsel %vm2677_vm10, 0, %v2676_v39  ;;  %vm1603_vm11 = vc.u32 %v1595_v55, %v1599_v17  ;;  %v1605_v3 = vadd.s32 %v1599_v17, %v1595_v55  ;;  %v1621_v21 = vshll.u32 %v1618_v1, 16  ;;  %v852_v55 = vpop.f32.mrf.mxu0 }
 0x1e2   :  { %v1497_v10 = vsub.s32 32, %v1496_v56  ;;  %v1501_v34 = vsub.s32 4294967266, %v1496_v56  ;;  %v1604_v5 = vsel %vm1603_vm11, 1, %v2921_v44  ;;  %v1498_v11 = vshll.u32 %v1489_v8, %v1496_v56 }
 0x1e3   :  { %v1606_v45 = vadd.s32 %v1604_v5, %v1598_v57  ;;  %vm1607_vm12 = vc.u32 %v1605_v3, %v1601_v28  ;;  %vm1625_vm13 = vc.u32 %v1617_v53, %v1621_v21  ;;  %v1600_v51 = vshrl.u32 %v1596_v36, 16 }
 0x1e4   :  { %v1499_v22 = vshrl.u32 %v1481_v42, %v1497_v10  ;;  %v1502_v6 = vadd.s32 127, %v1501_v34  ;;  %v1608_v26 = vsel %vm1607_vm12, 1, %v2921_v44  ;;  %v1626_v38 = vsel %vm1625_vm13, 1, %v2921_v44 }
 0x1e5   :  { %v1610_v52 = vadd.s32 %v1608_v26, %v1606_v45  ;;  %vm1389_vm14 = vcmp.lt.s32.totalorder %v3706_v40, 0  ;;  %v1623_v47 = vshll.u32 %v1619_v35, 16  ;;  %v1627_v60 = vadd.s32 %v1621_v21, %v1617_v53 }
 0x1e6   :  { %v1500_v46 = vor.u32 %v1499_v22, %v1498_v11  ;;  %v1503_v58 = vshll.u32 %v1502_v6, 23  ;;  %v1628_v7 = vadd.s32 %v1626_v38, %v1620_v24  ;;  %v1511_v8 = vsub.s32 4, %v3867_v43 }
 0x1e7   :  { %v1611_v39 = vadd.s32 %v1610_v52, %v1600_v51  ;;  %v3924_v0 = vadd.f32 %v900_v18, %v3820_v50  ;;  %v1558_v59 = vshrl.u32 %v2915_v61, %v3839_v13  ;;  %v1579_v25 = vsel %vm1577_vm0, %v3863_v63, 2102212464 }
 0x1e8   :  { %v1504_v33 = vor.u32 4788187, %v1503_v58  ;;  %v1602_v36 = vshrl.u32 %v1597_v9, 16  ;;  %vm1629_vm15 = vc.u32 %v1627_v60, %v1623_v47  ;;  %v1507_v42 = vcvt.s32.f32 %v1500_v46 }
 0x1e9   :  { %v1630_v57 = vsel %vm1629_vm15, 1, %v2921_v44  ;;  %v1697_v56 = vand.u32 2147483647, %v3924_v0  ;;  %v1578_v18 = vsel %vm1574_vm3, %v1558_v59, %v3859_v27  ;;  %v1622_v28 = vshrl.u32 %v1618_v1, 16  ;;  %v854_v2 = vpop.f32.mrf.mxu0 }
 0x1ea   :  { %v1505_v17 = vand.u32 2147483647, %v1504_v33  ;;  %v1632_v3 = vadd.s32 %v1630_v57, %v1628_v7  ;;  %v1700_v13 = vand.u32 2139095040, %v3924_v0  ;;  %v1512_v63 = vsel %vm1389_vm14, %v1511_v8, %v3867_v43 }
 0x1eb   :  { %v1580_v9 = vsel %vm1576_vm4, %v3861_v16, %v1579_v25  ;;  %v1612_v34 = vadd.s32 %v1611_v39, %v1602_v36  ;;  %v1624_v5 = vshrl.u32 %v1619_v35, 16  ;;  %v1704_v27 = vand.u32 8388607, %v1697_v56 }
 0x1ec   :  { %v1508_v10 = vmul.f32 %v1507_v42, %v1505_v17  ;;  %v1633_v53 = vadd.s32 %v1632_v3, %v1622_v28  ;;  %v1701_v45 = vshrl.u32 %v1700_v13, 23  ;;  %vm3947_vm0 = vcmp.le.f32.partialorder %v1387_v29, 0.7853982 }
 0x1ed   :  { %v1631_v11 = vadd.s32 %v1627_v60, %v1623_v47  ;;  %v1514_v43 = vsel %vm3947_vm0, 0, %v1512_v63  ;;  %v1581_v16 = vsel %vm1575_vm7, %v1578_v18, %v1580_v9  ;;  %v3958_v26 = vadd.f32 %v852_v55, %v3370_v49 }
 0x1ee   :  { %v1509_v21 = vxor.u32 2147483648, %v1508_v10  ;;  %v1634_v35 = vadd.s32 %v1633_v53, %v1624_v5  ;;  %v2681_v22 = vadd.s32 4294967169, %v1701_v45  ;;  %v901_v29 = vperm.slane %v3913_v15, 6 }
 0x1ef   :  { %vm1637_vm1 = vc.u32 %v1612_v34, %v1631_v11  ;;  %v1705_v46 = vor.u32 8388608, %v1704_v27  ;;  %v1635_v38 = vmul.u32 %v3885_v4, %v1581_v16  ;;  %v1531_v47 = vadd.s32 3, %v1514_v43 }
 0x1f0   :  { %v1510_v6 = vsel %vm1389_vm14, %v1509_v21, %v1508_v10  ;;  %v1638_v24 = vadd.s32 1, %v1634_v35  ;;  %v1707_v58 = vadd.s32 1, %v2681_v22  ;;  %v3968_v25 = vadd.f32 %v901_v29, %v3958_v26 }
 0x1f1   :  { %v1513_v52 = vsel %vm3947_vm0, %v3706_v40, %v1510_v6  ;;  %v3965_v59 = vshll.u32 %v1705_v46, 8  ;;  %v1532_v42 = vand.u32 3, %v1531_v47  ;;  %v2326_v28 = vperm.slane %v3582_v41, 3 }
 0x1f2   :  { %v1515_v51 = vmul.f32 %v1513_v52, %v1513_v52  ;;  %v1639_v60 = vsel %vm1637_vm1, %v1638_v24, %v1634_v35  ;;  %vm1708_vm2 = vcmp.gt.s32.totalorder %v1707_v58, 0  ;;  %vm1544_vm3 = vcmp.lt.s32.totalorder %v3743_v62, 0 }
 0x1f3   :  { %v1640_v49 = vadd.s32 %v1639_v60, %v1635_v38  ;;  %v1709_v8 = vsel %vm1708_vm2, %v1707_v58, 0  ;;  %v3974_v13 = vadd.s32 %v1631_v11, %v1612_v34  ;;  %v3977_v10 = vand.u32 65535, %v3965_v59 }
 0x1f4   :  { %v1516_v7 = vmul.f32 -0.001358992, %v1515_v51  ;;  %v1523_v33 = vmul.f32 -0.00019511016, %v1515_v51  ;;  %v1711_v39 = vand.u32 31, %v1709_v8  ;;  %v3980_v45 = vshrl.u32 %v1709_v8, 5 }
 0x1f5   :  { %v1641_v17 = vadd.s32 536870912, %v1640_v49  ;;  %v1852_v63 = vand.u32 2147483647, %v3968_v25  ;;  %vm1534_vm4 = vcmp.eq.s32.totalorder %v1532_v42, 0  ;;  %vm1537_vm5 = vcmp.eq.s32.totalorder %v1532_v42, 2 }
 0x1f6   :  { %v1517_v36 = vadd.f32 0.041655596, %v1516_v7  ;;  %v1524_v55 = vadd.f32 0.008332121, %v1523_v33  ;;  %v3970_v57 = vsub.s32 32, %v1711_v39  ;;  %v1714_v27 = vshll.u32 %v2915_v61, %v1711_v39 }
 0x1f7   :  { %v1642_v3 = vshrl.u32 %v1641_v17, 30  ;;  %vm1533_vm6 = vcmp.lt.s32.totalorder %v1532_v42, 2  ;;  %vm3989_vm7 = vcmp.eq.s32.totalorder %v2326_v28, 1  ;;  %v1717_v22 = vshll.u32 %v2916_v19, %v1711_v39 }
 0x1f8   :  { %v1518_v4 = vmul.f32 %v1517_v36, %v1515_v51  ;;  %v1525_v18 = vmul.f32 %v1524_v55, %v1515_v51  ;;  %v1715_v1 = vshrl.u32 %v2916_v19, %v3970_v57  ;;  %v1718_v34 = vshrl.u32 %v2917_v54, %v3970_v57 }
 0x1f9   :  { %v1643_v53 = vshll.u32 %v1642_v3, 30  ;;  %v1724_v21 = vshrl.u32 %v2919_v30, %v3970_v57  ;;  %vm1530_vm8 = vweird.f32 %v3706_v40  ;;  %v1666_v6 = vsub.s32 4, %v1642_v3 }
 0x1fa   :  { %v1519_v9 = vadd.f32 -0.4999988, %v1518_v4  ;;  %v1526_v5 = vadd.f32 -0.16666654, %v1525_v18  ;;  %v1721_v29 = vshrl.u32 %v2918_v37, %v3970_v57  ;;  %v1723_v24 = vshll.u32 %v2918_v37, %v1711_v39 }
 0x1fb   :  { %v1644_v35 = vsub.s32 %v1640_v49, %v1643_v53  ;;  %v1727_v46 = vshrl.u32 %v2920_v14, %v3970_v57  ;;  %vm4002_vm10 = vcmp.le.f32.partialorder %v1542_v31, 0.7853982  ;;  %v1716_v47 = vor.u32 %v1715_v1, %v1714_v27 }
 0x1fc   :  { %v1520_v11 = vmul.f32 %v1519_v9, %v1515_v51  ;;  %v1527_v43 = vmul.f32 %v1526_v5, %v1515_v51  ;;  %v1719_v60 = vor.u32 %v1718_v34, %v1717_v22  ;;  %v1720_v7 = vshll.u32 %v2917_v54, %v1711_v39 }
 0x1fd   :  { %vm1645_vm9 = vcmp.lt.s32.totalorder %v1644_v35, 0  ;;  %v1646_v51 = vsub.s32 0, %v1644_v35  ;;  %v1725_v33 = vor.u32 %v1724_v21, %v1723_v24  ;;  %v1726_v55 = vshll.u32 %v2919_v30, %v1711_v39 }
 0x1fe   :  { %v1521_v58 = vadd.f32 1.0, %v1520_v11  ;;  %v1528_v2 = vadd.f32 1.0, %v1527_v43  ;;  %v1722_v4 = vor.u32 %v1721_v29, %v1720_v7  ;;  %v1747_v18 = vshrl.u32 %v3965_v59, 16 }
 0x1ff   :  { %v1647_v36 = vsel %vm1645_vm9, %v1646_v51, %v1644_v35  ;;  %v1855_v28 = vand.u32 2139095040, %v3968_v25  ;;  %v1667_v9 = vsel %vm1544_vm3, %v1666_v6, %v1642_v3  ;;  %v1728_v5 = vor.u32 %v1727_v46, %v1726_v55 }
 0x200   :  { %v1529_v49 = vmul.f32 %v1528_v2, %v1513_v52  ;;  %v1538_v8 = vxor.u32 2147483648, %v1521_v58  ;;  %v1648_v17 = vclz %v1647_v36  ;;  %vm1729_vm11 = vcmp.lt.s32.totalorder %v3980_v45, 1 }
 0x201   :  { %vm1730_vm12 = vcmp.lt.s32.totalorder %v3980_v45, 2  ;;  %vm1732_vm13 = vcmp.lt.s32.totalorder %v3980_v45, 4  ;;  %v1737_v52 = vsel %vm1729_vm11, %v1716_v47, %v1719_v60  ;;  %vm1731_vm14 = vcmp.lt.s32.totalorder %v3980_v45, 3 }
 0x202   :  { %v1535_v31 = vxor.u32 2147483648, %v1529_v49  ;;  %v2679_v53 = vadd.s32 4294967294, %v1648_v17  ;;  %v1539_v27 = vsel %vm1537_vm5, %v1538_v8, %v1529_v49  ;;  %v1738_v3 = vsel %vm1732_vm13, %v1725_v33, 920167782 }
 0x203   :  { %v1739_v34 = vsel %vm1731_vm14, %v1722_v4, %v1738_v3  ;;  %v1741_v21 = vsel %vm1729_vm11, %v1719_v60, %v1722_v4  ;;  %v1742_v6 = vsel %vm1732_vm13, %v1728_v5, 1326507024  ;;  %v1856_v46 = vshrl.u32 %v1855_v28, 23 }
 0x204   :  { %v1536_v39 = vsel %vm1534_vm4, %v1521_v58, %v1535_v31  ;;  %vm2680_vm15 = vcmp.lt.s32.totalorder %v2679_v53, 0  ;;  %v1740_v22 = vsel %vm1730_vm12, %v1737_v52, %v1739_v34  ;;  %v1669_v58 = vsel %vm4002_vm10, 0, %v1667_v9 }
 0x205   :  { %v1540_v1 = vsel %vm1533_vm6, %v1536_v39, %v1539_v27  ;;  %v1651_v43 = vsel %vm2680_vm15, 0, %v2679_v53  ;;  %v1743_v40 = vsel %vm1731_vm14, %v1725_v33, %v1742_v6  ;;  %v1770_v2 = vand.u32 65535, %v1740_v22 }
 0x206   :  { %v1541_v11 = vsel %vm1530_vm8, nan, %v1540_v1  ;;  %v1652_v29 = vsub.s32 32, %v1651_v43  ;;  %v1656_v24 = vsub.s32 4294967266, %v1651_v43  ;;  %v1771_v51 = vshrl.u32 %v1740_v22, 16 }
 0x207   :  { %v2344_v42 = vsel %vm3989_vm7, %v3549_v20, %v1541_v11  ;;  %v1653_v7 = vshll.u32 %v1644_v35, %v1651_v43  ;;  %v1744_v16 = vsel %vm1730_vm12, %v1741_v21, %v1743_v40  ;;  %v1734_v20 = vsel %vm1732_vm13, %v1722_v4, 2102212464 }
 0x208   :  { %2353 = vst [vmem:[#allocation10 + $0x18] sm:$0xff] %v2344_v42  ;;  %v1654_v49 = vshrl.u32 %v3974_v13, %v1652_v29  ;;  %v1657_v8 = vadd.s32 127, %v1656_v24  ;;  %v1748_v36 = vand.u32 65535, %v1744_v16  ;;  %v1749_v55 = vshrl.u32 %v1744_v16, 16  ;;  %v4059_v24 = vpop.f32.mrf.mxu1 }
 0x209   :  { %v4047_v17 = vand.u32 8388607, %v1852_v63  ;;  %v1713_v35 = vshrl.u32 %v2915_v61, %v3970_v57  ;;  %v1773_v13 = vmul.u32 %v1771_v51, %v3977_v10  ;;  %v1686_v31 = vadd.s32 3, %v1669_v58 }
 0x20a   :  { %v1655_v28 = vor.u32 %v1654_v49, %v1653_v7  ;;  %v1658_v33 = vshll.u32 %v1657_v8, 23  ;;  %v1751_v9 = vmul.u32 %v1749_v55, %v3977_v10  ;;  %v1752_v5 = vmul.u32 %v1748_v36, %v1747_v18 }
 0x20b   :  { %v1774_v53 = vmul.u32 %v1770_v2, %v1747_v18  ;;  %v1733_v4 = vsel %vm1729_vm11, %v1713_v35, %v1716_v47  ;;  %v1735_v39 = vsel %vm1731_vm14, %v1719_v60, %v1734_v20  ;;  %v2684_v27 = vadd.s32 4294967169, %v1856_v46 }
 0x20c   :  { %v1659_v52 = vor.u32 4788187, %v1658_v33  ;;  %v1750_v3 = vmul.u32 %v1748_v36, %v3977_v10  ;;  %v1753_v1 = vmul.u32 %v1749_v55, %v1747_v18  ;;  %v1754_v34 = vshll.u32 %v1751_v9, 16 }
 0x20d   :  { %v1772_v57 = vmul.u32 %v1770_v2, %v3977_v10  ;;  %v1662_v11 = vcvt.s32.f32 %v1655_v28  ;;  %v1775_v43 = vmul.u32 %v1771_v51, %v1747_v18  ;;  %v1776_v22 = vshll.u32 %v1773_v13, 16 }
 0x20e   :  { %v1660_v21 = vand.u32 2147483647, %v1659_v52  ;;  %v1756_v6 = vshll.u32 %v1752_v5, 16  ;;  %vm1758_vm0 = vc.u32 %v1750_v3, %v1754_v34  ;;  %v1760_v42 = vadd.s32 %v1754_v34, %v1750_v3 }
 0x20f   :  { %v1778_v29 = vshll.u32 %v1774_v53, 16  ;;  %v1759_v60 = vsel %vm1758_vm0, 1, %v2921_v44  ;;  %vm1780_vm1 = vc.u32 %v1772_v57, %v1776_v22  ;;  %v1782_v46 = vadd.s32 %v1776_v22, %v1772_v57 }
 0x210   :  { %v1663_v47 = vmul.f32 %v1662_v11, %v1660_v21  ;;  %v1761_v58 = vadd.s32 %v1759_v60, %v1753_v1  ;;  %vm1762_vm2 = vc.u32 %v1760_v42, %v1756_v6  ;;  %v1781_v40 = vsel %vm1780_vm1, 1, %v2921_v44  ;;  %v867_v21 = vpop.f32.mrf.mxu1 }
 0x211   :  { %v1862_v10 = vadd.s32 1, %v2684_v27  ;;  %v1763_v18 = vsel %vm1762_vm2, 1, %v2921_v44  ;;  %v1783_v51 = vadd.s32 %v1781_v40, %v1775_v43  ;;  %vm1784_vm4 = vc.u32 %v1782_v46, %v1778_v29 }
 0x212   :  { %v1664_v2 = vxor.u32 2147483648, %v1663_v47  ;;  %v1755_v7 = vshrl.u32 %v1751_v9, 16  ;;  %v1765_v49 = vadd.s32 %v1763_v18, %v1761_v58  ;;  %v1785_v8 = vsel %vm1784_vm4, 1, %v2921_v44 }
 0x213   :  { %vm1863_vm5 = vcmp.gt.s32.totalorder %v1862_v10, 0  ;;  %v1777_v20 = vshrl.u32 %v1773_v13, 16  ;;  %v1787_v36 = vadd.s32 %v1785_v8, %v1783_v51  ;;  %v1757_v33 = vshrl.u32 %v1752_v5, 16 }
 0x214   :  { %v1665_v16 = vsel %vm1544_vm3, %v1664_v2, %v1663_v47  ;;  %v1864_v55 = vsel %vm1863_vm5, %v1862_v10, 0  ;;  %v1766_v35 = vadd.s32 %v1765_v49, %v1755_v7  ;;  %v1736_v9 = vsel %vm1730_vm12, %v1733_v4, %v1735_v39 }
 0x215   :  { %v1668_v28 = vsel %vm4002_vm10, %v3743_v62, %v1665_v16  ;;  %v1866_v52 = vand.u32 31, %v1864_v55  ;;  %v1779_v3 = vshrl.u32 %v1774_v53, 16  ;;  %v1788_v1 = vadd.s32 %v1787_v36, %v1777_v20 }
 0x216   :  { %v1670_v27 = vmul.f32 %v1668_v28, %v1668_v28  ;;  %v4072_v34 = vadd.s32 %v1766_v35, %v1757_v33  ;;  %v4074_v57 = vadd.s32 %v1782_v46, %v1778_v29  ;;  %v4078_v38 = vand.u32 3, %v1686_v31 }
 0x217   :  { %v4076_v13 = vsub.s32 32, %v1866_v52  ;;  %v1789_v5 = vadd.s32 %v1788_v1, %v1779_v3  ;;  %v1790_v22 = vmul.u32 %v3965_v59, %v1736_v9  ;;  %v1860_v45 = vor.u32 8388608, %v4047_v17 }
 0x218   :  { %v1671_v11 = vmul.f32 -0.001358992, %v1670_v27  ;;  %v1678_v43 = vmul.f32 -0.00019511016, %v1670_v27  ;;  %vm1792_vm3 = vc.u32 %v4072_v34, %v4074_v57  ;;  %v4084_v53 = vshrl.u32 %v1864_v55, 5 }
 0x219   :  { %v1793_v6 = vadd.s32 1, %v1789_v5  ;;  %v1870_v42 = vshrl.u32 %v2916_v19, %v4076_v13  ;;  %v1873_v31 = vshrl.u32 %v2917_v54, %v4076_v13  ;;  %v1876_v29 = vshrl.u32 %v2918_v37, %v4076_v13 }
 0x21a   :  { %v1672_v4 = vadd.f32 0.041655596, %v1671_v11  ;;  %v1679_v39 = vadd.f32 0.008332121, %v1678_v43  ;;  %v1878_v59 = vshll.u32 %v2918_v37, %v1866_v52  ;;  %v1879_v47 = vshrl.u32 %v2919_v30, %v4076_v13 }
 0x21b   :  { %v1794_v46 = vsel %vm1792_vm3, %v1793_v6, %v1789_v5  ;;  %v1869_v58 = vshll.u32 %v2915_v61, %v1866_v52  ;;  %v1872_v10 = vshll.u32 %v2916_v19, %v1866_v52  ;;  %v1875_v2 = vshll.u32 %v2917_v54, %v1866_v52 }
 0x21c   :  { %v1673_v17 = vmul.f32 %v1672_v4, %v1670_v27  ;;  %v1680_v60 = vmul.f32 %v1679_v39, %v1670_v27  ;;  %v1795_v40 = vadd.s32 %v1794_v46, %v1790_v22  ;;  %v1880_v18 = vor.u32 %v1879_v47, %v1878_v59 }
 0x21d   :  { %v1881_v49 = vshll.u32 %v2919_v30, %v1866_v52  ;;  %v1882_v8 = vshrl.u32 %v2920_v14, %v4076_v13  ;;  %v4101_v20 = vor.u32 %v1870_v42, %v1869_v58  ;;  %v4103_v36 = vor.u32 %v1873_v31, %v1872_v10  ;;  %v4147_v58 = vpop.f32.mrf.mxu2 }
 0x21e   :  { %v1674_v51 = vadd.f32 -0.4999988, %v1673_v17  ;;  %v1681_v7 = vadd.f32 -0.16666654, %v1680_v60  ;;  %v1796_v16 = vadd.s32 536870912, %v1795_v40  ;;  %v4105_v55 = vor.u32 %v1876_v29, %v1875_v2 }
 0x21f   :  { %vm1688_vm6 = vcmp.lt.s32.totalorder %v4078_v38, 2  ;;  %v1883_v9 = vor.u32 %v1882_v8, %v1881_v49  ;;  %vm1887_vm7 = vcmp.lt.s32.totalorder %v4084_v53, 4  ;;  %vm1685_vm8 = vweird.f32 %v3743_v62 }
 0x220   :  { %v1675_v33 = vmul.f32 %v1674_v51, %v1670_v27  ;;  %v1682_v35 = vmul.f32 %v1681_v7, %v1670_v27  ;;  %vm1689_vm9 = vcmp.eq.s32.totalorder %v4078_v38, 0  ;;  %v2327_v52 = vperm.slane %v3582_v41, 4 }
 0x221   :  { %v4112_v3 = vshrl.u32 %v1796_v16, 30  ;;  %v1893_v1 = vsel %vm1887_vm7, %v1880_v18, 920167782  ;;  %vm1884_vm10 = vcmp.lt.s32.totalorder %v4084_v53, 1  ;;  %vm1886_vm11 = vcmp.lt.s32.totalorder %v4084_v53, 3 }
 0x222   :  { %v1676_v21 = vadd.f32 1.0, %v1675_v33  ;;  %v1683_v11 = vadd.f32 1.0, %v1682_v35  ;;  %v1892_v43 = vsel %vm1884_vm10, %v4101_v20, %v4103_v36  ;;  %v1894_v5 = vsel %vm1886_vm11, %v4105_v55, %v1893_v1 }
 0x223   :  { %v1798_v27 = vshll.u32 %v4112_v3, 30  ;;  %v4126_v22 = vshll.u32 %v1860_v45, 8  ;;  %v1896_v6 = vsel %vm1884_vm10, %v4103_v36, %v4105_v55  ;;  %v1897_v42 = vsel %vm1887_vm7, %v1883_v9, 1326507024 }
 0x224   :  { %v1684_v4 = vmul.f32 %v1683_v11, %v1668_v28  ;;  %v1693_v39 = vxor.u32 2147483648, %v1676_v21  ;;  %vm1692_vm12 = vcmp.eq.s32.totalorder %v4078_v38, 2  ;;  %vm1885_vm13 = vcmp.lt.s32.totalorder %v4084_v53, 2 }
 0x225   :  { %v1799_v31 = vsub.s32 %v1795_v40, %v1798_v27  ;;  %v1898_v29 = vsel %vm1886_vm11, %v1880_v18, %v1897_v42  ;;  %vm4138_vm14 = vcmp.eq.s32.totalorder %v2327_v52, 1  ;;  %v1895_v59 = vsel %vm1885_vm13, %v1892_v43, %v1894_v5 }
 0x226   :  { %v1690_v45 = vxor.u32 2147483648, %v1684_v4  ;;  %v1899_v47 = vsel %vm1885_vm13, %v1896_v6, %v1898_v29  ;;  %v1901_v60 = vand.u32 65535, %v4126_v22  ;;  %v1694_v10 = vsel %vm1692_vm12, %v1693_v39, %v1684_v4  ;;  %v880_v29 = vpop.f32.mrf.mxu2 }
 0x227   :  { %vm1800_vm15 = vcmp.lt.s32.totalorder %v1799_v31, 0  ;;  %v1801_v17 = vsub.s32 0, %v1799_v31  ;;  %v1903_v46 = vand.u32 65535, %v1899_v47  ;;  %v1902_v2 = vshrl.u32 %v4126_v22, 16 }
 0x228   :  { %v1691_v40 = vsel %vm1689_vm9, %v1676_v21, %v1690_v45  ;;  %v1904_v18 = vshrl.u32 %v1899_v47, 16  ;;  %v1925_v49 = vand.u32 65535, %v1895_v59  ;;  %v1926_v8 = vshrl.u32 %v1895_v59, 16 }
 0x229   :  { %v1695_v51 = vsel %vm1688_vm6, %v1691_v40, %v1694_v10  ;;  %v1802_v7 = vsel %vm1800_vm15, %v1801_v17, %v1799_v31  ;;  %v1907_v9 = vmul.u32 %v1903_v46, %v1902_v2  ;;  %v746_v52 = vadd.f32 %v3372_v32, %v3345_v23 }
 0x22a   :  { %v1696_v16 = vsel %vm1685_vm8, nan, %v1695_v51  ;;  %v1803_v33 = vclz %v1802_v7  ;;  %v1906_v35 = vmul.u32 %v1904_v18, %v1901_v60  ;;  %v1791_v38 = vadd.s32 %v4074_v57, %v4072_v34 }
 0x22b   :  { %v2345_v1 = vsel %vm4138_vm14, %v3731_v12, %v1696_v16  ;;  %v1905_v11 = vmul.u32 %v1903_v46, %v1901_v60  ;;  %v1868_v62 = vshrl.u32 %v2915_v61, %v4076_v13  ;;  %v1908_v43 = vmul.u32 %v1904_v18, %v1902_v2 }
 0x22c   :  { %2354 = vst [vmem:[#allocation10 + $0x20] sm:$0xff] %v2345_v1  ;;  %v2682_v21 = vadd.s32 4294967294, %v1803_v33  ;;  %v1909_v27 = vshll.u32 %v1906_v35, 16  ;;  %v1927_v5 = vmul.u32 %v1925_v49, %v1901_v60  ;;  %v1928_v4 = vmul.u32 %v1926_v8, %v1901_v60 }
 0x22d   :  { %v1911_v39 = vshll.u32 %v1907_v9, 16  ;;  %v1929_v6 = vmul.u32 %v1925_v49, %v1902_v2  ;;  %v1910_v45 = vshrl.u32 %v1906_v35, 16  ;;  %v1930_v13 = vmul.u32 %v1926_v8, %v1902_v2 }
 0x22e   :  { %vm2683_vm0 = vcmp.lt.s32.totalorder %v2682_v21, 0  ;;  %vm1913_vm1 = vc.u32 %v1905_v11, %v1909_v27  ;;  %v1915_v23 = vadd.s32 %v1909_v27, %v1905_v11  ;;  %v1931_v42 = vshll.u32 %v1928_v4, 16 }
 0x22f   :  { %v1806_v32 = vsel %vm2683_vm0, 0, %v2682_v21  ;;  %v1914_v12 = vsel %vm1913_vm1, 1, %v2921_v44  ;;  %v1933_v10 = vshll.u32 %v1929_v6, 16  ;;  %v1821_v16 = vsub.s32 4, %v4112_v3 }
 0x230   :  { %v1807_v34 = vsub.s32 32, %v1806_v32  ;;  %v1811_v57 = vsub.s32 4294967266, %v1806_v32  ;;  %v1916_v28 = vadd.s32 %v1914_v12, %v1908_v43  ;;  %v1808_v59 = vshll.u32 %v1799_v31, %v1806_v32 }
 0x231   :  { %vm1917_vm2 = vc.u32 %v1915_v23, %v1911_v39  ;;  %vm1935_vm4 = vc.u32 %v1927_v5, %v1931_v42  ;;  %v1937_v18 = vadd.s32 %v1931_v42, %v1927_v5  ;;  %v1889_v31 = vsel %vm1887_vm7, %v4105_v55, 2102212464 }
 0x232   :  { %v1809_v47 = vshrl.u32 %v1791_v38, %v1807_v34  ;;  %v1812_v17 = vadd.s32 127, %v1811_v57  ;;  %v1918_v60 = vsel %vm1917_vm2, 1, %v2921_v44  ;;  %v1936_v46 = vsel %vm1935_vm4, 1, %v2921_v44 }
 0x233   :  { %v1920_v40 = vadd.s32 %v1918_v60, %v1916_v28  ;;  %v1938_v51 = vadd.s32 %v1936_v46, %v1930_v13  ;;  %vm1699_vm5 = vcmp.lt.s32.totalorder %v3924_v0, 0  ;;  %v1888_v2 = vsel %vm1884_vm10, %v1868_v62, %v4101_v20 }
 0x234   :  { %v1810_v7 = vor.u32 %v1809_v47, %v1808_v59  ;;  %v1813_v49 = vshll.u32 %v1812_v17, 23  ;;  %vm1939_vm3 = vc.u32 %v1937_v18, %v1933_v10  ;;  %v1912_v35 = vshrl.u32 %v1907_v9, 16 }
 0x235   :  { %v1921_v8 = vadd.s32 %v1920_v40, %v1910_v45  ;;  %v1940_v1 = vsel %vm1939_vm3, 1, %v2921_v44  ;;  %v4178_v38 = vadd.f32 %v4059_v24, %v746_v52  ;;  %v1890_v21 = vsel %vm1886_vm11, %v4103_v36, %v1889_v31  ;;  %v2779_v36 = vld [vmem:[#allocation7 + $0x8] ss:$0 sm:$0xff] }
 0x236   :  { %v1814_v33 = vor.u32 4788187, %v1813_v49  ;;  %v1932_v55 = vshrl.u32 %v1928_v4, 16  ;;  %v1942_v11 = vadd.s32 %v1940_v1, %v1938_v51  ;;  %v902_v27 = vperm.slane %v3913_v15, 7 }
 0x237   :  { %v1817_v5 = vcvt.s32.f32 %v1810_v7  ;;  %v1822_v20 = vsel %vm1699_vm5, %v1821_v16, %v4112_v3  ;;  %v1922_v9 = vadd.s32 %v1921_v8, %v1912_v35  ;;  %v1934_v62 = vshrl.u32 %v1929_v6, 16 }
 0x238   :  { %v1815_v43 = vand.u32 2147483647, %v1814_v33  ;;  %v1943_v39 = vadd.s32 %v1942_v11, %v1932_v55  ;;  %v4188_v24 = vadd.f32 %v902_v27, %v4178_v38  ;;  %v4192_v52 = vadd.f32 %v4147_v58, %v3374_v48 }
 0x239   :  { %vm4196_vm6 = vcmp.le.f32.partialorder %v1697_v56, 0.7853982  ;;  %v1941_v23 = vadd.s32 %v1937_v18, %v1933_v10  ;;  %v1891_v3 = vsel %vm1885_vm13, %v1888_v2, %v1890_v21  ;;  %v2328_v11 = vperm.slane %v3582_v41, 5 }
 0x23a   :  { %v1818_v4 = vmul.f32 %v1817_v5, %v1815_v43  ;;  %v1944_v32 = vadd.s32 %v1943_v39, %v1934_v62  ;;  %v2007_v12 = vand.u32 2147483647, %v4188_v24  ;;  %v2010_v6 = vand.u32 2139095040, %v4188_v24 }
 0x23b   :  { %v1824_v48 = vsel %vm4196_vm6, 0, %v1822_v20  ;;  %vm1947_vm7 = vc.u32 %v1922_v9, %v1941_v23  ;;  %v4209_v34 = vadd.f32 %v2779_v36, %v4192_v52  ;;  %v1945_v57 = vmul.u32 %v4126_v22, %v1891_v3 }
 0x23c   :  { %v1819_v42 = vxor.u32 2147483648, %v1818_v4  ;;  %v1948_v58 = vadd.s32 1, %v1944_v32  ;;  %v2011_v56 = vshrl.u32 %v2010_v6, 23  ;;  %v2014_v29 = vand.u32 8388607, %v2007_v12 }
 0x23d   :  { %v1841_v28 = vadd.s32 3, %v1824_v48  ;;  %v2162_v40 = vand.u32 2147483647, %v4209_v34  ;;  %v2165_v10 = vand.u32 2139095040, %v4209_v34  ;;  %vm1854_vm10 = vcmp.lt.s32.totalorder %v3968_v25, 0 }
 0x23e   :  { %v1820_v53 = vsel %vm1699_vm5, %v1819_v42, %v1818_v4  ;;  %v1949_v59 = vsel %vm1947_vm7, %v1948_v58, %v1944_v32  ;;  %v2687_v13 = vadd.s32 4294967169, %v2011_v56  ;;  %v2015_v60 = vor.u32 8388608, %v2014_v29 }
 0x23f   :  { %v1823_v45 = vsel %vm4196_vm6, %v3924_v0, %v1820_v53  ;;  %v1950_v17 = vadd.s32 %v1949_v59, %v1945_v57  ;;  %v4219_v49 = vand.u32 3, %v1841_v28  ;;  %v2166_v35 = vshrl.u32 %v2165_v10, 23 }
 0x240   :  { %v1825_v47 = vmul.f32 %v1823_v45, %v1823_v45  ;;  %v2017_v46 = vadd.s32 1, %v2687_v13  ;;  %v4221_v33 = vshll.u32 %v2015_v60, 8  ;;  %v4225_v1 = vand.u32 8388607, %v2162_v40 }
 0x241   :  { %v1951_v7 = vadd.s32 536870912, %v1950_v17  ;;  %vm1847_vm9 = vcmp.eq.s32.totalorder %v4219_v49, 2  ;;  %vm1844_vm11 = vcmp.eq.s32.totalorder %v4219_v49, 0  ;;  %v1946_v39 = vadd.s32 %v1941_v23, %v1922_v9 }
 0x242   :  { %v1826_v18 = vmul.f32 -0.001358992, %v1825_v47  ;;  %v1833_v51 = vmul.f32 -0.00019511016, %v1825_v47  ;;  %vm2018_vm8 = vcmp.gt.s32.totalorder %v2017_v46, 0  ;;  %v4236_v36 = vand.u32 65535, %v4221_v33 }
 0x243   :  { %v1952_v31 = vshrl.u32 %v1951_v7, 30  ;;  %v2019_v2 = vsel %vm2018_vm8, %v2017_v46, 0  ;;  %v4238_v15 = vadd.s32 4294967169, %v2166_v35  ;;  %v2170_v4 = vor.u32 8388608, %v4225_v1 }
 0x244   :  { %v1827_v22 = vadd.f32 0.041655596, %v1826_v18  ;;  %v1834_v16 = vadd.f32 0.008332121, %v1833_v51  ;;  %v2021_v8 = vand.u32 31, %v2019_v2  ;;  %vm1843_vm12 = vcmp.lt.s32.totalorder %v4219_v49, 2 }
 0x245   :  { %v1953_v27 = vshll.u32 %v1952_v31, 30  ;;  %vm4242_vm13 = vcmp.eq.s32.totalorder %v2328_v11, 1  ;;  %vm1840_vm15 = vweird.f32 %v3924_v0  ;;  %v1976_v9 = vsub.s32 4, %v1952_v31 }
 0x246   :  { %v1828_v21 = vmul.f32 %v1827_v22, %v1825_v47  ;;  %v1835_v55 = vmul.f32 %v1834_v16, %v1825_v47  ;;  %v4228_v43 = vsub.s32 32, %v2021_v8  ;;  %v4249_v23 = vshrl.u32 %v2019_v2, 5 }
 0x247   :  { %v4232_v62 = vsub.s32 %v1950_v17, %v1953_v27  ;;  %v2024_v48 = vshll.u32 %v2915_v61, %v2021_v8  ;;  %v2027_v59 = vshll.u32 %v2916_v19, %v2021_v8  ;;  %vm4264_vm0 = vcmp.le.f32.partialorder %v1852_v63, 0.7853982 }
 0x248   :  { %v1829_v5 = vadd.f32 -0.4999988, %v1828_v21  ;;  %v1836_v20 = vadd.f32 -0.16666654, %v1835_v55  ;;  %v2025_v58 = vshrl.u32 %v2916_v19, %v4228_v43  ;;  %v2028_v57 = vshrl.u32 %v2917_v54, %v4228_v43 }
 0x249   :  { %vm1955_vm14 = vcmp.lt.s32.totalorder %v4232_v62, 0  ;;  %v1956_v42 = vsub.s32 0, %v4232_v62  ;;  %v2031_v13 = vshrl.u32 %v2918_v37, %v4228_v43  ;;  %v2033_v10 = vshll.u32 %v2918_v37, %v2021_v8 }
 0x24a   :  { %v1830_v3 = vmul.f32 %v1829_v5, %v1825_v47  ;;  %v1837_v32 = vmul.f32 %v1836_v20, %v1825_v47  ;;  %v2034_v47 = vshrl.u32 %v2919_v30, %v4228_v43  ;;  %v2037_v18 = vshrl.u32 %v2920_v14, %v4228_v43 }
 0x24b   :  { %v1957_v53 = vsel %vm1955_vm14, %v1956_v42, %v4232_v62  ;;  %v2026_v7 = vor.u32 %v2025_v58, %v2024_v48  ;;  %v2030_v22 = vshll.u32 %v2917_v54, %v2021_v8  ;;  %v2057_v16 = vshrl.u32 %v4221_v33, 16 }
 0x24c   :  { %v1831_v56 = vadd.f32 1.0, %v1830_v3  ;;  %v1838_v29 = vadd.f32 1.0, %v1837_v32  ;;  %v1958_v28 = vclz %v1957_v53  ;;  %v2035_v35 = vor.u32 %v2034_v47, %v2033_v10 }
 0x24d   :  { %v2036_v21 = vshll.u32 %v2919_v30, %v2021_v8  ;;  %v1977_v55 = vsel %vm1854_vm10, %v1976_v9, %v1952_v31  ;;  %v2032_v11 = vor.u32 %v2031_v13, %v2030_v22  ;;  %vm2039_vm2 = vcmp.lt.s32.totalorder %v4249_v23, 1 }
 0x24e   :  { %v1839_v17 = vmul.f32 %v1838_v29, %v1823_v45  ;;  %v1848_v60 = vxor.u32 2147483648, %v1831_v56  ;;  %v2685_v51 = vadd.s32 4294967294, %v1958_v28  ;;  %v2029_v45 = vor.u32 %v2028_v57, %v2027_v59 }
 0x24f   :  { %v2038_v20 = vor.u32 %v2037_v18, %v2036_v21  ;;  %vm2042_vm4 = vcmp.lt.s32.totalorder %v4249_v23, 4  ;;  %vm2041_vm5 = vcmp.lt.s32.totalorder %v4249_v23, 3  ;;  %vm2040_vm3 = vcmp.lt.s32.totalorder %v4249_v23, 2 }
 0x250   :  { %v1845_v2 = vxor.u32 2147483648, %v1839_v17  ;;  %v1849_v63 = vsel %vm1847_vm9, %v1848_v60, %v1839_v17  ;;  %vm2686_vm1 = vcmp.lt.s32.totalorder %v2685_v51, 0  ;;  %v2047_v31 = vsel %vm2039_vm2, %v2026_v7, %v2029_v45 }
 0x251   :  { %v1961_v5 = vsel %vm2686_vm1, 0, %v2685_v51  ;;  %v2048_v9 = vsel %vm2042_vm4, %v2035_v35, 920167782  ;;  %v2051_v29 = vsel %vm2039_vm2, %v2029_v45, %v2032_v11  ;;  %v2052_v53 = vsel %vm2042_vm4, %v2038_v20, 1326507024 }
 0x252   :  { %v1846_v27 = vsel %vm1844_vm11, %v1831_v56, %v1845_v2  ;;  %v1962_v32 = vsub.s32 32, %v1961_v5  ;;  %v1966_v8 = vsub.s32 4294967266, %v1961_v5  ;;  %v1963_v48 = vshll.u32 %v4232_v62, %v1961_v5 }
 0x253   :  { %v1850_v3 = vsel %vm1843_vm12, %v1846_v27, %v1849_v63  ;;  %v2049_v0 = vsel %vm2041_vm5, %v2032_v11, %v2048_v9  ;;  %v2172_v13 = vadd.s32 1, %v4238_v15  ;;  %v2023_v17 = vshrl.u32 %v2915_v61, %v4228_v43 }
 0x254   :  { %v1851_v42 = vsel %vm1840_vm15, nan, %v1850_v3  ;;  %v1964_v58 = vshrl.u32 %v1946_v39, %v1962_v32  ;;  %v1967_v56 = vadd.s32 127, %v1966_v8  ;;  %v2050_v62 = vsel %vm2040_vm3, %v2047_v31, %v2049_v0 }
 0x255   :  { %v2346_v49 = vsel %vm4242_vm13, %v3820_v50, %v1851_v42  ;;  %v1979_v50 = vsel %vm4264_vm0, 0, %v1977_v55  ;;  %v2053_v39 = vsel %vm2041_vm5, %v2035_v35, %v2052_v53  ;;  %v2080_v6 = vand.u32 65535, %v2050_v62 }
 0x256   :  { %2355 = vst [vmem:[#allocation10 + $0x28] sm:$0xff] %v2346_v49  ;;  %v1965_v57 = vor.u32 %v1964_v58, %v1963_v48  ;;  %v1968_v28 = vshll.u32 %v1967_v56, 23  ;;  %v2081_v59 = vshrl.u32 %v2050_v62, 16  ;;  %v2044_v60 = vsel %vm2042_vm4, %v2032_v11, 2102212464 }
 0x257   :  { %v2054_v10 = vsel %vm2040_vm3, %v2051_v29, %v2053_v39  ;;  %v1996_v18 = vadd.s32 3, %v1979_v50  ;;  %v2043_v15 = vsel %vm2039_vm2, %v2023_v17, %v2026_v7  ;;  %v2084_v63 = vmul.u32 %v2080_v6, %v2057_v16 }
 0x258   :  { %v1969_v47 = vor.u32 4788187, %v1968_v28  ;;  %v2058_v51 = vand.u32 65535, %v2054_v10  ;;  %v2059_v22 = vshrl.u32 %v2054_v10, 16  ;;  %v2083_v2 = vmul.u32 %v2081_v59, %v4236_v36 }
 0x259   :  { %v1972_v21 = vcvt.s32.f32 %v1965_v57  ;;  %v2045_v43 = vsel %vm2041_vm5, %v2029_v45, %v2044_v60  ;;  %v2082_v27 = vmul.u32 %v2080_v6, %v4236_v36  ;;  %v2085_v20 = vmul.u32 %v2081_v59, %v2057_v16 }
 0x25a   :  { %v1970_v35 = vand.u32 2147483647, %v1969_v47  ;;  %v2061_v55 = vmul.u32 %v2059_v22, %v4236_v36  ;;  %v2062_v11 = vmul.u32 %v2058_v51, %v2057_v16  ;;  %v2086_v3 = vshll.u32 %v2083_v2, 16 }
 0x25b   :  { %vm2173_vm6 = vcmp.gt.s32.totalorder %v2172_v13, 0  ;;  %v2060_v32 = vmul.u32 %v2058_v51, %v4236_v36  ;;  %v2063_v8 = vmul.u32 %v2059_v22, %v2057_v16  ;;  %v2088_v31 = vshll.u32 %v2084_v63, 16 }
 0x25c   :  { %v1973_v5 = vmul.f32 %v1972_v21, %v1970_v35  ;;  %v2064_v42 = vshll.u32 %v2061_v55, 16  ;;  %v2066_v7 = vshll.u32 %v2062_v11, 16  ;;  %vm2090_vm7 = vc.u32 %v2082_v27, %v2086_v3 }
 0x25d   :  { %v2092_v49 = vadd.s32 %v2086_v3, %v2082_v27  ;;  %v2091_v48 = vsel %vm2090_vm7, 1, %v2921_v44  ;;  %v2174_v58 = vsel %vm2173_vm6, %v2172_v13, 0  ;;  %v2087_v50 = vshrl.u32 %v2083_v2, 16 }
 0x25e   :  { %v1974_v9 = vxor.u32 2147483648, %v1973_v5  ;;  %vm2068_vm8 = vc.u32 %v2060_v32, %v2064_v42  ;;  %v2070_v45 = vadd.s32 %v2064_v42, %v2060_v32  ;;  %v2093_v29 = vadd.s32 %v2091_v48, %v2085_v20 }
 0x25f   :  { %v2069_v0 = vsel %vm2068_vm8, 1, %v2921_v44  ;;  %vm2094_vm9 = vc.u32 %v2092_v49, %v2088_v31  ;;  %v2046_v39 = vsel %vm2040_vm3, %v2043_v15, %v2045_v43  ;;  %v2065_v6 = vshrl.u32 %v2061_v55, 16 }
 0x260   :  { %v1975_v56 = vsel %vm1854_vm10, %v1974_v9, %v1973_v5  ;;  %v2071_v16 = vadd.s32 %v2069_v0, %v2063_v8  ;;  %vm2072_vm11 = vc.u32 %v2070_v45, %v2066_v7  ;;  %v2095_v53 = vsel %vm2094_vm9, 1, %v2921_v44 }
 0x261   :  { %v1978_v36 = vsel %vm4264_vm0, %v3968_v25, %v1975_v56  ;;  %v2073_v28 = vsel %vm2072_vm11, 1, %v2921_v44  ;;  %v2097_v62 = vadd.s32 %v2095_v53, %v2093_v29  ;;  %v2176_v13 = vand.u32 31, %v2174_v58 }
 0x262   :  { %v1980_v57 = vmul.f32 %v1978_v36, %v1978_v36  ;;  %v2075_v59 = vadd.s32 %v2073_v28, %v2071_v16  ;;  %v2089_v60 = vshrl.u32 %v2084_v63, 16  ;;  %v4334_v10 = vand.u32 3, %v1996_v18 }
 0x263   :  { %v2098_v46 = vadd.s32 %v2097_v62, %v2087_v50  ;;  %v2067_v51 = vshrl.u32 %v2062_v11, 16  ;;  %v4336_v35 = vsub.s32 32, %v2176_v13  ;;  %v2100_v5 = vmul.u32 %v4221_v33, %v2046_v39 }
 0x264   :  { %v1981_v47 = vmul.f32 -0.001358992, %v1980_v57  ;;  %v1988_v17 = vmul.f32 -0.00019511016, %v1980_v57  ;;  %v2076_v22 = vadd.s32 %v2075_v59, %v2065_v6  ;;  %v4341_v15 = vadd.s32 %v2092_v49, %v2088_v31 }
 0x265   :  { %v2099_v2 = vadd.s32 %v2098_v46, %v2089_v60  ;;  %v4343_v43 = vshrl.u32 %v2174_v58, 5  ;;  %v2180_v63 = vshrl.u32 %v2916_v19, %v4336_v35  ;;  %v2183_v20 = vshrl.u32 %v2917_v54, %v4336_v35 }
 0x266   :  { %v1982_v21 = vadd.f32 0.041655596, %v1981_v47  ;;  %v1989_v27 = vadd.f32 0.008332121, %v1988_v17  ;;  %v4339_v23 = vadd.s32 %v2076_v22, %v2067_v51  ;;  %v2179_v33 = vshll.u32 %v2915_v61, %v2176_v13 }
 0x267   :  { %v2103_v11 = vadd.s32 1, %v2099_v2  ;;  %v2182_v3 = vshll.u32 %v2916_v19, %v2176_v13  ;;  %v2186_v32 = vshrl.u32 %v2918_v37, %v4336_v35  ;;  %v2185_v9 = vshll.u32 %v2917_v54, %v2176_v13 }
 0x268   :  { %v1983_v18 = vmul.f32 %v1982_v21, %v1980_v57  ;;  %v1990_v55 = vmul.f32 %v1989_v27, %v1980_v57  ;;  %vm2102_vm10 = vc.u32 %v4339_v23, %v4341_v15  ;;  %v4356_v49 = vor.u32 %v2180_v63, %v2179_v33 }
 0x269   :  { %v2104_v31 = vsel %vm2102_vm10, %v2103_v11, %v2099_v2  ;;  %v2188_v45 = vshll.u32 %v2918_v37, %v2176_v13  ;;  %v2189_v48 = vshrl.u32 %v2919_v30, %v4336_v35  ;;  %v4361_v0 = vor.u32 %v2183_v20, %v2182_v3 }
 0x26a   :  { %v1984_v8 = vadd.f32 -0.4999988, %v1983_v18  ;;  %v1991_v42 = vadd.f32 -0.16666654, %v1990_v55  ;;  %v2105_v7 = vadd.s32 %v2104_v31, %v2100_v5  ;;  %v2192_v19 = vshrl.u32 %v2920_v14, %v4336_v35 }
 0x26b   :  { %v4365_v16 = vor.u32 %v2186_v32, %v2185_v9  ;;  %v2190_v53 = vor.u32 %v2189_v48, %v2188_v45  ;;  %v2191_v54 = vshll.u32 %v2919_v30, %v2176_v13  ;;  %v2329_v37 = vperm.slane %v3582_v41, 6 }
 0x26c   :  { %v1985_v58 = vmul.f32 %v1984_v8, %v1980_v57  ;;  %v1992_v56 = vmul.f32 %v1991_v42, %v1980_v57  ;;  %v2106_v29 = vadd.s32 536870912, %v2105_v7  ;;  %vm2194_vm12 = vcmp.lt.s32.totalorder %v4343_v43, 1 }
 0x26d   :  { %v2193_v57 = vor.u32 %v2192_v19, %v2191_v54  ;;  %vm2196_vm13 = vcmp.lt.s32.totalorder %v4343_v43, 3  ;;  %vm2197_vm14 = vcmp.lt.s32.totalorder %v4343_v43, 4  ;;  %v2202_v30 = vsel %vm2194_vm12, %v4356_v49, %v4361_v0 }
 0x26e   :  { %v1986_v28 = vadd.f32 1.0, %v1985_v58  ;;  %v1993_v50 = vadd.f32 1.0, %v1992_v56  ;;  %v4370_v62 = vshrl.u32 %v2106_v29, 30  ;;  %v2203_v6 = vsel %vm2197_vm14, %v2190_v53, 920167782 }
 0x26f   :  { %vm1998_vm15 = vcmp.lt.s32.totalorder %v4334_v10, 2  ;;  %vm1999_vm0 = vcmp.eq.s32.totalorder %v4334_v10, 0  ;;  %v2204_v13 = vsel %vm2196_vm13, %v4365_v16, %v2203_v6  ;;  %vm2002_vm1 = vcmp.eq.s32.totalorder %v4334_v10, 2 }
 0x270   :  { %v1994_v14 = vmul.f32 %v1993_v50, %v1978_v36  ;;  %v2003_v39 = vxor.u32 2147483648, %v1986_v28  ;;  %v2108_v59 = vshll.u32 %v4370_v62, 30  ;;  %vm2195_vm2 = vcmp.lt.s32.totalorder %v4343_v43, 2 }
 0x271   :  { %v4390_v47 = vshll.u32 %v2170_v4, 8  ;;  %v2205_v60 = vsel %vm2195_vm2, %v2202_v30, %v2204_v13  ;;  %v2206_v46 = vsel %vm2194_vm12, %v4361_v0, %v4365_v16  ;;  %v2207_v51 = vsel %vm2197_vm14, %v2193_v57, 1326507024 }
 0x272   :  { %v2000_v36 = vxor.u32 2147483648, %v1994_v14  ;;  %v2109_v17 = vsub.s32 %v2105_v7, %v2108_v59  ;;  %v2004_v21 = vsel %vm2002_vm1, %v2003_v39, %v1994_v14  ;;  %vm2338_vm4 = vcmp.eq.s32.totalorder %v2329_v37, 1 }
 0x273   :  { %v2208_v1 = vsel %vm2196_vm13, %v2190_v53, %v2207_v51  ;;  %vm1995_vm5 = vweird.f32 %v3968_v25  ;;  %v2211_v63 = vand.u32 65535, %v4390_v47  ;;  %v2236_v18 = vshrl.u32 %v2205_v60, 16 }
 0x274   :  { %v2001_v22 = vsel %vm1999_vm0, %v1986_v28, %v2000_v36  ;;  %vm2110_vm3 = vcmp.lt.s32.totalorder %v2109_v17, 0  ;;  %v2111_v27 = vsub.s32 0, %v2109_v17  ;;  %v2209_v5 = vsel %vm2195_vm2, %v2206_v46, %v2208_v1 }
 0x275   :  { %v2005_v4 = vsel %vm1998_vm15, %v2001_v22, %v2004_v21  ;;  %v2213_v20 = vand.u32 65535, %v2209_v5  ;;  %v2235_v33 = vand.u32 65535, %v2205_v60  ;;  %v2212_v25 = vshrl.u32 %v4390_v47, 16 }
 0x276   :  { %v2006_v2 = vsel %vm1995_vm5, nan, %v2005_v4  ;;  %v2112_v11 = vsel %vm2110_vm3, %v2111_v27, %v2109_v17  ;;  %v2214_v10 = vshrl.u32 %v2209_v5, 16  ;;  %v2238_v32 = vmul.u32 %v2236_v18, %v2211_v63 }
 0x277   :  { %v2347_v55 = vsel %vm2338_vm4, %v3958_v26, %v2006_v2  ;;  %v2113_v3 = vclz %v2112_v11  ;;  %v2217_v31 = vmul.u32 %v2213_v20, %v2212_v25  ;;  %v2101_v9 = vadd.s32 %v4341_v15, %v4339_v23 }
 0x278   :  { %2356 = vst [vmem:[#allocation10 + $0x30] sm:$0xff] %v2347_v55  ;;  %v2216_v42 = vmul.u32 %v2214_v10, %v2211_v63  ;;  %v2237_v7 = vmul.u32 %v2235_v33, %v2211_v63  ;;  %v2239_v45 = vmul.u32 %v2235_v33, %v2212_v25  ;;  %v2241_v48 = vshll.u32 %v2238_v32, 16 }
 0x279   :  { %v2688_v8 = vadd.s32 4294967294, %v2113_v3  ;;  %v2215_v26 = vmul.u32 %v2213_v20, %v2211_v63  ;;  %v2218_v58 = vmul.u32 %v2214_v10, %v2212_v25  ;;  %v2221_v29 = vshll.u32 %v2217_v31, 16 }
 0x27a   :  { %v2219_v56 = vshll.u32 %v2216_v42, 16  ;;  %v2240_v53 = vmul.u32 %v2236_v18, %v2212_v25  ;;  %v2243_v54 = vshll.u32 %v2239_v45, 16  ;;  %vm2245_vm8 = vc.u32 %v2237_v7, %v2241_v48 }
 0x27b   :  { %vm2689_vm6 = vcmp.lt.s32.totalorder %v2688_v8, 0  ;;  %v2247_v23 = vadd.s32 %v2241_v48, %v2237_v7  ;;  %v2246_v6 = vsel %vm2245_vm8, 1, %v2921_v44  ;;  %v2178_v46 = vshrl.u32 %v2915_v61, %v4336_v35 }
 0x27c   :  { %v2116_v19 = vsel %vm2689_vm6, 0, %v2688_v8  ;;  %vm2223_vm7 = vc.u32 %v2215_v26, %v2219_v56  ;;  %v2225_v14 = vadd.s32 %v2219_v56, %v2215_v26  ;;  %v2248_v59 = vadd.s32 %v2246_v6, %v2240_v53 }
 0x27d   :  { %v2117_v28 = vsub.s32 32, %v2116_v19  ;;  %v2118_v50 = vshll.u32 %v2109_v17, %v2116_v19  ;;  %v2121_v37 = vsub.s32 4294967266, %v2116_v19  ;;  %v2224_v57 = vsel %vm2223_vm7, 1, %v2921_v44 }
 0x27e   :  { %v2226_v30 = vadd.s32 %v2224_v57, %v2218_v58  ;;  %vm2227_vm9 = vc.u32 %v2225_v14, %v2221_v29  ;;  %vm2249_vm11 = vc.u32 %v2247_v23, %v2243_v54  ;;  %v2199_v17 = vsel %vm2197_vm14, %v4365_v16, 2102212464 }
 0x27f   :  { %v2119_v15 = vshrl.u32 %v2101_v9, %v2117_v28  ;;  %v2122_v39 = vadd.s32 127, %v2121_v37  ;;  %v2228_v60 = vsel %vm2227_vm9, 1, %v2921_v44  ;;  %v2220_v51 = vshrl.u32 %v2216_v42, 16 }
 0x280   :  { %v2230_v22 = vadd.s32 %v2228_v60, %v2226_v30  ;;  %v2250_v21 = vsel %vm2249_vm11, 1, %v2921_v44  ;;  %v2242_v4 = vshrl.u32 %v2238_v32, 16  ;;  %v2198_v2 = vsel %vm2194_vm12, %v2178_v46, %v4356_v49 }
 0x281   :  { %v2120_v13 = vor.u32 %v2119_v15, %v2118_v50  ;;  %v2123_v36 = vshll.u32 %v2122_v39, 23  ;;  %v2252_v27 = vadd.s32 %v2250_v21, %v2248_v59  ;;  %v2200_v16 = vsel %vm2196_vm13, %v4361_v0, %v2199_v17 }
 0x282   :  { %v2222_v5 = vshrl.u32 %v2217_v31, 16  ;;  %v2231_v63 = vadd.s32 %v2230_v22, %v2220_v51  ;;  %v2244_v61 = vshrl.u32 %v2239_v45, 16  ;;  %v2251_v20 = vadd.s32 %v2247_v23, %v2243_v54 }
 0x283   :  { %v2124_v1 = vor.u32 4788187, %v2123_v36  ;;  %v2127_v55 = vcvt.s32.f32 %v2120_v13  ;;  %v2253_v35 = vadd.s32 %v2252_v27, %v2242_v4  ;;  %v2201_v3 = vsel %vm2195_vm2, %v2198_v2, %v2200_v16 }
 0x284   :  { %v2232_v11 = vadd.s32 %v2231_v63, %v2222_v5  ;;  %vm2009_vm12 = vcmp.lt.s32.totalorder %v4188_v24, 0  ;;  %v2255_v0 = vmul.u32 %v4390_v47, %v2201_v3  ;;  %vm4433_vm13 = vcmp.le.f32.partialorder %v2007_v12, 0.7853982 }
 0x285   :  { %v2125_v18 = vand.u32 2147483647, %v2124_v1  ;;  %v2254_v25 = vadd.s32 %v2253_v35, %v2244_v61  ;;  %v2131_v42 = vsub.s32 4, %v4370_v62  ;;  %v2330_v13 = vperm.slane %v3582_v41, 7 }
 0x286   :  { %vm2257_vm10 = vc.u32 %v2232_v11, %v2251_v20  ;;  %v2256_v51 = vadd.s32 %v2251_v20, %v2232_v11  ;;  %vm2150_vm5 = vweird.f32 %v4188_v24  ;;  %vm2164_vm3 = vcmp.lt.s32.totalorder %v4209_v34, 0 }
 0x287   :  { %v2128_v33 = vmul.f32 %v2127_v55, %v2125_v18  ;;  %v2258_v49 = vadd.s32 1, %v2254_v25  ;;  %v2132_v48 = vsel %vm2009_vm12, %v2131_v42, %v4370_v62  ;;  %vm2339_vm4 = vcmp.eq.s32.totalorder %v2330_v13, 1 }
 0x288   :  { %v2134_v19 = vsel %vm4433_vm13, 0, %v2132_v48  ;;  %vm4450_vm6 = vcmp.le.f32.partialorder %v2162_v40, 0.7853982 }
 0x289   :  { %v2129_v10 = vxor.u32 2147483648, %v2128_v33  ;;  %v2259_v31 = vsel %vm2257_vm10, %v2258_v49, %v2254_v25  ;;  %v2151_v57 = vadd.s32 3, %v2134_v19 }
 0x28a   :  { %v2260_v9 = vadd.s32 %v2259_v31, %v2255_v0 }
 0x28b   :  { %v2130_v8 = vsel %vm2009_vm12, %v2129_v10, %v2128_v33  ;;  %v2152_v6 = vand.u32 3, %v2151_v57  ;;  %vm2305_vm12 = vweird.f32 %v4209_v34 }
 0x28c   :  { %v2133_v43 = vsel %vm4433_vm13, %v4188_v24, %v2130_v8  ;;  %v2261_v45 = vadd.s32 536870912, %v2260_v9 }
 0x28d   :  { %v2135_v7 = vmul.f32 %v2133_v43, %v2133_v43  ;;  %vm2153_vm15 = vcmp.lt.s32.totalorder %v2152_v6, 2  ;;  %vm2154_vm0 = vcmp.eq.s32.totalorder %v2152_v6, 0  ;;  %vm2157_vm2 = vcmp.eq.s32.totalorder %v2152_v6, 2 }
 0x28e   :  { %v2262_v58 = vshrl.u32 %v2261_v45, 30 }
 0x28f   :  { %v2136_v47 = vmul.f32 -0.001358992, %v2135_v7  ;;  %v2143_v26 = vmul.f32 -0.00019511016, %v2135_v7 }
 0x290   :  { %v2263_v29 = vshll.u32 %v2262_v58, 30  ;;  %v2286_v10 = vsub.s32 4, %v2262_v58 }
 0x291   :  { %v2137_v12 = vadd.f32 0.041655596, %v2136_v47  ;;  %v2144_v56 = vadd.f32 0.008332121, %v2143_v26 }
 0x292   :  { %v2264_v28 = vsub.s32 %v2260_v9, %v2263_v29  ;;  %v2287_v8 = vsel %vm2164_vm3, %v2286_v10, %v2262_v58 }
 0x293   :  { %v2138_v53 = vmul.f32 %v2137_v12, %v2135_v7  ;;  %v2145_v54 = vmul.f32 %v2144_v56, %v2135_v7  ;;  %v2289_v9 = vsel %vm4450_vm6, 0, %v2287_v8 }
 0x294   :  { %vm2265_vm14 = vcmp.lt.s32.totalorder %v2264_v28, 0  ;;  %v2266_v14 = vsub.s32 0, %v2264_v28  ;;  %v2306_v47 = vadd.s32 3, %v2289_v9 }
 0x295   :  { %v2139_v50 = vadd.f32 -0.4999988, %v2138_v53  ;;  %v2146_v37 = vadd.f32 -0.16666654, %v2145_v54 }
 0x296   :  { %v2267_v62 = vsel %vm2265_vm14, %v2266_v14, %v2264_v28  ;;  %v2307_v53 = vand.u32 3, %v2306_v47 }
 0x297   :  { %v2140_v23 = vmul.f32 %v2139_v50, %v2135_v7  ;;  %v2147_v15 = vmul.f32 %v2146_v37, %v2135_v7  ;;  %v2268_v59 = vclz %v2267_v62 }
 0x298   :  { %vm2309_vm8 = vcmp.eq.s32.totalorder %v2307_v53, 0  ;;  %vm2312_vm9 = vcmp.eq.s32.totalorder %v2307_v53, 2  ;;  %vm2308_vm11 = vcmp.lt.s32.totalorder %v2307_v53, 2 }
 0x299   :  { %v2141_v39 = vadd.f32 1.0, %v2140_v23  ;;  %v2148_v30 = vadd.f32 1.0, %v2147_v15  ;;  %v2691_v60 = vadd.s32 4294967294, %v2268_v59 }
 0x29b   :  { %v2149_v36 = vmul.f32 %v2148_v30, %v2133_v43  ;;  %v2158_v17 = vxor.u32 2147483648, %v2141_v39  ;;  %vm2692_vm1 = vcmp.lt.s32.totalorder %v2691_v60, 0  ;;  %v2318_v43 = vld [vmem:[#allocation8 + $0x8] sm:$0x1] }
 0x29c   :  { %v2271_v22 = vsel %vm2692_vm1, 0, %v2691_v60  ;;  %vm2320_vm7 = vcmp.ne.f32.partialorder %v2318_v43, 0.0 }
 0x29d   :  { %v2155_v46 = vxor.u32 2147483648, %v2149_v36  ;;  %v2159_v1 = vsel %vm2157_vm2, %v2158_v17, %v2149_v36  ;;  %v2272_v4 = vsub.s32 32, %v2271_v22  ;;  %v2276_v27 = vsub.s32 4294967266, %v2271_v22 }
 0x29e   :  { %v2273_v41 = vshll.u32 %v2264_v28, %v2271_v22  ;;  %v2322_v56 = vsel %vm2320_vm7, 1, %v2921_v44 }
 0x29f   :  { %v2156_v21 = vsel %vm2154_vm0, %v2141_v39, %v2155_v46  ;;  %v2274_v5 = vshrl.u32 %v2256_v51, %v2272_v4  ;;  %v2277_v63 = vadd.s32 127, %v2276_v27  ;;  %v2331_v28 = vperm.slane %v2322_v56, 0 }
 0x2a0   :  { %v2160_v2 = vsel %vm2153_vm15, %v2156_v21, %v2159_v1 }
 0x2a1   :  { %v2161_v16 = vsel %vm2150_vm5, nan, %v2160_v2  ;;  %v2275_v55 = vor.u32 %v2274_v5, %v2273_v41  ;;  %v2278_v61 = vshll.u32 %v2277_v63, 23  ;;  %vm2340_vm10 = vcmp.eq.s32.totalorder %v2331_v28, 1 }
 0x2a2   :  { %v2348_v18 = vsel %vm2339_vm4, %v4178_v38, %v2161_v16 }
 0x2a3   :  { %2357 = vst [vmem:[#allocation10 + $0x38] sm:$0xff] %v2348_v18  ;;  %v2279_v35 = vor.u32 4788187, %v2278_v61  ;;  %v2282_v11 = vcvt.s32.f32 %v2275_v55 }
 0x2a5   :  { %v2280_v33 = vand.u32 2147483647, %v2279_v35 }
 0x2a7   :  { %v2283_v20 = vmul.f32 %v2282_v11, %v2280_v33 }
 0x2a9   :  { %v2284_v3 = vxor.u32 2147483648, %v2283_v20 }
 0x2ab   :  { %v2285_v25 = vsel %vm2164_vm3, %v2284_v3, %v2283_v20 }
 0x2ac   :  { %v2288_v38 = vsel %vm4450_vm6, %v4209_v34, %v2285_v25 }
 0x2ad   :  { %v2290_v49 = vmul.f32 %v2288_v38, %v2288_v38 }
 0x2af   :  { %v2291_v0 = vmul.f32 -0.001358992, %v2290_v49  ;;  %v2298_v32 = vmul.f32 -0.00019511016, %v2290_v49 }
 0x2b1   :  { %v2292_v42 = vadd.f32 0.041655596, %v2291_v0  ;;  %v2299_v31 = vadd.f32 0.008332121, %v2298_v32 }
 0x2b3   :  { %v2293_v40 = vmul.f32 %v2292_v42, %v2290_v49  ;;  %v2300_v7 = vmul.f32 %v2299_v31, %v2290_v49 }
 0x2b5   :  { %v2294_v45 = vadd.f32 -0.4999988, %v2293_v40  ;;  %v2301_v48 = vadd.f32 -0.16666654, %v2300_v7 }
 0x2b7   :  { %v2295_v26 = vmul.f32 %v2294_v45, %v2290_v49  ;;  %v2302_v12 = vmul.f32 %v2301_v48, %v2290_v49 }
 0x2b9   :  { %v2296_v19 = vadd.f32 1.0, %v2295_v26  ;;  %v2303_v29 = vadd.f32 1.0, %v2302_v12 }
 0x2bb   :  { %v2304_v58 = vmul.f32 %v2303_v29, %v2288_v38  ;;  %v2313_v54 = vxor.u32 2147483648, %v2296_v19 }
 0x2bd   :  { %v2310_v50 = vxor.u32 2147483648, %v2304_v58  ;;  %v2314_v57 = vsel %vm2312_vm9, %v2313_v54, %v2304_v58 }
 0x2bf   :  { %v2311_v37 = vsel %vm2309_vm8, %v2296_v19, %v2310_v50 }
 0x2c0   :  { %v2315_v44 = vsel %vm2308_vm11, %v2311_v37, %v2314_v57 }
 0x2c1   :  { %v2316_v14 = vsel %vm2305_vm12, nan, %v2315_v44 }
 0x2c2   :  { %v2349_v23 = vsel %vm2340_vm10, %v4192_v52, %v2316_v14 }
 0x2c3   :  { %2358 = vst [vmem:[#allocation10 + $0x40] sm:$0xff] %v2349_v23 }
 0x2c4   :  { %2369 = dma.vmem_to_hbm [thread:$0]  %s2365_s3, 1152, %s2367_s11, [#allocation4]  }
 0x2c5   :  { %2907 = dma.done.wait [#allocation4], 1152  }
 0x2c6   :  { %2908 = vsyncadd [#allocation4], 4294966144 }
 0x2c7   :  { %2374 = vsyncpa [#allocation3], 1 }
 0x2c8   :  { %2375 = vsyncpa [#allocation6], 1 }
 0x2c9   :  { %2376 = vsyncpa [#allocation9], 1 }
 0x2ca   :  { %2377 = vsyncpa [#allocation4], 1 }

</bundles_post_ra>
